<compile_context>
chip_gen: v7x
topology: tpu7x:2x2x1
jax: 0.10.0
libtpu: 0.0.40
codegen_flags: <defaults>
</compile_context>

<pallas_src>
import functools

import jax
import jax.numpy as jnp
from jax import lax
from jax.experimental import pallas as pl
from jax.experimental.pallas import tpu as pltpu

KSIZE = 7
PAD = (KSIZE - 1) // 2
BN_EPS = 1e-5


@functools.lru_cache(maxsize=None)
def _roll_convention():
    """One-time probe of pltpu.roll's rotation direction.

    Returns +1 if pltpu.roll matches jnp.roll (out[i] = x[i - shift]),
    -1 if it is the reverse, 0 if it cannot be determined (the kernel then
    falls back to plain lane slices, which are always correct).
    """
    def probe(x_ref, o_ref):
        o_ref[...] = pltpu.roll(x_ref[...], shift=1, axis=1)

    try:
        x = lax.broadcasted_iota(jnp.float32, (8, 128), 1)
        y = jax.device_get(
            pl.pallas_call(
                probe,
                out_shape=jax.ShapeDtypeStruct((8, 128), jnp.float32))(x))
        if float(y[0, 1]) == 0.0 and float(y[0, 0]) == 127.0:
            return 1
        if float(y[0, 1]) == 2.0 and float(y[0, 0]) == 1.0:
            return -1
    except Exception:
        pass
    return 0


def _vmem_limit_bytes():
    # v5e/v6e: 128 MiB physical VMEM, v7x: 64 MiB.  Take ~3/4 of physical,
    # capped at 100 MiB, so larger tiles / deeper buffering are possible on
    # v5e/v6e while leaving headroom on v7x.
    try:
        phys = pltpu.get_tpu_info().vmem_capacity_bytes
    except Exception:
        phys = 64 * 1024 * 1024
    return int(min(phys * 3 // 4, 100 * 1024 * 1024))


def cbam_kernel(x_ref, w1_ref, w2t_ref, b2_ref, b1_ref, cw_ref, bn_ref,
                o_ref, pad_ref, *, roll_sign):
    """One batch element: x_ref block is (1, H, W, C), channels on lanes."""
    x = x_ref[0]                                    # (H, W, C) f32
    H, W, C = x.shape
    Cr = w1_ref.shape[0]
    PW = pad_ref.shape[2]                           # lane extent (>= W + 2*PAD)

    # ---------------- Channel gate ----------------
    # Global avg / max pooling over the spatial (non-lane) axes.
    avg_row = jnp.mean(jnp.mean(x, axis=0), axis=0, keepdims=True)   # (1, C)
    max_row = jnp.max(jnp.max(x, axis=0), axis=0, keepdims=True)     # (1, C)

    # Shared MLP (Linear C->C/r, ReLU, Linear C/r->C), evaluated on the VPU in
    # exact f32: with C/r tiny the MXU tile would be >95% padding and purely
    # serial latency on the critical path.  Because the second layer is linear:
    #   mlp(avg)+mlp(max) = sum_r [relu(avg.w1_r+b1_r)+relu(max.w1_r+b1_r)]*w2_r
    #                       + 2*b2
    # TODO(synk): switch back to a single DEFAULT-precision jnp.dot when C/r is
    #             large enough to fill an MXU pass.
    att = 2.0 * b2_ref[...]                                           # (1, C)
    for r in range(Cr):
        w1r = w1_ref[r:r + 1, :]                                      # (1, C)
        ha = jnp.sum(avg_row * w1r, axis=1, keepdims=True) + b1_ref[r]
        hm = jnp.sum(max_row * w1r, axis=1, keepdims=True) + b1_ref[r]
        hsum = jnp.maximum(ha, 0.0) + jnp.maximum(hm, 0.0)            # (1, 1)
        att = att + hsum * w2t_ref[r:r + 1, :]                        # (1, C)
    cscale = jax.nn.sigmoid(att)                                      # (1, C)
    x1 = x * cscale                                                   # (H, W, C)

    # ---------------- Spatial gate ----------------
    # ChannelPool: max / mean over the channel (lane) axis -> dense (H, W)
    # maps with W on the lane axis.
    max2d = jnp.max(x1, axis=2)                     # (H, W)
    mean2d = jnp.mean(x1, axis=2)                   # (H, W)

    # Zero-padded staging buffer for the 7x7 "same" convolution.  The interior
    # is fully overwritten every step, so only the four halo strips are
    # (re-)zeroed; doing it every step is megacore-safe.  Lanes beyond
    # W + 2*PAD never reach the output (see the combine below) and may hold
    # stale data without affecting correctness.
    zrows = jnp.zeros((PAD, PW), jnp.float32)
    zcols = jnp.zeros((H, PAD), jnp.float32)
    for c in range(2):
        pad_ref[c, 0:PAD, :] = zrows
        pad_ref[c, PAD + H:2 * PAD + H, :] = zrows
        pad_ref[c, PAD:PAD + H, 0:PAD] = zcols
        pad_ref[c, PAD:PAD + H, PAD + W:PAD + W + PAD] = zcols
    pad_ref[0, PAD:PAD + H, PAD:PAD + W] = max2d
    pad_ref[1, PAD:PAD + H, PAD:PAD + W] = mean2d

    # Conv2d(2 -> 1, kernel 7x7, stride 1, pad 3, no bias), regrouped so only
    # one sublane-shifted row is live at a time:
    #   partial[dx][h, :] = sum_{c, dy} k[c, dy, dx] * padded[c, h+dy, :]
    #   out[h, w]         = sum_dx partial[dx][h, w + dx]
    # -> 14 sublane-shifted row reads, 98 full-width FMAs, 7 live partials.
    partial = [None] * KSIZE
    for c in range(2):
        base = c * KSIZE * KSIZE
        for dy in range(KSIZE):
            row = pad_ref[c, dy:dy + H, :]          # (H, PW)
            for dx in range(KSIZE):
                contrib = row * cw_ref[base + dy * KSIZE + dx]
                partial[dx] = contrib if partial[dx] is None \
                    else partial[dx] + contrib

    # Combine the per-dx partials.  Preferred path: one XLU rotate per dx plus
    # a single aligned [:, :W] slice; fallback: misaligned lane slices.
    if roll_sign == 0:
        y = partial[0][:, :W]
        for dx in range(1, KSIZE):
            y = y + partial[dx][:, dx:dx + W]
    else:
        y_wide = partial[0]
        for dx in range(1, KSIZE):
            y_wide = y_wide + pltpu.roll(
                partial[dx], shift=(roll_sign * -dx) % PW, axis=1)
        y = y_wide[:, :W]

    # Folded inference BatchNorm:  y * scale + bias, then sigmoid.
    y = y * bn_ref[0] + bn_ref[1]                   # (H, W)
    sscale = jax.nn.sigmoid(y)                      # (H, W)

    # Broadcast the spatial scale back over the channel (lane) axis.
    o_ref[0] = (x1 * sscale[:, :, None]).astype(o_ref.dtype)


def cbam_pallas(x_nhwc, params):
    B, H, W, C = x_nhwc.shape
    Cr = params["w1"].shape[0]
    PW = pl.cdiv(W + 2 * PAD, 128) * 128            # lane-aligned pad width

    # Plain-JAX glue: parameter reshapes / BN folding.
    w1 = params["w1"].astype(jnp.float32)                   # (Cr, C)
    w2t = params["w2"].T.astype(jnp.float32)                # (Cr, C)
    b1 = params["b1"].astype(jnp.float32)                   # (Cr,)  -> SMEM
    b2 = params["b2"].reshape(1, C).astype(jnp.float32)     # (1, C)
    cw = params["cw"].reshape(-1).astype(jnp.float32)       # (2*7*7,) -> SMEM
    bn_scale = params["bn_gamma"] / jnp.sqrt(params["bn_var"] + BN_EPS)
    bn_bias = params["bn_beta"] - params["bn_mean"] * bn_scale
    bn = jnp.concatenate([bn_scale, bn_bias]).astype(jnp.float32)   # (2,)

    kernel = functools.partial(cbam_kernel, roll_sign=_roll_convention())

    return pl.pallas_call(
        kernel,
        out_shape=jax.ShapeDtypeStruct((B, H, W, C), x_nhwc.dtype),
        grid=(B,),
        in_specs=[
            pl.BlockSpec((1, H, W, C), lambda b: (b, 0, 0, 0)),   # x
            pl.BlockSpec((Cr, C), lambda b: (0, 0)),              # w1
            pl.BlockSpec((Cr, C), lambda b: (0, 0)),              # w2^T
            pl.BlockSpec((1, C), lambda b: (0, 0)),               # b2
            pl.BlockSpec(memory_space=pltpu.MemorySpace.SMEM),    # b1
            pl.BlockSpec(memory_space=pltpu.MemorySpace.SMEM),    # conv w flat
            pl.BlockSpec(memory_space=pltpu.MemorySpace.SMEM),    # bn scale/bias
        ],
        out_specs=pl.BlockSpec((1, H, W, C), lambda b: (b, 0, 0, 0)),
        scratch_shapes=[
            pltpu.VMEM((2, H + 2 * PAD, PW), jnp.float32),
        ],
        compiler_params=pltpu.CompilerParams(
            dimension_semantics=("parallel",),          # shard batch over cores
            vmem_limit_bytes=_vmem_limit_bytes()),
    )(x_nhwc, w1, w2t, b2, b1, cw, bn)


def cbam_reference(x_nchw, params):
    """Pure-JAX reference mirroring the PyTorch forward (NCHW)."""
    def mlp(v):
        h = jnp.maximum(
            jnp.dot(v, params["w1"].T, precision=lax.Precision.HIGHEST)
            + params["b1"], 0.0)
        return jnp.dot(h, params["w2"].T,
                       precision=lax.Precision.HIGHEST) + params["b2"]

    avg = jnp.mean(x_nchw, axis=(2, 3))
    mx = jnp.max(x_nchw, axis=(2, 3))
    att = mlp(avg) + mlp(mx)
    cs = jax.nn.sigmoid(att)[:, :, None, None]
    x1 = x_nchw * cs

    comp = jnp.stack([jnp.max(x1, axis=1), jnp.mean(x1, axis=1)], axis=1)
    conv = lax.conv_general_dilated(
        comp, params["cw"], window_strides=(1, 1),
        padding=((PAD, PAD), (PAD, PAD)),
        dimension_numbers=("NCHW", "OIHW", "NCHW"),
        precision=lax.Precision.HIGHEST)
    g = params["bn_gamma"][None, :, None, None]
    b = params["bn_beta"][None, :, None, None]
    m = params["bn_mean"][None, :, None, None]
    v = params["bn_var"][None, :, None, None]
    bnv = (conv - m) / jnp.sqrt(v + BN_EPS) * g + b
    ss = jax.nn.sigmoid(bnv)
    return x1 * ss


if __name__ == "__main__":
    B, C, H, W = 2, 32, 16, 16          # gate_channels=32, reduction_ratio=16
    R = 16
    Cr = C // R

    key = jax.random.PRNGKey(0)
    kx, k1, k2, k3, k4, k5 = jax.random.split(key, 6)
    x_nchw = jax.random.normal(kx, (B, C, H, W), jnp.float32)

    params = dict(
        w1=0.2 * jax.random.normal(k1, (Cr, C), jnp.float32),     # Linear C->C/r
        b1=0.1 * jax.random.normal(k2, (Cr,), jnp.float32),
        w2=0.2 * jax.random.normal(k3, (C, Cr), jnp.float32),     # Linear C/r->C
        b2=0.1 * jax.random.normal(k4, (C,), jnp.float32),
        cw=0.2 * jax.random.normal(k5, (1, 2, KSIZE, KSIZE), jnp.float32),
        bn_gamma=jnp.ones((1,), jnp.float32),
        bn_beta=jnp.zeros((1,), jnp.float32),
        bn_mean=jnp.zeros((1,), jnp.float32),
        bn_var=jnp.ones((1,), jnp.float32),
    )

    # NCHW (PyTorch convention) -> NHWC for the kernel, back for comparison.
    x_nhwc = jnp.transpose(x_nchw, (0, 2, 3, 1))
    out_nhwc = cbam_pallas(x_nhwc, params)
    out_nchw = jnp.transpose(out_nhwc, (0, 3, 1, 2))
    jax.block_until_ready(out_nchw)

    ref = cbam_reference(x_nchw, params)
    err = float(jnp.max(jnp.abs(out_nchw - ref)))
    assert err < 2e-3, f"max abs err {err}"
    print("KERNEL_OK")
</pallas_src>

<mosaic_0001>
module attributes {stable_mosaic.version = 11 : i64} {
  func.func @probe(%arg0: memref<8x128xf32, #tpu.memory_space<vmem>>, %arg1: memref<8x128xf32, #tpu.memory_space<vmem>>) attributes {dimension_semantics = [], scalar_prefetch = 0 : i64, scratch_operands = 0 : i64, tpu.core_type = #tpu.core_type<tc>} {
    %c0 = arith.constant 0 : index
    %c0_0 = arith.constant 0 : index
    %0 = vector.load %arg0[%c0, %c0_0] : memref<8x128xf32, #tpu.memory_space<vmem>>, vector<8x128xf32>
    %c1_i32 = arith.constant 1 : i32
    %1 = tpu.dynamic_rotate %0 by %c1_i32 dim 1 : vector<8x128xf32>, i32 -> vector<8x128xf32>
    %c0_1 = arith.constant 0 : index
    %c0_2 = arith.constant 0 : index
    %2 = vector.load %arg1[%c0_1, %c0_2] : memref<8x128xf32, #tpu.memory_space<vmem>>, vector<8x128xf32>
    tpu.vector_store %arg1[%c0_1, %c0_2], %1 {strides = array<i32>} : memref<8x128xf32, #tpu.memory_space<vmem>>, vector<8x128xf32>,
    return
  }
}

module attributes {stable_mosaic.version = 11 : i64} {
  func.func @cbam_kernel(%arg0: i32, %arg1: memref<1x16x16x32xf32, #tpu.memory_space<vmem>>, %arg2: memref<2x32xf32, #tpu.memory_space<vmem>>, %arg3: memref<2x32xf32, #tpu.memory_space<vmem>>, %arg4: memref<1x32xf32, #tpu.memory_space<vmem>>, %arg5: memref<2xf32, #tpu.memory_space<smem>>, %arg6: memref<98xf32, #tpu.memory_space<smem>>, %arg7: memref<2xf32, #tpu.memory_space<smem>>, %arg8: memref<1x16x16x32xf32, #tpu.memory_space<vmem>>, %arg9: memref<2x22x128xf32, #tpu.memory_space<vmem>>) attributes {dimension_semantics = [#tpu.dimension_semantics<parallel>], iteration_bounds = array<i64: 2>, scalar_prefetch = 0 : i64, scratch_operands = 1 : i64, tpu.core_type = #tpu.core_type<tc>, window_params = [{transform_indices = @transform_0, window_bounds = array<i64: 1, 16, 16, 32>}, {pipeline_mode = #tpu.pipeline_mode<synchronous>, transform_indices = @transform_1, window_bounds = array<i64: 2, 32>}, {pipeline_mode = #tpu.pipeline_mode<synchronous>, transform_indices = @transform_2, window_bounds = array<i64: 2, 32>}, {pipeline_mode = #tpu.pipeline_mode<synchronous>, transform_indices = @transform_3, window_bounds = array<i64: 1, 32>}, {transform_indices = @transform_4, window_bounds = array<i64: 2>}, {transform_indices = @transform_5, window_bounds = array<i64: 98>}, {transform_indices = @transform_6, window_bounds = array<i64: 2>}, {transform_indices = @transform_7, window_bounds = array<i64: 1, 16, 16, 32>}]} {
    %c0 = arith.constant 0 : index
    %c0_0 = arith.constant 0 : index
    %c0_1 = arith.constant 0 : index
    %c0_2 = arith.constant 0 : index
    %0 = vector.load %arg1[%c0, %c0_0, %c0_1, %c0_2] : memref<1x16x16x32xf32, #tpu.memory_space<vmem>>, vector<1x16x16x32xf32>
    %1 = vector.shape_cast %0 : vector<1x16x16x32xf32> to vector<16x16x32xf32>
    %cst = arith.constant dense<0.000000e+00> : vector<16x32xf32>
    %2 = vector.multi_reduction <add>, %1, %cst [0] : vector<16x16x32xf32> to vector<16x32xf32>
    %cst_3 = arith.constant 1.600000e+01 : f32
    %3 = vector.broadcast %cst_3 : f32 to vector<16x32xf32>
    %4 = arith.divf %2, %3 : vector<16x32xf32>
    %cst_4 = arith.constant dense<0.000000e+00> : vector<32xf32>
    %5 = vector.multi_reduction <add>, %4, %cst_4 [0] : vector<16x32xf32> to vector<32xf32>
    %6 = vector.shape_cast %5 : vector<32xf32> to vector<1x32xf32>
    %cst_5 = arith.constant 1.600000e+01 : f32
    %7 = vector.broadcast %cst_5 : f32 to vector<1x32xf32>
    %8 = arith.divf %6, %7 : vector<1x32xf32>
    %cst_6 = arith.constant dense<0xFF800000> : vector<16x32xf32>
    %9 = vector.multi_reduction <maximumf>, %1, %cst_6 [0] : vector<16x16x32xf32> to vector<16x32xf32>
    %cst_7 = arith.constant dense<0xFF800000> : vector<32xf32>
    %10 = vector.multi_reduction <maximumf>, %9, %cst_7 [0] : vector<16x32xf32> to vector<32xf32>
    %11 = vector.shape_cast %10 : vector<32xf32> to vector<1x32xf32>
    %c0_8 = arith.constant 0 : index
    %c0_9 = arith.constant 0 : index
    %12 = vector.load %arg4[%c0_8, %c0_9] : memref<1x32xf32, #tpu.memory_space<vmem>>, vector<1x32xf32>
    %cst_10 = arith.constant 2.000000e+00 : f32
    %13 = vector.broadcast %cst_10 : f32 to vector<1x32xf32>
    %14 = arith.mulf %13, %12 : vector<1x32xf32>
    %c0_11 = arith.constant 0 : index
    %c0_12 = arith.constant 0 : index
    %15 = vector.load %arg2[%c0_11, %c0_12] : memref<2x32xf32, #tpu.memory_space<vmem>>, vector<1x32xf32>
    %16 = arith.mulf %8, %15 : vector<1x32xf32>
    %cst_13 = arith.constant dense<0.000000e+00> : vector<1xf32>
    %17 = vector.multi_reduction <add>, %16, %cst_13 [1] : vector<1x32xf32> to vector<1xf32>
    %18 = vector.shape_cast %17 : vector<1xf32> to vector<1x1xf32>
    %c0_14 = arith.constant 0 : index
    %19 = memref.load %arg5[%c0_14] : memref<2xf32, #tpu.memory_space<smem>>
    %20 = vector.broadcast %19 : f32 to vector<1x1xf32>
    %21 = arith.addf %18, %20 : vector<1x1xf32>
    %22 = arith.mulf %11, %15 : vector<1x32xf32>
    %cst_15 = arith.constant dense<0.000000e+00> : vector<1xf32>
    %23 = vector.multi_reduction <add>, %22, %cst_15 [1] : vector<1x32xf32> to vector<1xf32>
    %24 = vector.shape_cast %23 : vector<1xf32> to vector<1x1xf32>
    %c0_16 = arith.constant 0 : index
    %25 = memref.load %arg5[%c0_16] : memref<2xf32, #tpu.memory_space<smem>>
    %26 = vector.broadcast %25 : f32 to vector<1x1xf32>
    %27 = arith.addf %24, %26 : vector<1x1xf32>
    %cst_17 = arith.constant 0.000000e+00 : f32
    %28 = vector.broadcast %cst_17 : f32 to vector<1x1xf32>
    %29 = arith.maximumf %21, %28 : vector<1x1xf32>
    %cst_18 = arith.constant 0.000000e+00 : f32
    %30 = vector.broadcast %cst_18 : f32 to vector<1x1xf32>
    %31 = arith.maximumf %27, %30 : vector<1x1xf32>
    %32 = arith.addf %29, %31 : vector<1x1xf32>
    %c0_19 = arith.constant 0 : index
    %c0_20 = arith.constant 0 : index
    %33 = vector.load %arg3[%c0_19, %c0_20] : memref<2x32xf32, #tpu.memory_space<vmem>>, vector<1x32xf32>
    %34 = vector.broadcast %32 : vector<1x1xf32> to vector<1x32xf32>
    %35 = arith.mulf %34, %33 : vector<1x32xf32>
    %36 = arith.addf %14, %35 : vector<1x32xf32>
    %c1 = arith.constant 1 : index
    %c0_21 = arith.constant 0 : index
    %37 = vector.load %arg2[%c1, %c0_21] : memref<2x32xf32, #tpu.memory_space<vmem>>, vector<1x32xf32>
    %38 = arith.mulf %8, %37 : vector<1x32xf32>
    %cst_22 = arith.constant dense<0.000000e+00> : vector<1xf32>
    %39 = vector.multi_reduction <add>, %38, %cst_22 [1] : vector<1x32xf32> to vector<1xf32>
    %40 = vector.shape_cast %39 : vector<1xf32> to vector<1x1xf32>
    %c1_23 = arith.constant 1 : index
    %41 = memref.load %arg5[%c1_23] : memref<2xf32, #tpu.memory_space<smem>>
    %42 = vector.broadcast %41 : f32 to vector<1x1xf32>
    %43 = arith.addf %40, %42 : vector<1x1xf32>
    %44 = arith.mulf %11, %37 : vector<1x32xf32>
    %cst_24 = arith.constant dense<0.000000e+00> : vector<1xf32>
    %45 = vector.multi_reduction <add>, %44, %cst_24 [1] : vector<1x32xf32> to vector<1xf32>
    %46 = vector.shape_cast %45 : vector<1xf32> to vector<1x1xf32>
    %c1_25 = arith.constant 1 : index
    %47 = memref.load %arg5[%c1_25] : memref<2xf32, #tpu.memory_space<smem>>
    %48 = vector.broadcast %47 : f32 to vector<1x1xf32>
    %49 = arith.addf %46, %48 : vector<1x1xf32>
    %cst_26 = arith.constant 0.000000e+00 : f32
    %50 = vector.broadcast %cst_26 : f32 to vector<1x1xf32>
    %51 = arith.maximumf %43, %50 : vector<1x1xf32>
    %cst_27 = arith.constant 0.000000e+00 : f32
    %52 = vector.broadcast %cst_27 : f32 to vector<1x1xf32>
    %53 = arith.maximumf %49, %52 : vector<1x1xf32>
    %54 = arith.addf %51, %53 : vector<1x1xf32>
    %c1_28 = arith.constant 1 : index
    %c0_29 = arith.constant 0 : index
    %55 = vector.load %arg3[%c1_28, %c0_29] : memref<2x32xf32, #tpu.memory_space<vmem>>, vector<1x32xf32>
    %56 = vector.broadcast %54 : vector<1x1xf32> to vector<1x32xf32>
    %57 = arith.mulf %56, %55 : vector<1x32xf32>
    %58 = arith.addf %36, %57 : vector<1x32xf32>
    %59 = arith.negf %58 : vector<1x32xf32>
    %60 = math.exp %59 : vector<1x32xf32>
    %cst_30 = arith.constant 1.000000e+00 : f32
    %61 = vector.broadcast %cst_30 : f32 to vector<1x32xf32>
    %62 = arith.addf %61, %60 : vector<1x32xf32>
    %63 = arith.divf %61, %62 : vector<1x32xf32>
    %64 = vector.shape_cast %63 : vector<1x32xf32> to vector<1x1x32xf32>
    %65 = vector.broadcast %64 : vector<1x1x32xf32> to vector<16x16x32xf32>
    %66 = arith.mulf %1, %65 : vector<16x16x32xf32>
    %cst_31 = arith.constant dense<0xFF800000> : vector<16x16xf32>
    %67 = vector.multi_reduction <maximumf>, %66, %cst_31 [2] : vector<16x16x32xf32> to vector<16x16xf32>
    %cst_32 = arith.constant dense<0.000000e+00> : vector<16x16xf32>
    %68 = vector.multi_reduction <add>, %66, %cst_32 [2] : vector<16x16x32xf32> to vector<16x16xf32>
    %cst_33 = arith.constant 3.200000e+01 : f32
    %69 = vector.broadcast %cst_33 : f32 to vector<16x16xf32>
    %70 = arith.divf %68, %69 : vector<16x16xf32>
    %cst_34 = arith.constant 0.000000e+00 : f32
    %71 = vector.broadcast %cst_34 : f32 to vector<3x128xf32>
    %cst_35 = arith.constant 0.000000e+00 : f32
    %72 = vector.broadcast %cst_35 : f32 to vector<16x3xf32>
    %c0_36 = arith.constant 0 : index
    %c0_37 = arith.constant 0 : index
    %c0_38 = arith.constant 0 : index
    %73 = vector.load %arg9[%c0_36, %c0_37, %c0_38] : memref<2x22x128xf32, #tpu.memory_space<vmem>>, vector<1x3x128xf32>
    %74 = vector.shape_cast %73 : vector<1x3x128xf32> to vector<3x128xf32>
    %75 = vector.shape_cast %71 : vector<3x128xf32> to vector<1x3x128xf32>
    tpu.vector_store %arg9[%c0_36, %c0_37, %c0_38], %75 {strides = array<i32>} : memref<2x22x128xf32, #tpu.memory_space<vmem>>, vector<1x3x128xf32>,
    %c0_39 = arith.constant 0 : index
    %c19 = arith.constant 19 : index
    %c0_40 = arith.constant 0 : index
    %76 = vector.load %arg9[%c0_39, %c19, %c0_40] : memref<2x22x128xf32, #tpu.memory_space<vmem>>, vector<1x3x128xf32>
    %77 = vector.shape_cast %76 : vector<1x3x128xf32> to vector<3x128xf32>
    %78 = vector.shape_cast %71 : vector<3x128xf32> to vector<1x3x128xf32>
    tpu.vector_store %arg9[%c0_39, %c19, %c0_40], %78 {strides = array<i32>} : memref<2x22x128xf32, #tpu.memory_space<vmem>>, vector<1x3x128xf32>,
    %c0_41 = arith.constant 0 : index
    %c3 = arith.constant 3 : index
    %c0_42 = arith.constant 0 : index
    %79 = vector.load %arg9[%c0_41, %c3, %c0_42] : memref<2x22x128xf32, #tpu.memory_space<vmem>>, vector<1x16x3xf32>
    %80 = vector.shape_cast %79 : vector<1x16x3xf32> to vector<16x3xf32>
    %81 = vector.shape_cast %72 : vector<16x3xf32> to vector<1x16x3xf32>
    tpu.vector_store %arg9[%c0_41, %c3, %c0_42], %81 {strides = array<i32>} : memref<2x22x128xf32, #tpu.memory_space<vmem>>, vector<1x16x3xf32>,
    %c0_43 = arith.constant 0 : index
    %c3_44 = arith.constant 3 : index
    %c19_45 = arith.constant 19 : index
    %82 = vector.load %arg9[%c0_43, %c3_44, %c19_45] : memref<2x22x128xf32, #tpu.memory_space<vmem>>, vector<1x16x3xf32>
    %83 = vector.shape_cast %82 : vector<1x16x3xf32> to vector<16x3xf32>
    %84 = vector.shape_cast %72 : vector<16x3xf32> to vector<1x16x3xf32>
    tpu.vector_store %arg9[%c0_43, %c3_44, %c19_45], %84 {strides = array<i32>} : memref<2x22x128xf32, #tpu.memory_space<vmem>>, vector<1x16x3xf32>,
    %c1_46 = arith.constant 1 : index
    %c0_47 = arith.constant 0 : index
    %c0_48 = arith.constant 0 : index
    %85 = vector.load %arg9[%c1_46, %c0_47, %c0_48] : memref<2x22x128xf32, #tpu.memory_space<vmem>>, vector<1x3x128xf32>
    %86 = vector.shape_cast %85 : vector<1x3x128xf32> to vector<3x128xf32>
    %87 = vector.shape_cast %71 : vector<3x128xf32> to vector<1x3x128xf32>
    tpu.vector_store %arg9[%c1_46, %c0_47, %c0_48], %87 {strides = array<i32>} : memref<2x22x128xf32, #tpu.memory_space<vmem>>, vector<1x3x128xf32>,
    %c1_49 = arith.constant 1 : index
    %c19_50 = arith.constant 19 : index
    %c0_51 = arith.constant 0 : index
    %88 = vector.load %arg9[%c1_49, %c19_50, %c0_51] : memref<2x22x128xf32, #tpu.memory_space<vmem>>, vector<1x3x128xf32>
    %89 = vector.shape_cast %88 : vector<1x3x128xf32> to vector<3x128xf32>
    %90 = vector.shape_cast %71 : vector<3x128xf32> to vector<1x3x128xf32>
    tpu.vector_store %arg9[%c1_49, %c19_50, %c0_51], %90 {strides = array<i32>} : memref<2x22x128xf32, #tpu.memory_space<vmem>>, vector<1x3x128xf32>,
    %c1_52 = arith.constant 1 : index
    %c3_53 = arith.constant 3 : index
    %c0_54 = arith.constant 0 : index
    %91 = vector.load %arg9[%c1_52, %c3_53, %c0_54] : memref<2x22x128xf32, #tpu.memory_space<vmem>>, vector<1x16x3xf32>
    %92 = vector.shape_cast %91 : vector<1x16x3xf32> to vector<16x3xf32>
    %93 = vector.shape_cast %72 : vector<16x3xf32> to vector<1x16x3xf32>
    tpu.vector_store %arg9[%c1_52, %c3_53, %c0_54], %93 {strides = array<i32>} : memref<2x22x128xf32, #tpu.memory_space<vmem>>, vector<1x16x3xf32>,
    %c1_55 = arith.constant 1 : index
    %c3_56 = arith.constant 3 : index
    %c19_57 = arith.constant 19 : index
    %94 = vector.load %arg9[%c1_55, %c3_56, %c19_57] : memref<2x22x128xf32, #tpu.memory_space<vmem>>, vector<1x16x3xf32>
    %95 = vector.shape_cast %94 : vector<1x16x3xf32> to vector<16x3xf32>
    %96 = vector.shape_cast %72 : vector<16x3xf32> to vector<1x16x3xf32>
    tpu.vector_store %arg9[%c1_55, %c3_56, %c19_57], %96 {strides = array<i32>} : memref<2x22x128xf32, #tpu.memory_space<vmem>>, vector<1x16x3xf32>,
    %c0_58 = arith.constant 0 : index
    %c3_59 = arith.constant 3 : index
    %c3_60 = arith.constant 3 : index
    %97 = vector.load %arg9[%c0_58, %c3_59, %c3_60] : memref<2x22x128xf32, #tpu.memory_space<vmem>>, vector<1x16x16xf32>
    %98 = vector.shape_cast %97 : vector<1x16x16xf32> to vector<16x16xf32>
    %99 = vector.shape_cast %67 : vector<16x16xf32> to vector<1x16x16xf32>
    tpu.vector_store %arg9[%c0_58, %c3_59, %c3_60], %99 {strides = array<i32>} : memref<2x22x128xf32, #tpu.memory_space<vmem>>, vector<1x16x16xf32>,
    %c1_61 = arith.constant 1 : index
    %c3_62 = arith.constant 3 : index
    %c3_63 = arith.constant 3 : index
    %100 = vector.load %arg9[%c1_61, %c3_62, %c3_63] : memref<2x22x128xf32, #tpu.memory_space<vmem>>, vector<1x16x16xf32>
    %101 = vector.shape_cast %100 : vector<1x16x16xf32> to vector<16x16xf32>
    %102 = vector.shape_cast %70 : vector<16x16xf32> to vector<1x16x16xf32>
    tpu.vector_store %arg9[%c1_61, %c3_62, %c3_63], %102 {strides = array<i32>} : memref<2x22x128xf32, #tpu.memory_space<vmem>>, vector<1x16x16xf32>,
    %c0_64 = arith.constant 0 : index
    %c0_65 = arith.constant 0 : index
    %c0_66 = arith.constant 0 : index
    %103 = vector.load %arg9[%c0_64, %c0_65, %c0_66] : memref<2x22x128xf32, #tpu.memory_space<vmem>>, vector<1x16x128xf32>
    %104 = vector.shape_cast %103 : vector<1x16x128xf32> to vector<16x128xf32>
    %c0_67 = arith.constant 0 : index
    %105 = memref.load %arg6[%c0_67] : memref<98xf32, #tpu.memory_space<smem>>
    %106 = vector.broadcast %105 : f32 to vector<16x128xf32>
    %107 = arith.mulf %104, %106 : vector<16x128xf32>
    %c1_68 = arith.constant 1 : index
    %108 = memref.load %arg6[%c1_68] : memref<98xf32, #tpu.memory_space<smem>>
    %109 = vector.broadcast %108 : f32 to vector<16x128xf32>
    %110 = arith.mulf %104, %109 : vector<16x128xf32>
    %c2 = arith.constant 2 : index
    %111 = memref.load %arg6[%c2] : memref<98xf32, #tpu.memory_space<smem>>
    %112 = vector.broadcast %111 : f32 to vector<16x128xf32>
    %113 = arith.mulf %104, %112 : vector<16x128xf32>
    %c3_69 = arith.constant 3 : index
    %114 = memref.load %arg6[%c3_69] : memref<98xf32, #tpu.memory_space<smem>>
    %115 = vector.broadcast %114 : f32 to vector<16x128xf32>
    %116 = arith.mulf %104, %115 : vector<16x128xf32>
    %c4 = arith.constant 4 : index
    %117 = memref.load %arg6[%c4] : memref<98xf32, #tpu.memory_space<smem>>
    %118 = vector.broadcast %117 : f32 to vector<16x128xf32>
    %119 = arith.mulf %104, %118 : vector<16x128xf32>
    %c5 = arith.constant 5 : index
    %120 = memref.load %arg6[%c5] : memref<98xf32, #tpu.memory_space<smem>>
    %121 = vector.broadcast %120 : f32 to vector<16x128xf32>
    %122 = arith.mulf %104, %121 : vector<16x128xf32>
    %c6 = arith.constant 6 : index
    %123 = memref.load %arg6[%c6] : memref<98xf32, #tpu.memory_space<smem>>
    %124 = vector.broadcast %123 : f32 to vector<16x128xf32>
    %125 = arith.mulf %104, %124 : vector<16x128xf32>
    %c0_70 = arith.constant 0 : index
    %c1_71 = arith.constant 1 : index
    %c0_72 = arith.constant 0 : index
    %126 = vector.load %arg9[%c0_70, %c1_71, %c0_72] : memref<2x22x128xf32, #tpu.memory_space<vmem>>, vector<1x16x128xf32>
    %127 = vector.shape_cast %126 : vector<1x16x128xf32> to vector<16x128xf32>
    %c7 = arith.constant 7 : index
    %128 = memref.load %arg6[%c7] : memref<98xf32, #tpu.memory_space<smem>>
    %129 = vector.broadcast %128 : f32 to vector<16x128xf32>
    %130 = arith.mulf %127, %129 : vector<16x128xf32>
    %131 = arith.addf %107, %130 : vector<16x128xf32>
    %c8 = arith.constant 8 : index
    %132 = memref.load %arg6[%c8] : memref<98xf32, #tpu.memory_space<smem>>
    %133 = vector.broadcast %132 : f32 to vector<16x128xf32>
    %134 = arith.mulf %127, %133 : vector<16x128xf32>
    %135 = arith.addf %110, %134 : vector<16x128xf32>
    %c9 = arith.constant 9 : index
    %136 = memref.load %arg6[%c9] : memref<98xf32, #tpu.memory_space<smem>>
    %137 = vector.broadcast %136 : f32 to vector<16x128xf32>
    %138 = arith.mulf %127, %137 : vector<16x128xf32>
    %139 = arith.addf %113, %138 : vector<16x128xf32>
    %c10 = arith.constant 10 : index
    %140 = memref.load %arg6[%c10] : memref<98xf32, #tpu.memory_space<smem>>
    %141 = vector.broadcast %140 : f32 to vector<16x128xf32>
    %142 = arith.mulf %127, %141 : vector<16x128xf32>
    %143 = arith.addf %116, %142 : vector<16x128xf32>
    %c11 = arith.constant 11 : index
    %144 = memref.load %arg6[%c11] : memref<98xf32, #tpu.memory_space<smem>>
    %145 = vector.broadcast %144 : f32 to vector<16x128xf32>
    %146 = arith.mulf %127, %145 : vector<16x128xf32>
    %147 = arith.addf %119, %146 : vector<16x128xf32>
    %c12 = arith.constant 12 : index
    %148 = memref.load %arg6[%c12] : memref<98xf32, #tpu.memory_space<smem>>
    %149 = vector.broadcast %148 : f32 to vector<16x128xf32>
    %150 = arith.mulf %127, %149 : vector<16x128xf32>
    %151 = arith.addf %122, %150 : vector<16x128xf32>
    %c13 = arith.constant 13 : index
    %152 = memref.load %arg6[%c13] : memref<98xf32, #tpu.memory_space<smem>>
    %153 = vector.broadcast %152 : f32 to vector<16x128xf32>
    %154 = arith.mulf %127, %153 : vector<16x128xf32>
    %155 = arith.addf %125, %154 : vector<16x128xf32>
    %c0_73 = arith.constant 0 : index
    %c2_74 = arith.constant 2 : index
    %c0_75 = arith.constant 0 : index
    %156 = vector.load %arg9[%c0_73, %c2_74, %c0_75] : memref<2x22x128xf32, #tpu.memory_space<vmem>>, vector<1x16x128xf32>
    %157 = vector.shape_cast %156 : vector<1x16x128xf32> to vector<16x128xf32>
    %c14 = arith.constant 14 : index
    %158 = memref.load %arg6[%c14] : memref<98xf32, #tpu.memory_space<smem>>
    %159 = vector.broadcast %158 : f32 to vector<16x128xf32>
    %160 = arith.mulf %157, %159 : vector<16x128xf32>
    %161 = arith.addf %131, %160 : vector<16x128xf32>
    %c15 = arith.constant 15 : index
    %162 = memref.load %arg6[%c15] : memref<98xf32, #tpu.memory_space<smem>>
    %163 = vector.broadcast %162 : f32 to vector<16x128xf32>
    %164 = arith.mulf %157, %163 : vector<16x128xf32>
    %165 = arith.addf %135, %164 : vector<16x128xf32>
    %c16 = arith.constant 16 : index
    %166 = memref.load %arg6[%c16] : memref<98xf32, #tpu.memory_space<smem>>
    %167 = vector.broadcast %166 : f32 to vector<16x128xf32>
    %168 = arith.mulf %157, %167 : vector<16x128xf32>
    %169 = arith.addf %139, %168 : vector<16x128xf32>
    %c17 = arith.constant 17 : index
    %170 = memref.load %arg6[%c17] : memref<98xf32, #tpu.memory_space<smem>>
    %171 = vector.broadcast %170 : f32 to vector<16x128xf32>
    %172 = arith.mulf %157, %171 : vector<16x128xf32>
    %173 = arith.addf %143, %172 : vector<16x128xf32>
    %c18 = arith.constant 18 : index
    %174 = memref.load %arg6[%c18] : memref<98xf32, #tpu.memory_space<smem>>
    %175 = vector.broadcast %174 : f32 to vector<16x128xf32>
    %176 = arith.mulf %157, %175 : vector<16x128xf32>
    %177 = arith.addf %147, %176 : vector<16x128xf32>
    %c19_76 = arith.constant 19 : index
    %178 = memref.load %arg6[%c19_76] : memref<98xf32, #tpu.memory_space<smem>>
    %179 = vector.broadcast %178 : f32 to vector<16x128xf32>
    %180 = arith.mulf %157, %179 : vector<16x128xf32>
    %181 = arith.addf %151, %180 : vector<16x128xf32>
    %c20 = arith.constant 20 : index
    %182 = memref.load %arg6[%c20] : memref<98xf32, #tpu.memory_space<smem>>
    %183 = vector.broadcast %182 : f32 to vector<16x128xf32>
    %184 = arith.mulf %157, %183 : vector<16x128xf32>
    %185 = arith.addf %155, %184 : vector<16x128xf32>
    %c0_77 = arith.constant 0 : index
    %c3_78 = arith.constant 3 : index
    %c0_79 = arith.constant 0 : index
    %186 = vector.load %arg9[%c0_77, %c3_78, %c0_79] : memref<2x22x128xf32, #tpu.memory_space<vmem>>, vector<1x16x128xf32>
    %187 = vector.shape_cast %186 : vector<1x16x128xf32> to vector<16x128xf32>
    %c21 = arith.constant 21 : index
    %188 = memref.load %arg6[%c21] : memref<98xf32, #tpu.memory_space<smem>>
    %189 = vector.broadcast %188 : f32 to vector<16x128xf32>
    %190 = arith.mulf %187, %189 : vector<16x128xf32>
    %191 = arith.addf %161, %190 : vector<16x128xf32>
    %c22 = arith.constant 22 : index
    %192 = memref.load %arg6[%c22] : memref<98xf32, #tpu.memory_space<smem>>
    %193 = vector.broadcast %192 : f32 to vector<16x128xf32>
    %194 = arith.mulf %187, %193 : vector<16x128xf32>
    %195 = arith.addf %165, %194 : vector<16x128xf32>
    %c23 = arith.constant 23 : index
    %196 = memref.load %arg6[%c23] : memref<98xf32, #tpu.memory_space<smem>>
    %197 = vector.broadcast %196 : f32 to vector<16x128xf32>
    %198 = arith.mulf %187, %197 : vector<16x128xf32>
    %199 = arith.addf %169, %198 : vector<16x128xf32>
    %c24 = arith.constant 24 : index
    %200 = memref.load %arg6[%c24] : memref<98xf32, #tpu.memory_space<smem>>
    %201 = vector.broadcast %200 : f32 to vector<16x128xf32>
    %202 = arith.mulf %187, %201 : vector<16x128xf32>
    %203 = arith.addf %173, %202 : vector<16x128xf32>
    %c25 = arith.constant 25 : index
    %204 = memref.load %arg6[%c25] : memref<98xf32, #tpu.memory_space<smem>>
    %205 = vector.broadcast %204 : f32 to vector<16x128xf32>
    %206 = arith.mulf %187, %205 : vector<16x128xf32>
    %207 = arith.addf %177, %206 : vector<16x128xf32>
    %c26 = arith.constant 26 : index
    %208 = memref.load %arg6[%c26] : memref<98xf32, #tpu.memory_space<smem>>
    %209 = vector.broadcast %208 : f32 to vector<16x128xf32>
    %210 = arith.mulf %187, %209 : vector<16x128xf32>
    %211 = arith.addf %181, %210 : vector<16x128xf32>
    %c27 = arith.constant 27 : index
    %212 = memref.load %arg6[%c27] : memref<98xf32, #tpu.memory_space<smem>>
    %213 = vector.broadcast %212 : f32 to vector<16x128xf32>
    %214 = arith.mulf %187, %213 : vector<16x128xf32>
    %215 = arith.addf %185, %214 : vector<16x128xf32>
    %c0_80 = arith.constant 0 : index
    %c4_81 = arith.constant 4 : index
    %c0_82 = arith.constant 0 : index
    %216 = vector.load %arg9[%c0_80, %c4_81, %c0_82] : memref<2x22x128xf32, #tpu.memory_space<vmem>>, vector<1x16x128xf32>
    %217 = vector.shape_cast %216 : vector<1x16x128xf32> to vector<16x128xf32>
    %c28 = arith.constant 28 : index
    %218 = memref.load %arg6[%c28] : memref<98xf32, #tpu.memory_space<smem>>
    %219 = vector.broadcast %218 : f32 to vector<16x128xf32>
    %220 = arith.mulf %217, %219 : vector<16x128xf32>
    %221 = arith.addf %191, %220 : vector<16x128xf32>
    %c29 = arith.constant 29 : index
    %222 = memref.load %arg6[%c29] : memref<98xf32, #tpu.memory_space<smem>>
    %223 = vector.broadcast %222 : f32 to vector<16x128xf32>
    %224 = arith.mulf %217, %223 : vector<16x128xf32>
    %225 = arith.addf %195, %224 : vector<16x128xf32>
    %c30 = arith.constant 30 : index
    %226 = memref.load %arg6[%c30] : memref<98xf32, #tpu.memory_space<smem>>
    %227 = vector.broadcast %226 : f32 to vector<16x128xf32>
    %228 = arith.mulf %217, %227 : vector<16x128xf32>
    %229 = arith.addf %199, %228 : vector<16x128xf32>
    %c31 = arith.constant 31 : index
    %230 = memref.load %arg6[%c31] : memref<98xf32, #tpu.memory_space<smem>>
    %231 = vector.broadcast %230 : f32 to vector<16x128xf32>
    %232 = arith.mulf %217, %231 : vector<16x128xf32>
    %233 = arith.addf %203, %232 : vector<16x128xf32>
    %c32 = arith.constant 32 : index
    %234 = memref.load %arg6[%c32] : memref<98xf32, #tpu.memory_space<smem>>
    %235 = vector.broadcast %234 : f32 to vector<16x128xf32>
    %236 = arith.mulf %217, %235 : vector<16x128xf32>
    %237 = arith.addf %207, %236 : vector<16x128xf32>
    %c33 = arith.constant 33 : index
    %238 = memref.load %arg6[%c33] : memref<98xf32, #tpu.memory_space<smem>>
    %239 = vector.broadcast %238 : f32 to vector<16x128xf32>
    %240 = arith.mulf %217, %239 : vector<16x128xf32>
    %241 = arith.addf %211, %240 : vector<16x128xf32>
    %c34 = arith.constant 34 : index
    %242 = memref.load %arg6[%c34] : memref<98xf32, #tpu.memory_space<smem>>
    %243 = vector.broadcast %242 : f32 to vector<16x128xf32>
    %244 = arith.mulf %217, %243 : vector<16x128xf32>
    %245 = arith.addf %215, %244 : vector<16x128xf32>
    %c0_83 = arith.constant 0 : index
    %c5_84 = arith.constant 5 : index
    %c0_85 = arith.constant 0 : index
    %246 = vector.load %arg9[%c0_83, %c5_84, %c0_85] : memref<2x22x128xf32, #tpu.memory_space<vmem>>, vector<1x16x128xf32>
    %247 = vector.shape_cast %246 : vector<1x16x128xf32> to vector<16x128xf32>
    %c35 = arith.constant 35 : index
    %248 = memref.load %arg6[%c35] : memref<98xf32, #tpu.memory_space<smem>>
    %249 = vector.broadcast %248 : f32 to vector<16x128xf32>
    %250 = arith.mulf %247, %249 : vector<16x128xf32>
    %251 = arith.addf %221, %250 : vector<16x128xf32>
    %c36 = arith.constant 36 : index
    %252 = memref.load %arg6[%c36] : memref<98xf32, #tpu.memory_space<smem>>
    %253 = vector.broadcast %252 : f32 to vector<16x128xf32>
    %254 = arith.mulf %247, %253 : vector<16x128xf32>
    %255 = arith.addf %225, %254 : vector<16x128xf32>
    %c37 = arith.constant 37 : index
    %256 = memref.load %arg6[%c37] : memref<98xf32, #tpu.memory_space<smem>>
    %257 = vector.broadcast %256 : f32 to vector<16x128xf32>
    %258 = arith.mulf %247, %257 : vector<16x128xf32>
    %259 = arith.addf %229, %258 : vector<16x128xf32>
    %c38 = arith.constant 38 : index
    %260 = memref.load %arg6[%c38] : memref<98xf32, #tpu.memory_space<smem>>
    %261 = vector.broadcast %260 : f32 to vector<16x128xf32>
    %262 = arith.mulf %247, %261 : vector<16x128xf32>
    %263 = arith.addf %233, %262 : vector<16x128xf32>
    %c39 = arith.constant 39 : index
    %264 = memref.load %arg6[%c39] : memref<98xf32, #tpu.memory_space<smem>>
    %265 = vector.broadcast %264 : f32 to vector<16x128xf32>
    %266 = arith.mulf %247, %265 : vector<16x128xf32>
    %267 = arith.addf %237, %266 : vector<16x128xf32>
    %c40 = arith.constant 40 : index
    %268 = memref.load %arg6[%c40] : memref<98xf32, #tpu.memory_space<smem>>
    %269 = vector.broadcast %268 : f32 to vector<16x128xf32>
    %270 = arith.mulf %247, %269 : vector<16x128xf32>
    %271 = arith.addf %241, %270 : vector<16x128xf32>
    %c41 = arith.constant 41 : index
    %272 = memref.load %arg6[%c41] : memref<98xf32, #tpu.memory_space<smem>>
    %273 = vector.broadcast %272 : f32 to vector<16x128xf32>
    %274 = arith.mulf %247, %273 : vector<16x128xf32>
    %275 = arith.addf %245, %274 : vector<16x128xf32>
    %c0_86 = arith.constant 0 : index
    %c6_87 = arith.constant 6 : index
    %c0_88 = arith.constant 0 : index
    %276 = vector.load %arg9[%c0_86, %c6_87, %c0_88] : memref<2x22x128xf32, #tpu.memory_space<vmem>>, vector<1x16x128xf32>
    %277 = vector.shape_cast %276 : vector<1x16x128xf32> to vector<16x128xf32>
    %c42 = arith.constant 42 : index
    %278 = memref.load %arg6[%c42] : memref<98xf32, #tpu.memory_space<smem>>
    %279 = vector.broadcast %278 : f32 to vector<16x128xf32>
    %280 = arith.mulf %277, %279 : vector<16x128xf32>
    %281 = arith.addf %251, %280 : vector<16x128xf32>
    %c43 = arith.constant 43 : index
    %282 = memref.load %arg6[%c43] : memref<98xf32, #tpu.memory_space<smem>>
    %283 = vector.broadcast %282 : f32 to vector<16x128xf32>
    %284 = arith.mulf %277, %283 : vector<16x128xf32>
    %285 = arith.addf %255, %284 : vector<16x128xf32>
    %c44 = arith.constant 44 : index
    %286 = memref.load %arg6[%c44] : memref<98xf32, #tpu.memory_space<smem>>
    %287 = vector.broadcast %286 : f32 to vector<16x128xf32>
    %288 = arith.mulf %277, %287 : vector<16x128xf32>
    %289 = arith.addf %259, %288 : vector<16x128xf32>
    %c45 = arith.constant 45 : index
    %290 = memref.load %arg6[%c45] : memref<98xf32, #tpu.memory_space<smem>>
    %291 = vector.broadcast %290 : f32 to vector<16x128xf32>
    %292 = arith.mulf %277, %291 : vector<16x128xf32>
    %293 = arith.addf %263, %292 : vector<16x128xf32>
    %c46 = arith.constant 46 : index
    %294 = memref.load %arg6[%c46] : memref<98xf32, #tpu.memory_space<smem>>
    %295 = vector.broadcast %294 : f32 to vector<16x128xf32>
    %296 = arith.mulf %277, %295 : vector<16x128xf32>
    %297 = arith.addf %267, %296 : vector<16x128xf32>
    %c47 = arith.constant 47 : index
    %298 = memref.load %arg6[%c47] : memref<98xf32, #tpu.memory_space<smem>>
    %299 = vector.broadcast %298 : f32 to vector<16x128xf32>
    %300 = arith.mulf %277, %299 : vector<16x128xf32>
    %301 = arith.addf %271, %300 : vector<16x128xf32>
    %c48 = arith.constant 48 : index
    %302 = memref.load %arg6[%c48] : memref<98xf32, #tpu.memory_space<smem>>
    %303 = vector.broadcast %302 : f32 to vector<16x128xf32>
    %304 = arith.mulf %277, %303 : vector<16x128xf32>
    %305 = arith.addf %275, %304 : vector<16x128xf32>
    %c1_89 = arith.constant 1 : index
    %c0_90 = arith.constant 0 : index
    %c0_91 = arith.constant 0 : index
    %306 = vector.load %arg9[%c1_89, %c0_90, %c0_91] : memref<2x22x128xf32, #tpu.memory_space<vmem>>, vector<1x16x128xf32>
    %307 = vector.shape_cast %306 : vector<1x16x128xf32> to vector<16x128xf32>
    %c49 = arith.constant 49 : index
    %308 = memref.load %arg6[%c49] : memref<98xf32, #tpu.memory_space<smem>>
    %309 = vector.broadcast %308 : f32 to vector<16x128xf32>
    %310 = arith.mulf %307, %309 : vector<16x128xf32>
    %311 = arith.addf %281, %310 : vector<16x128xf32>
    %c50 = arith.constant 50 : index
    %312 = memref.load %arg6[%c50] : memref<98xf32, #tpu.memory_space<smem>>
    %313 = vector.broadcast %312 : f32 to vector<16x128xf32>
    %314 = arith.mulf %307, %313 : vector<16x128xf32>
    %315 = arith.addf %285, %314 : vector<16x128xf32>
    %c51 = arith.constant 51 : index
    %316 = memref.load %arg6[%c51] : memref<98xf32, #tpu.memory_space<smem>>
    %317 = vector.broadcast %316 : f32 to vector<16x128xf32>
    %318 = arith.mulf %307, %317 : vector<16x128xf32>
    %319 = arith.addf %289, %318 : vector<16x128xf32>
    %c52 = arith.constant 52 : index
    %320 = memref.load %arg6[%c52] : memref<98xf32, #tpu.memory_space<smem>>
    %321 = vector.broadcast %320 : f32 to vector<16x128xf32>
    %322 = arith.mulf %307, %321 : vector<16x128xf32>
    %323 = arith.addf %293, %322 : vector<16x128xf32>
    %c53 = arith.constant 53 : index
    %324 = memref.load %arg6[%c53] : memref<98xf32, #tpu.memory_space<smem>>
    %325 = vector.broadcast %324 : f32 to vector<16x128xf32>
    %326 = arith.mulf %307, %325 : vector<16x128xf32>
    %327 = arith.addf %297, %326 : vector<16x128xf32>
    %c54 = arith.constant 54 : index
    %328 = memref.load %arg6[%c54] : memref<98xf32, #tpu.memory_space<smem>>
    %329 = vector.broadcast %328 : f32 to vector<16x128xf32>
    %330 = arith.mulf %307, %329 : vector<16x128xf32>
    %331 = arith.addf %301, %330 : vector<16x128xf32>
    %c55 = arith.constant 55 : index
    %332 = memref.load %arg6[%c55] : memref<98xf32, #tpu.memory_space<smem>>
    %333 = vector.broadcast %332 : f32 to vector<16x128xf32>
    %334 = arith.mulf %307, %333 : vector<16x128xf32>
    %335 = arith.addf %305, %334 : vector<16x128xf32>
    %c1_92 = arith.constant 1 : index
    %c1_93 = arith.constant 1 : index
    %c0_94 = arith.constant 0 : index
    %336 = vector.load %arg9[%c1_92, %c1_93, %c0_94] : memref<2x22x128xf32, #tpu.memory_space<vmem>>, vector<1x16x128xf32>
    %337 = vector.shape_cast %336 : vector<1x16x128xf32> to vector<16x128xf32>
    %c56 = arith.constant 56 : index
    %338 = memref.load %arg6[%c56] : memref<98xf32, #tpu.memory_space<smem>>
    %339 = vector.broadcast %338 : f32 to vector<16x128xf32>
    %340 = arith.mulf %337, %339 : vector<16x128xf32>
    %341 = arith.addf %311, %340 : vector<16x128xf32>
    %c57 = arith.constant 57 : index
    %342 = memref.load %arg6[%c57] : memref<98xf32, #tpu.memory_space<smem>>
    %343 = vector.broadcast %342 : f32 to vector<16x128xf32>
    %344 = arith.mulf %337, %343 : vector<16x128xf32>
    %345 = arith.addf %315, %344 : vector<16x128xf32>
    %c58 = arith.constant 58 : index
    %346 = memref.load %arg6[%c58] : memref<98xf32, #tpu.memory_space<smem>>
    %347 = vector.broadcast %346 : f32 to vector<16x128xf32>
    %348 = arith.mulf %337, %347 : vector<16x128xf32>
    %349 = arith.addf %319, %348 : vector<16x128xf32>
    %c59 = arith.constant 59 : index
    %350 = memref.load %arg6[%c59] : memref<98xf32, #tpu.memory_space<smem>>
    %351 = vector.broadcast %350 : f32 to vector<16x128xf32>
    %352 = arith.mulf %337, %351 : vector<16x128xf32>
    %353 = arith.addf %323, %352 : vector<16x128xf32>
    %c60 = arith.constant 60 : index
    %354 = memref.load %arg6[%c60] : memref<98xf32, #tpu.memory_space<smem>>
    %355 = vector.broadcast %354 : f32 to vector<16x128xf32>
    %356 = arith.mulf %337, %355 : vector<16x128xf32>
    %357 = arith.addf %327, %356 : vector<16x128xf32>
    %c61 = arith.constant 61 : index
    %358 = memref.load %arg6[%c61] : memref<98xf32, #tpu.memory_space<smem>>
    %359 = vector.broadcast %358 : f32 to vector<16x128xf32>
    %360 = arith.mulf %337, %359 : vector<16x128xf32>
    %361 = arith.addf %331, %360 : vector<16x128xf32>
    %c62 = arith.constant 62 : index
    %362 = memref.load %arg6[%c62] : memref<98xf32, #tpu.memory_space<smem>>
    %363 = vector.broadcast %362 : f32 to vector<16x128xf32>
    %364 = arith.mulf %337, %363 : vector<16x128xf32>
    %365 = arith.addf %335, %364 : vector<16x128xf32>
    %c1_95 = arith.constant 1 : index
    %c2_96 = arith.constant 2 : index
    %c0_97 = arith.constant 0 : index
    %366 = vector.load %arg9[%c1_95, %c2_96, %c0_97] : memref<2x22x128xf32, #tpu.memory_space<vmem>>, vector<1x16x128xf32>
    %367 = vector.shape_cast %366 : vector<1x16x128xf32> to vector<16x128xf32>
    %c63 = arith.constant 63 : index
    %368 = memref.load %arg6[%c63] : memref<98xf32, #tpu.memory_space<smem>>
    %369 = vector.broadcast %368 : f32 to vector<16x128xf32>
    %370 = arith.mulf %367, %369 : vector<16x128xf32>
    %371 = arith.addf %341, %370 : vector<16x128xf32>
    %c64 = arith.constant 64 : index
    %372 = memref.load %arg6[%c64] : memref<98xf32, #tpu.memory_space<smem>>
    %373 = vector.broadcast %372 : f32 to vector<16x128xf32>
    %374 = arith.mulf %367, %373 : vector<16x128xf32>
    %375 = arith.addf %345, %374 : vector<16x128xf32>
    %c65 = arith.constant 65 : index
    %376 = memref.load %arg6[%c65] : memref<98xf32, #tpu.memory_space<smem>>
    %377 = vector.broadcast %376 : f32 to vector<16x128xf32>
    %378 = arith.mulf %367, %377 : vector<16x128xf32>
    %379 = arith.addf %349, %378 : vector<16x128xf32>
    %c66 = arith.constant 66 : index
    %380 = memref.load %arg6[%c66] : memref<98xf32, #tpu.memory_space<smem>>
    %381 = vector.broadcast %380 : f32 to vector<16x128xf32>
    %382 = arith.mulf %367, %381 : vector<16x128xf32>
    %383 = arith.addf %353, %382 : vector<16x128xf32>
    %c67 = arith.constant 67 : index
    %384 = memref.load %arg6[%c67] : memref<98xf32, #tpu.memory_space<smem>>
    %385 = vector.broadcast %384 : f32 to vector<16x128xf32>
    %386 = arith.mulf %367, %385 : vector<16x128xf32>
    %387 = arith.addf %357, %386 : vector<16x128xf32>
    %c68 = arith.constant 68 : index
    %388 = memref.load %arg6[%c68] : memref<98xf32, #tpu.memory_space<smem>>
    %389 = vector.broadcast %388 : f32 to vector<16x128xf32>
    %390 = arith.mulf %367, %389 : vector<16x128xf32>
    %391 = arith.addf %361, %390 : vector<16x128xf32>
    %c69 = arith.constant 69 : index
    %392 = memref.load %arg6[%c69] : memref<98xf32, #tpu.memory_space<smem>>
    %393 = vector.broadcast %392 : f32 to vector<16x128xf32>
    %394 = arith.mulf %367, %393 : vector<16x128xf32>
    %395 = arith.addf %365, %394 : vector<16x128xf32>
    %c1_98 = arith.constant 1 : index
    %c3_99 = arith.constant 3 : index
    %c0_100 = arith.constant 0 : index
    %396 = vector.load %arg9[%c1_98, %c3_99, %c0_100] : memref<2x22x128xf32, #tpu.memory_space<vmem>>, vector<1x16x128xf32>
    %397 = vector.shape_cast %396 : vector<1x16x128xf32> to vector<16x128xf32>
    %c70 = arith.constant 70 : index
    %398 = memref.load %arg6[%c70] : memref<98xf32, #tpu.memory_space<smem>>
    %399 = vector.broadcast %398 : f32 to vector<16x128xf32>
    %400 = arith.mulf %397, %399 : vector<16x128xf32>
    %401 = arith.addf %371, %400 : vector<16x128xf32>
    %c71 = arith.constant 71 : index
    %402 = memref.load %arg6[%c71] : memref<98xf32, #tpu.memory_space<smem>>
    %403 = vector.broadcast %402 : f32 to vector<16x128xf32>
    %404 = arith.mulf %397, %403 : vector<16x128xf32>
    %405 = arith.addf %375, %404 : vector<16x128xf32>
    %c72 = arith.constant 72 : index
    %406 = memref.load %arg6[%c72] : memref<98xf32, #tpu.memory_space<smem>>
    %407 = vector.broadcast %406 : f32 to vector<16x128xf32>
    %408 = arith.mulf %397, %407 : vector<16x128xf32>
    %409 = arith.addf %379, %408 : vector<16x128xf32>
    %c73 = arith.constant 73 : index
    %410 = memref.load %arg6[%c73] : memref<98xf32, #tpu.memory_space<smem>>
    %411 = vector.broadcast %410 : f32 to vector<16x128xf32>
    %412 = arith.mulf %397, %411 : vector<16x128xf32>
    %413 = arith.addf %383, %412 : vector<16x128xf32>
    %c74 = arith.constant 74 : index
    %414 = memref.load %arg6[%c74] : memref<98xf32, #tpu.memory_space<smem>>
    %415 = vector.broadcast %414 : f32 to vector<16x128xf32>
    %416 = arith.mulf %397, %415 : vector<16x128xf32>
    %417 = arith.addf %387, %416 : vector<16x128xf32>
    %c75 = arith.constant 75 : index
    %418 = memref.load %arg6[%c75] : memref<98xf32, #tpu.memory_space<smem>>
    %419 = vector.broadcast %418 : f32 to vector<16x128xf32>
    %420 = arith.mulf %397, %419 : vector<16x128xf32>
    %421 = arith.addf %391, %420 : vector<16x128xf32>
    %c76 = arith.constant 76 : index
    %422 = memref.load %arg6[%c76] : memref<98xf32, #tpu.memory_space<smem>>
    %423 = vector.broadcast %422 : f32 to vector<16x128xf32>
    %424 = arith.mulf %397, %423 : vector<16x128xf32>
    %425 = arith.addf %395, %424 : vector<16x128xf32>
    %c1_101 = arith.constant 1 : index
    %c4_102 = arith.constant 4 : index
    %c0_103 = arith.constant 0 : index
    %426 = vector.load %arg9[%c1_101, %c4_102, %c0_103] : memref<2x22x128xf32, #tpu.memory_space<vmem>>, vector<1x16x128xf32>
    %427 = vector.shape_cast %426 : vector<1x16x128xf32> to vector<16x128xf32>
    %c77 = arith.constant 77 : index
    %428 = memref.load %arg6[%c77] : memref<98xf32, #tpu.memory_space<smem>>
    %429 = vector.broadcast %428 : f32 to vector<16x128xf32>
    %430 = arith.mulf %427, %429 : vector<16x128xf32>
    %431 = arith.addf %401, %430 : vector<16x128xf32>
    %c78 = arith.constant 78 : index
    %432 = memref.load %arg6[%c78] : memref<98xf32, #tpu.memory_space<smem>>
    %433 = vector.broadcast %432 : f32 to vector<16x128xf32>
    %434 = arith.mulf %427, %433 : vector<16x128xf32>
    %435 = arith.addf %405, %434 : vector<16x128xf32>
    %c79 = arith.constant 79 : index
    %436 = memref.load %arg6[%c79] : memref<98xf32, #tpu.memory_space<smem>>
    %437 = vector.broadcast %436 : f32 to vector<16x128xf32>
    %438 = arith.mulf %427, %437 : vector<16x128xf32>
    %439 = arith.addf %409, %438 : vector<16x128xf32>
    %c80 = arith.constant 80 : index
    %440 = memref.load %arg6[%c80] : memref<98xf32, #tpu.memory_space<smem>>
    %441 = vector.broadcast %440 : f32 to vector<16x128xf32>
    %442 = arith.mulf %427, %441 : vector<16x128xf32>
    %443 = arith.addf %413, %442 : vector<16x128xf32>
    %c81 = arith.constant 81 : index
    %444 = memref.load %arg6[%c81] : memref<98xf32, #tpu.memory_space<smem>>
    %445 = vector.broadcast %444 : f32 to vector<16x128xf32>
    %446 = arith.mulf %427, %445 : vector<16x128xf32>
    %447 = arith.addf %417, %446 : vector<16x128xf32>
    %c82 = arith.constant 82 : index
    %448 = memref.load %arg6[%c82] : memref<98xf32, #tpu.memory_space<smem>>
    %449 = vector.broadcast %448 : f32 to vector<16x128xf32>
    %450 = arith.mulf %427, %449 : vector<16x128xf32>
    %451 = arith.addf %421, %450 : vector<16x128xf32>
    %c83 = arith.constant 83 : index
    %452 = memref.load %arg6[%c83] : memref<98xf32, #tpu.memory_space<smem>>
    %453 = vector.broadcast %452 : f32 to vector<16x128xf32>
    %454 = arith.mulf %427, %453 : vector<16x128xf32>
    %455 = arith.addf %425, %454 : vector<16x128xf32>
    %c1_104 = arith.constant 1 : index
    %c5_105 = arith.constant 5 : index
    %c0_106 = arith.constant 0 : index
    %456 = vector.load %arg9[%c1_104, %c5_105, %c0_106] : memref<2x22x128xf32, #tpu.memory_space<vmem>>, vector<1x16x128xf32>
    %457 = vector.shape_cast %456 : vector<1x16x128xf32> to vector<16x128xf32>
    %c84 = arith.constant 84 : index
    %458 = memref.load %arg6[%c84] : memref<98xf32, #tpu.memory_space<smem>>
    %459 = vector.broadcast %458 : f32 to vector<16x128xf32>
    %460 = arith.mulf %457, %459 : vector<16x128xf32>
    %461 = arith.addf %431, %460 : vector<16x128xf32>
    %c85 = arith.constant 85 : index
    %462 = memref.load %arg6[%c85] : memref<98xf32, #tpu.memory_space<smem>>
    %463 = vector.broadcast %462 : f32 to vector<16x128xf32>
    %464 = arith.mulf %457, %463 : vector<16x128xf32>
    %465 = arith.addf %435, %464 : vector<16x128xf32>
    %c86 = arith.constant 86 : index
    %466 = memref.load %arg6[%c86] : memref<98xf32, #tpu.memory_space<smem>>
    %467 = vector.broadcast %466 : f32 to vector<16x128xf32>
    %468 = arith.mulf %457, %467 : vector<16x128xf32>
    %469 = arith.addf %439, %468 : vector<16x128xf32>
    %c87 = arith.constant 87 : index
    %470 = memref.load %arg6[%c87] : memref<98xf32, #tpu.memory_space<smem>>
    %471 = vector.broadcast %470 : f32 to vector<16x128xf32>
    %472 = arith.mulf %457, %471 : vector<16x128xf32>
    %473 = arith.addf %443, %472 : vector<16x128xf32>
    %c88 = arith.constant 88 : index
    %474 = memref.load %arg6[%c88] : memref<98xf32, #tpu.memory_space<smem>>
    %475 = vector.broadcast %474 : f32 to vector<16x128xf32>
    %476 = arith.mulf %457, %475 : vector<16x128xf32>
    %477 = arith.addf %447, %476 : vector<16x128xf32>
    %c89 = arith.constant 89 : index
    %478 = memref.load %arg6[%c89] : memref<98xf32, #tpu.memory_space<smem>>
    %479 = vector.broadcast %478 : f32 to vector<16x128xf32>
    %480 = arith.mulf %457, %479 : vector<16x128xf32>
    %481 = arith.addf %451, %480 : vector<16x128xf32>
    %c90 = arith.constant 90 : index
    %482 = memref.load %arg6[%c90] : memref<98xf32, #tpu.memory_space<smem>>
    %483 = vector.broadcast %482 : f32 to vector<16x128xf32>
    %484 = arith.mulf %457, %483 : vector<16x128xf32>
    %485 = arith.addf %455, %484 : vector<16x128xf32>
    %c1_107 = arith.constant 1 : index
    %c6_108 = arith.constant 6 : index
    %c0_109 = arith.constant 0 : index
    %486 = vector.load %arg9[%c1_107, %c6_108, %c0_109] : memref<2x22x128xf32, #tpu.memory_space<vmem>>, vector<1x16x128xf32>
    %487 = vector.shape_cast %486 : vector<1x16x128xf32> to vector<16x128xf32>
    %c91 = arith.constant 91 : index
    %488 = memref.load %arg6[%c91] : memref<98xf32, #tpu.memory_space<smem>>
    %489 = vector.broadcast %488 : f32 to vector<16x128xf32>
    %490 = arith.mulf %487, %489 : vector<16x128xf32>
    %491 = arith.addf %461, %490 : vector<16x128xf32>
    %c92 = arith.constant 92 : index
    %492 = memref.load %arg6[%c92] : memref<98xf32, #tpu.memory_space<smem>>
    %493 = vector.broadcast %492 : f32 to vector<16x128xf32>
    %494 = arith.mulf %487, %493 : vector<16x128xf32>
    %495 = arith.addf %465, %494 : vector<16x128xf32>
    %c93 = arith.constant 93 : index
    %496 = memref.load %arg6[%c93] : memref<98xf32, #tpu.memory_space<smem>>
    %497 = vector.broadcast %496 : f32 to vector<16x128xf32>
    %498 = arith.mulf %487, %497 : vector<16x128xf32>
    %499 = arith.addf %469, %498 : vector<16x128xf32>
    %c94 = arith.constant 94 : index
    %500 = memref.load %arg6[%c94] : memref<98xf32, #tpu.memory_space<smem>>
    %501 = vector.broadcast %500 : f32 to vector<16x128xf32>
    %502 = arith.mulf %487, %501 : vector<16x128xf32>
    %503 = arith.addf %473, %502 : vector<16x128xf32>
    %c95 = arith.constant 95 : index
    %504 = memref.load %arg6[%c95] : memref<98xf32, #tpu.memory_space<smem>>
    %505 = vector.broadcast %504 : f32 to vector<16x128xf32>
    %506 = arith.mulf %487, %505 : vector<16x128xf32>
    %507 = arith.addf %477, %506 : vector<16x128xf32>
    %c96 = arith.constant 96 : index
    %508 = memref.load %arg6[%c96] : memref<98xf32, #tpu.memory_space<smem>>
    %509 = vector.broadcast %508 : f32 to vector<16x128xf32>
    %510 = arith.mulf %487, %509 : vector<16x128xf32>
    %511 = arith.addf %481, %510 : vector<16x128xf32>
    %c97 = arith.constant 97 : index
    %512 = memref.load %arg6[%c97] : memref<98xf32, #tpu.memory_space<smem>>
    %513 = vector.broadcast %512 : f32 to vector<16x128xf32>
    %514 = arith.mulf %487, %513 : vector<16x128xf32>
    %515 = arith.addf %485, %514 : vector<16x128xf32>
    %516 = vector.extract_strided_slice %491 {offsets = [0, 0], sizes = [16, 16], strides = [1, 1]} : vector<16x128xf32> to vector<16x16xf32>
    %517 = vector.extract_strided_slice %495 {offsets = [0, 1], sizes = [16, 16], strides = [1, 1]} : vector<16x128xf32> to vector<16x16xf32>
    %518 = arith.addf %516, %517 : vector<16x16xf32>
    %519 = vector.extract_strided_slice %499 {offsets = [0, 2], sizes = [16, 16], strides = [1, 1]} : vector<16x128xf32> to vector<16x16xf32>
    %520 = arith.addf %518, %519 : vector<16x16xf32>
    %521 = vector.extract_strided_slice %503 {offsets = [0, 3], sizes = [16, 16], strides = [1, 1]} : vector<16x128xf32> to vector<16x16xf32>
    %522 = arith.addf %520, %521 : vector<16x16xf32>
    %523 = vector.extract_strided_slice %507 {offsets = [0, 4], sizes = [16, 16], strides = [1, 1]} : vector<16x128xf32> to vector<16x16xf32>
    %524 = arith.addf %522, %523 : vector<16x16xf32>
    %525 = vector.extract_strided_slice %511 {offsets = [0, 5], sizes = [16, 16], strides = [1, 1]} : vector<16x128xf32> to vector<16x16xf32>
    %526 = arith.addf %524, %525 : vector<16x16xf32>
    %527 = vector.extract_strided_slice %515 {offsets = [0, 6], sizes = [16, 16], strides = [1, 1]} : vector<16x128xf32> to vector<16x16xf32>
    %528 = arith.addf %526, %527 : vector<16x16xf32>
    %c0_110 = arith.constant 0 : index
    %529 = memref.load %arg7[%c0_110] : memref<2xf32, #tpu.memory_space<smem>>
    %530 = vector.broadcast %529 : f32 to vector<16x16xf32>
    %531 = arith.mulf %528, %530 : vector<16x16xf32>
    %c1_111 = arith.constant 1 : index
    %532 = memref.load %arg7[%c1_111] : memref<2xf32, #tpu.memory_space<smem>>
    %533 = vector.broadcast %532 : f32 to vector<16x16xf32>
    %534 = arith.addf %531, %533 : vector<16x16xf32>
    %535 = arith.negf %534 : vector<16x16xf32>
    %536 = math.exp %535 : vector<16x16xf32>
    %cst_112 = arith.constant 1.000000e+00 : f32
    %537 = vector.broadcast %cst_112 : f32 to vector<16x16xf32>
    %538 = arith.addf %537, %536 : vector<16x16xf32>
    %539 = arith.divf %537, %538 : vector<16x16xf32>
    %540 = vector.shape_cast %539 : vector<16x16xf32> to vector<16x16x1xf32>
    %541 = vector.broadcast %540 : vector<16x16x1xf32> to vector<16x16x32xf32>
    %542 = arith.mulf %66, %541 : vector<16x16x32xf32>
    %c0_113 = arith.constant 0 : index
    %c0_114 = arith.constant 0 : index
    %c0_115 = arith.constant 0 : index
    %c0_116 = arith.constant 0 : index
    %543 = vector.load %arg8[%c0_113, %c0_114, %c0_115, %c0_116] : memref<1x16x16x32xf32, #tpu.memory_space<vmem>>, vector<1x16x16x32xf32>
    %544 = vector.shape_cast %543 : vector<1x16x16x32xf32> to vector<16x16x32xf32>
    %545 = vector.shape_cast %542 : vector<16x16x32xf32> to vector<1x16x16x32xf32>
    tpu.vector_store %arg8[%c0_113, %c0_114, %c0_115, %c0_116], %545 {strides = array<i32>} : memref<1x16x16x32xf32, #tpu.memory_space<vmem>>, vector<1x16x16x32xf32>,
    return
  }
  func.func @transform_0(%arg0: i32) -> (i32, i32, i32, i32) {
    %c0_i32 = arith.constant 0 : i32
    %c0_i32_0 = arith.constant 0 : i32
    %c0_i32_1 = arith.constant 0 : i32
    %c0_i32_2 = arith.constant 0 : i32
    return %arg0, %c0_i32, %c0_i32_0, %c0_i32_1 : i32, i32, i32, i32
  }
  func.func @transform_1(%arg0: i32) -> (i32, i32) {
    %c0_i32 = arith.constant 0 : i32
    %c0_i32_0 = arith.constant 0 : i32
    %c0_i32_1 = arith.constant 0 : i32
    return %c0_i32, %c0_i32_0 : i32, i32
  }
  func.func @transform_2(%arg0: i32) -> (i32, i32) {
    %c0_i32 = arith.constant 0 : i32
    %c0_i32_0 = arith.constant 0 : i32
    %c0_i32_1 = arith.constant 0 : i32
    return %c0_i32, %c0_i32_0 : i32, i32
  }
  func.func @transform_3(%arg0: i32) -> (i32, i32) {
    %c0_i32 = arith.constant 0 : i32
    %c0_i32_0 = arith.constant 0 : i32
    %c0_i32_1 = arith.constant 0 : i32
    return %c0_i32, %c0_i32_0 : i32, i32
  }
  func.func @transform_4(%arg0: i32) -> i32 {
    %c0_i32 = arith.constant 0 : i32
    %c0_i32_0 = arith.constant 0 : i32
    return %c0_i32 : i32
  }
  func.func @transform_5(%arg0: i32) -> i32 {
    %c0_i32 = arith.constant 0 : i32
    %c0_i32_0 = arith.constant 0 : i32
    return %c0_i32 : i32
  }
  func.func @transform_6(%arg0: i32) -> i32 {
    %c0_i32 = arith.constant 0 : i32
    %c0_i32_0 = arith.constant 0 : i32
    return %c0_i32 : i32
  }
  func.func @transform_7(%arg0: i32) -> (i32, i32, i32, i32) {
    %c0_i32 = arith.constant 0 : i32
    %c0_i32_0 = arith.constant 0 : i32
    %c0_i32_1 = arith.constant 0 : i32
    %c0_i32_2 = arith.constant 0 : i32
    return %arg0, %c0_i32, %c0_i32_0, %c0_i32_1 : i32, i32, i32, i32
  }
}

</mosaic_0001>

<bundles_post_ra>
// kernel: tpu_custom_call.1
= control target key start
LH: loop header
LB: loop body
LE: loop exit
PB: predicated region body
PF: predicated region fallthrough
CT: control target
= control target key end

     0   :  { %6 = vsyncpa [#allocation3], 0  ;;  %s128_s0 = inlined_call_operand.hbm [shape: f32[8,128], index: 0, kind: input, shape index: {}]   ;;  %s129_s1 = inlined_call_operand.hbm [shape: f32[8,128], index: 1, kind: output, shape index: {}]  }
   0x1   :  { %7 = vsyncpa [#allocation4], 0  ;;  %s91_s6 = smov [#allocation2]   ;;  %s43_s10 = scalar_lea.hbm %s128_s0, 128 }
   0x2   :  { %s14_s7 = sshll.u32 %s91_s6, 4  ;;  %p44_p0 = scmp.ne.s32.totalorder %s128_s0, %s43_s10  ;;  %s15_s7 = int_to_ptr.vmem [resolvable:$true] %s14_s7 }
   0x3   :  { %p47_p1 = scmp.lt.u32.totalorder %s43_s10, %s128_s0 }
   0x5   :  { %p49_p2 = pnand %p47_p1, %p44_p0 }
   0x7   :  { %52 = shalt.err (!%p49_p2)
}
   0x8   :  { %s53_s15 = scalar_lea.vmem %s15_s7, 128  ;;  %p58_p4 = scmp.lt.s32.totalorder %s15_s7, %s15_s7 }
   0x9   :  { %p54_p3 = scmp.ne.s32.totalorder %s15_s7, %s53_s15  ;;  %p59_p5 = scmp.lt.s32.totalorder %s53_s15, %s53_s15 }
   0xb   :  { %p60_p6 = por %p59_p5, %p58_p4 }
   0xd   :  { %p61_p7 = pnand %p60_p6, %p54_p3 }
   0xf   :  { %64 = shalt.err (!%p61_p7)
}
  0x10   :  { %17 = dma.hbm_to_vmem [thread:$0]  %s128_s0, 128, %s15_s7, [#allocation3]  }
  0x11   :  { %87 = dma.done.wait [#allocation3], 128  }
  0x12   :  { %88 = vsyncadd [#allocation3], 4294967168  ;;  %v21_v0 = vld [vmem:[#allocation2] sm:$0xff]  ;;  %s92_s18 = smov 1   ;;  %s93_s19 = smov [#allocation5]  }
  0x13   :  { %22 = vrot.lane.b32.xlu0 %v21_v0, %s92_s18  ;;  %s31_s20 = sshll.u32 %s93_s19, 4  ;;  %s32_s20 = int_to_ptr.vmem [resolvable:$true] %s31_s20 }
  0x14   :  { %s65_s21 = scalar_lea.vmem %s32_s20, 128  ;;  %p70_p9 = scmp.lt.s32.totalorder %s32_s20, %s32_s20 }
  0x15   :  { %p66_p8 = scmp.ne.s32.totalorder %s32_s20, %s65_s21  ;;  %p71_p10 = scmp.lt.s32.totalorder %s65_s21, %s65_s21 }
  0x17   :  { %p72_p11 = por %p71_p10, %p70_p9 }
  0x19   :  { %p73_p12 = pnand %p72_p11, %p66_p8 }
  0x85   :  { %v23_v1 = vpop.permute.xlu0 %22 }
  0x86   :  { %24 = vst [vmem:[#allocation5] sm:$0xff] %v23_v1 }
  0x87   :  { %76 = shalt.err (!%p73_p12)
}
  0x88   :  { %s77_s0 = scalar_lea.hbm %s129_s1, 128 }
  0x89   :  { %p78_p13 = scmp.ne.s32.totalorder %s129_s1, %s77_s0  ;;  %p81_p0 = scmp.lt.u32.totalorder %s77_s0, %s129_s1 }
  0x8b   :  { %p83_p1 = pnand %p81_p0, %p78_p13 }
  0x8d   :  { %86 = shalt.err (!%p83_p1)
}
  0x8e   :  { %34 = dma.vmem_to_hbm [thread:$0]  %s32_s20, 128, %s129_s1, [#allocation4]  }
  0x8f   :  { %89 = dma.done.wait [#allocation4], 128  }
  0x90   :  { %90 = vsyncadd [#allocation4], 4294967168 }
  0x91   :  { %38 = vsyncpa [#allocation3], 1 }
  0x92   :  { %39 = vsyncpa [#allocation4], 1 }

// kernel: tpu_custom_call.1
= control target key start
LH: loop header
LB: loop body
LE: loop exit
PB: predicated region body
PF: predicated region fallthrough
CT: control target
= control target key end

     0   :  { %s4778_s0 = inlined_call_operand.hbm [shape: f32[2,16,16,32], index: 0, kind: input, shape index: {}]   ;;  %s4779_s1 = inlined_call_operand.vmem [shape: f32[2,32], index: 1, kind: input, shape index: {}]   ;;  %s4780_s2 = inlined_call_operand.vmem [shape: f32[2,32], index: 2, kind: input, shape index: {}]   ;;  %s4781_s3 = inlined_call_operand.vmem [shape: f32[1,32], index: 3, kind: input, shape index: {}]   ;;  %s4782_s4 = inlined_call_operand.vmem [shape: f32[2], index: 4, kind: input, shape index: {}]   ;;  %s4783_s5 = inlined_call_operand.vmem [shape: f32[98], index: 5, kind: input, shape index: {}]   ;;  %s4784_s6 = inlined_call_operand.vmem [shape: f32[2], index: 6, kind: input, shape index: {}]   ;;  %s4785_s7 = inlined_call_operand.hbm [shape: f32[2,16,16,32], index: 7, kind: output, shape index: {}]  }
   0x1   :  { %5016 = sst [smem:[#allocation148_spill]] %s4778_s0 }
   0x2   :  { %5017 = sst [smem:[#allocation149_spill]] %s4779_s1 }
   0x3   :  { %5018 = sst [smem:[#allocation150_spill]] %s4780_s2 }
   0x4   :  { %5019 = sst [smem:[#allocation151_spill]] %s4781_s3 }
   0x5   :  { %5020 = sst [smem:[#allocation152_spill]] %s4782_s4 }
   0x6   :  { %5021 = sst [smem:[#allocation153_spill]] %s4783_s5 }
   0x7   :  { %5022 = sst [smem:[#allocation154_spill]] %s4784_s6 }
   0x8   :  { %5023 = sst [smem:[#allocation155_spill]] %s4785_s7 }
   0x9   :  { %12 = vsyncpa [#allocation4], 0 }
   0xa   :  { %14 = vsyncpa [#allocation4 + $0x1], 0 }
   0xb   :  { %15 = vsyncpa [#allocation6], 0 }
   0xc   :  { %16 = vsyncpa [#allocation9], 0 }
   0xd   :  { %17 = vsyncpa [#allocation5], 0 }
   0xe   :  { %19 = vsyncpa [#allocation5 + $0x1], 0  ;;  %s2712_s24 = smov 0   ;;  %s2714_s25 = smov 0  }
   0xf   :  { %s2716_s26 = smov 0   ;;  %s2718_s27 = smov 0  }
  0x10 LB: > { %5024 = sst [smem:[#allocation16_spill]] %s2642_s24  ;;  %s2733_s28 = sadd.s32 4294967295, %s2654_s27   ;;  %s2654_s27 = sphi %s2718_s27, %s5512_s27   ;;  %s2650_s26 = sphi %s2716_s26, %s5515_s26   ;;  %s2646_s25 = sphi %s2714_s25, %s5514_s25   ;;  %s2642_s24 = sphi %s2712_s24, %s5513_s24  }
  0x11   : > { %5025 = sst [smem:[#allocation17_spill]] %s2646_s25  ;;  %s2281_s29 = sadd.s32 4294967294, %s2654_s27  }
  0x12   : > { %5026 = sst [smem:[#allocation18_spill]] %s2650_s26  ;;  %p45_p0 = scmp.ne.s32.totalorder %s2646_s25, %s2642_s24 }
  0x13   : > { %5027 = sst [smem:[#allocation19_spill]] %s2654_s27  ;;  %p4786_p1 = scmp.eq.s32.totalorder %s2733_s28, 0 }
  0x14   : > { %5028 = sst [smem:[#allocation20_spill]] %s2733_s28  ;;  %p201_p3 = scmp.eq.s32.totalorder %s2281_s29, 1 }
  0x15   : > { %p2742_p4 = por %p4786_p1, %p45_p0  ;;  %p2282_p5 = scmp.ge.s32.totalorder %s2654_s27, 1 }
  0x16   : > { %p2747_p6 = por %p201_p3, %p45_p0  ;;  %p208_p7 = scmp.lt.s32.totalorder %s2654_s27, 3 }
  0x17   : > { %s5029_s30 = scalar_select %p2742_p4, 1, 0 }
  0x18   : > { %s5030_s8 = scalar_select %p2747_p6, 1, 0 }
  0x19   : > { %s5032_s5 = sld [smem:[#allocation153_spill]]  ;;  %p2755_p8 = pnand %p2282_p5, %p208_p7 }
  0x1a   : > { %5031 = sst [smem:[#allocation21_spill]] %s5030_s8  ;;  %s5034_s4 = sld [smem:[#allocation152_spill]] }
  0x1b   : > { %s5033_s12 = scalar_select %p2755_p8, 1, 0 }
  0x1c   : > { %p2421_p10 = pneg %p2755_p8  ;;  %s5036_s6 = sld [smem:[#allocation154_spill]] }
  0x1e   : > { %p2767_p11 = pnand %p2421_p10, %p4786_p1 }
  0x1f   : > { %s241_s11 = sshll.u32 %s5032_s5, 4  ;;  %s242_s11 = int_to_ptr.vmem [resolvable:$true] %s241_s11 }
  0x20   : > { %s230_s15 = sshll.u32 %s5034_s4, 4  ;;  %s2505_s20 = scalar_lea.vmem %s242_s11, 16  ;;  %s231_s15 = int_to_ptr.vmem [resolvable:$true] %s230_s15 }
  0x21   : > { %p2506_p12 = scmp.ne.s32.totalorder %s242_s11, %s2505_s20  ;;  %p2507_p13 = pneg %p2767_p11 }
  0x22   : > { %s252_s19 = sshll.u32 %s5036_s6, 4  ;;  %p2513_p5 = scmp.lt.s32.totalorder %s242_s11, %s242_s11  ;;  %s2774_s19 = int_to_ptr.vmem [resolvable:$true] %s252_s19 }
  0x23   : > { %p2508_p0 = pnand %p2507_p13, %p2506_p12  ;;  %p2514_p7 = scmp.lt.s32.totalorder %s2505_s20, %s2505_s20 }
  0x25   : > { %p2509_p3 = pneg %p2508_p0  ;;  %p2515_p10 = por %p2514_p7, %p2513_p5 }
  0x27   : > { %p2516_p9 = pnand %p2515_p10, %p2509_p3 }
  0x29   : > { %2519 = shalt.err (!%p2516_p9)
}
  0x2a   : > { %s2656_s21 = smov [#allocation8]   ;;  %s2520_s22 = scalar_lea.vmem %s231_s15, 16 }
  0x2b   : > { %2427 = dma.vmem_to_smem (!%p2767_p11), %s242_s11, 16, %s2656_s21, [#allocation9]  }
  0x2c   : > { %p2521_p1 = scmp.ne.s32.totalorder %s231_s15, %s2520_s22  ;;  %p2528_p4 = scmp.lt.s32.totalorder %s231_s15, %s231_s15 }
  0x2d   : > { %p2529_p8 = scmp.lt.s32.totalorder %s2520_s22, %s2520_s22 }
  0x2e   : > { %p2523_p2 = pnand %p2521_p1, %p2507_p13 }
  0x2f   : > { %p2530_p12 = por %p2529_p8, %p2528_p4 }
  0x30   : > { %p2524_p6 = pneg %p2523_p2 }
  0x32   : > { %p2531_p0 = pnand %p2530_p12, %p2524_p6 }
  0x34   : > { %2534 = shalt.err (!%p2531_p0)
}
  0x35   : > { %s2657_s23 = smov [#allocation7]   ;;  %s2535_s29 = scalar_lea.vmem %s2774_s19, 16 }
  0x36   : > { %2424 = dma.vmem_to_smem (!%p2767_p11), %s231_s15, 16, %s2657_s23, [#allocation6]  }
  0x37   : > { %p2536_p9 = scmp.ne.s32.totalorder %s2774_s19, %s2535_s29  ;;  %p2543_p2 = scmp.lt.s32.totalorder %s2774_s19, %s2774_s19 }
  0x38   : > { %p2544_p5 = scmp.lt.s32.totalorder %s2535_s29, %s2535_s29 }
  0x39   : > { %p2538_p3 = pnand %p2536_p9, %p2507_p13 }
  0x3a   : > { %p2545_p4 = por %p2544_p5, %p2543_p2 }
  0x3b   : > { %p2539_p1 = pneg %p2538_p3 }
  0x3d   : > { %p2546_p6 = pnand %p2545_p4, %p2539_p1 }
  0x3f   : > { %2549 = shalt.err (!%p2546_p6)
}
  0x40   : > { %s2658_s9 = smov [#allocation10]   ;;  %s2799_s10 = sadd.s32 1, %s2654_s27  }
  0x41   : > { %2430 = dma.vmem_to_smem (!%p2767_p11), %s2774_s19, 16, %s2658_s9, [#allocation9]  }
  0x42   : > { %5037 = sst [smem:[#allocation22_spill]] %s2799_s10  ;;  %s29_s11 = ssub.s32 %s2654_s27, %s2799_s10 }
  0x43   : > { %s32_s13 = sadd.s32 1, %s2650_s26  ;;  %p30_p8 = scmp.eq.s32.totalorder %s29_s11, 0 }
  0x44   : > { %p39_p13 = scmp.ne.s32.totalorder %s2650_s26, %s2646_s25  ;;  %p40_p7 = scmp.eq.s32.totalorder %s2654_s27, 0 }
  0x45   : > { %p2442_p10 = scmp.lt.s32.totalorder %s2654_s27, 2  ;;  %p5039_p0 = scmp.eq.s32.totalorder %s2733_s28, 1 }
  0x46   : > { %s2809_s14 = scalar_select %p30_p8, %s2650_s26, %s32_s13  }
  0x47   : > { %p41_p12 = por %p40_p7, %p39_p13  ;;  %p2813_p9 = por %p5039_p0, %p39_p13 }
  0x48   : > { %5038 = sst [smem:[#allocation23_spill]] %s2809_s14  ;;  %s263_s16 = sand.u32 1, %s2650_s26  }
  0x49   : > { %s5040_s15 = scalar_select %p2813_p9, 1, 0 }
  0x4a   : > { %s2403_s17 = sshll.u32 %s2654_s27, 12  ;;  %s2287_s18 = sshll.u32 %s263_s16, 8 }
  0x4b   : > { %5041 = sst [smem:[#allocation24_spill]] %s5040_s15  ;;  %s267_s22 = scalar_lea.vmem [#allocation3], %s2287_s18 }
  0x4c   : > { %s5042_s0 = sld [smem:[#allocation148_spill]]  ;;  %s274_s23 = sshll.u32 %s267_s22, 4  ;;  %s2828_s23 = int_to_ptr.vmem [resolvable:$true] %s274_s23 }
  0x4d   : > { %p2824_p11 = pnand %p2442_p10, %p41_p12  ;;  %s2830_s9 = scalar_lea.sflag [#allocation4], %s263_s16 }
  0x4f   : > { %p2552_p1 = pneg %p2824_p11 }
  0x52   : > { %s2822_s21 = scalar_lea.hbm %s5042_s0, %s2403_s17  ;;  %s2555_s18 = scalar_lea.hbm %s5042_s0, 8192 }
  0x53   : > { %s2550_s11 = scalar_lea.hbm %s2822_s21, 4096  ;;  %p2556_p4 = scmp.lt.u32.totalorder %s2822_s21, %s5042_s0 }
  0x54   : > { %p2551_p3 = scmp.ne.s32.totalorder %s2822_s21, %s2550_s11  ;;  %p2557_p6 = scmp.lt.u32.totalorder %s2555_s18, %s2550_s11 }
  0x55   : > { %p2559_p13 = scmp.lt.u32.totalorder %s2550_s11, %s2822_s21 }
  0x56   : > { %p2553_p2 = pnand %p2552_p1, %p2551_p3  ;;  %p2558_p8 = por %p2557_p6, %p2556_p4 }
  0x58   : > { %p2554_p5 = pneg %p2553_p2  ;;  %p2560_p7 = por %p2559_p13, %p2558_p8 }
  0x5a   : > { %p2561_p10 = pnand %p2560_p7, %p2554_p5 }
  0x5c   : > { %2564 = shalt.err (!%p2561_p10)
}
  0x5d   : > { %s2565_s16 = scalar_lea.vmem %s2828_s23, 4096  ;;  %s2659_s22 = smov [#allocation3]  }
  0x5e   : > { %p2566_p12 = scmp.ne.s32.totalorder %s2828_s23, %s2565_s16  ;;  %s2570_s13 = sshll.u32 %s2659_s22, 4  ;;  %s2571_s13 = int_to_ptr.vmem [resolvable:$false] %s2570_s13 }
  0x5f   : > { %s2572_s17 = scalar_lea.vmem %s2571_s13, 8192  ;;  %p2573_p2 = scmp.lt.s32.totalorder %s2828_s23, %s2571_s13 }
  0x60   : > { %p2568_p0 = pnand %p2566_p12, %p2552_p1  ;;  %p2574_p4 = scmp.lt.s32.totalorder %s2572_s17, %s2565_s16 }
  0x62   : > { %p2569_p3 = pneg %p2568_p0  ;;  %p2575_p6 = por %p2574_p4, %p2573_p2 }
  0x64   : > { %p2576_p8 = pnand %p2575_p6, %p2569_p3 }
  0x66   : > { %2579 = shalt.err (!%p2576_p8)
}
  0x67   : > { %s2660_s11 = smov 128   ;;  %s2661_s18 = smov 8  }
  0x68   : > { %2434 = dma.hbm_to_vmem [thread:$0]  (!%p2824_p11), %s2822_s21, 4096, %s2828_s23, %s2830_s9, %s2660_s11, %s2660_s11, %s2661_s18  }
  0x69   : > { %p5044_p1 = scmp.ne.s32.totalorder %s5033_s12, 0 }
  0x6b   : > { %286 = sbr.rel (%p5044_p1) target bundleno = 1062 (0x426), region = 48 }
  0x72   : > { %s2861_s19 = sand.u32 1, %s2646_s25   ;;  %p5046_p5 = scmp.ne.s32.totalorder %s5029_s30, 0 }
  0x73   : > { %5045 = sst [smem:[#allocation25_spill]] %s2861_s19  ;;  %s4794_s20 = sshll.u32 %s2861_s19, 8 }
  0x74   : > { %s289_s16 = scalar_lea.sflag [#allocation4], %s2861_s19  ;;  %s2867_s22 = scalar_lea.vmem [#allocation3], %s4794_s20 }
  0x75   : > { %2625 = dma.done.wait (%p5046_p5), %s289_s16, 4096  }
  0x76   : > { %2627 = vsyncadd (%p5046_p5), %s289_s16, 4294963200  ;;  %p5047_p11 = scmp.eq.s32.totalorder %s2733_s28, 0 }
  0x78   : > { %2629 = dma.done.wait (%p5047_p11), [#allocation6], 16   ;;  %p5048_p13 = pmov %p5047_p11 }
  0x79   : > { %p5049_p7 = pmov %p5047_p11 }
  0x7a   : > { %2631 = vsyncadd (%p5048_p13), [#allocation6], 4294967280 }
  0x7b   : > { %2633 = dma.done.wait (%p5049_p7), [#allocation9], 32   ;;  %p5050_p10 = pmov %p5049_p7 }
  0x7d   : > { %2635 = vsyncadd (%p5050_p10), [#allocation9], 4294967264 }
  0x7e   : > { %309 = sfence }
  0x7f   : > { %v2882_v0 = vld [vmem:[%s2867_s22] sm:$0xff]  ;;  %v2885_v1 = vld [vmem:[%s2867_s22 + $0x8] sm:$0xff]  ;;  %v2888_v2 = vld [vmem:[%s2867_s22 + $0x10] sm:$0xff]  ;;  %vm368_vm0 = vcmask 261120   ;;  %s5056_s1 = sld [smem:[#allocation149_spill]]  ;;  %vm519_vm1 = vcmask 253952  }
  0x80   : > { %v2891_v3 = vld [vmem:[%s2867_s22 + $0x18] sm:$0xff]  ;;  %v2894_v4 = vld [vmem:[%s2867_s22 + $0x20] sm:$0xff]  ;;  %v2897_v5 = vld [vmem:[%s2867_s22 + $0x28] sm:$0xff]  ;;  %v369_v6 = vsel %vm368_vm0, %v2882_v0, 0.0  ;;  %v370_v7 = vsel %vm368_vm0, %v2888_v2, 0.0  ;;  %v400_v8 = vsel %vm368_vm0, %v2885_v1, 0.0 }
  0x81   : > { %5051 = vst [vmem:[#allocation26_spill] sm:$0xff] %v2894_v4  ;;  %v2906_v9 = vld [vmem:[%s2867_s22 + $0x30] sm:$0xff]  ;;  %v2909_v10 = vld [vmem:[%s2867_s22 + $0x38] sm:$0xff]  ;;  %v2912_v11 = vld [vmem:[%s2867_s22 + $0x40] sm:$0xff]  ;;  %v371_v12 = vadd.f32 %v370_v7, %v369_v6  ;;  %v372_v13 = vsel %vm368_vm0, %v2894_v4, 0.0  ;;  %v401_v14 = vsel %vm368_vm0, %v2891_v3, 0.0 }
  0x82   : > { %v403_v15 = vsel %vm368_vm0, %v2897_v5, 0.0  ;;  %v2921_v16 = vld [vmem:[%s2867_s22 + $0x48] sm:$0xff]  ;;  %v2924_v17 = vld [vmem:[%s2867_s22 + $0x50] sm:$0xff]  ;;  %v2927_v18 = vld [vmem:[%s2867_s22 + $0x58] sm:$0xff]  ;;  %v374_v19 = vsel %vm368_vm0, %v2906_v9, 0.0  ;;  %v402_v20 = vadd.f32 %v401_v14, %v400_v8  ;;  %v376_v25 = vsel %vm368_vm0, %v2912_v11, 0.0 }
  0x83   : > { %v2932_v21 = vld [vmem:[%s2867_s22 + $0x60] sm:$0xff]  ;;  %v2935_v22 = vld [vmem:[%s2867_s22 + $0x68] sm:$0xff]  ;;  %v2938_v23 = vld [vmem:[%s2867_s22 + $0x70] sm:$0xff]  ;;  %v373_v24 = vadd.f32 %v372_v13, %v371_v12  ;;  %v378_v26 = vsel %vm368_vm0, %v2924_v17, 0.0  ;;  %v405_v27 = vsel %vm368_vm0, %v2909_v10, 0.0  ;;  %v407_v33 = vsel %vm368_vm0, %v2921_v16, 0.0 }
  0x84   : > { %5052 = vst [vmem:[#allocation27_spill] sm:$0xff] %v2932_v21  ;;  %5053 = vst [vmem:[#allocation28_spill] sm:$0xff] %v2938_v23  ;;  %v2947_v28 = vld [vmem:[%s2867_s22 + $0x78] sm:$0xff]  ;;  %v2950_v29 = vld [vmem:[%s2867_s22 + $0x80] sm:$0xff]  ;;  %v380_v31 = vsel %vm368_vm0, %v2932_v21, 0.0  ;;  %v404_v32 = vadd.f32 %v403_v15, %v402_v20  ;;  %v409_v34 = vsel %vm368_vm0, %v2927_v18, 0.0 }
  0x85   : > { %v2953_v30 = vld [vmem:[%s2867_s22 + $0x88] sm:$0xff]  ;;  %v2962_v35 = vld [vmem:[%s2867_s22 + $0x90] sm:$0xff]  ;;  %v2965_v36 = vld [vmem:[%s2867_s22 + $0x98] sm:$0xff]  ;;  %v375_v38 = vadd.f32 %v374_v19, %v373_v24  ;;  %v382_v39 = vsel %vm368_vm0, %v2938_v23, 0.0  ;;  %v384_v40 = vsel %vm368_vm0, %v2950_v29, 0.0  ;;  %v411_v41 = vsel %vm368_vm0, %v2935_v22, 0.0 }
  0x86   : > { %v2968_v37 = vld [vmem:[%s2867_s22 + $0xa0] sm:$0xff]  ;;  %v2977_v42 = vld [vmem:[%s2867_s22 + $0xa8] sm:$0xff]  ;;  %v2980_v43 = vld [vmem:[%s2867_s22 + $0xb0] sm:$0xff]  ;;  %v386_v45 = vsel %vm368_vm0, %v2962_v35, 0.0  ;;  %v406_v46 = vadd.f32 %v405_v27, %v404_v32  ;;  %v413_v47 = vsel %vm368_vm0, %v2947_v28, 0.0  ;;  %v415_v48 = vsel %vm368_vm0, %v2953_v30, 0.0 }
  0x87   : > { %v2983_v44 = vld [vmem:[%s2867_s22 + $0xb8] sm:$0xff]  ;;  %v2992_v49 = vld [vmem:[%s2867_s22 + $0xc0] sm:$0xff]  ;;  %v2995_v50 = vld [vmem:[%s2867_s22 + $0xc8] sm:$0xff]  ;;  %v377_v52 = vadd.f32 %v376_v25, %v375_v38  ;;  %v388_v53 = vsel %vm368_vm0, %v2968_v37, 0.0  ;;  %v390_v54 = vsel %vm368_vm0, %v2980_v43, 0.0  ;;  %v417_v55 = vsel %vm368_vm0, %v2965_v36, 0.0 }
  0x88   : > { %v2998_v51 = vld [vmem:[%s2867_s22 + $0xd0] sm:$0xff]  ;;  %v3007_v56 = vld [vmem:[%s2867_s22 + $0xd8] sm:$0xff]  ;;  %v3010_v57 = vld [vmem:[%s2867_s22 + $0xe0] sm:$0xff]  ;;  %v392_v59 = vsel %vm368_vm0, %v2992_v49, 0.0  ;;  %v408_v60 = vadd.f32 %v407_v33, %v406_v46  ;;  %v419_v61 = vsel %vm368_vm0, %v2977_v42, 0.0  ;;  %v421_v62 = vsel %vm368_vm0, %v2983_v44, 0.0 }
  0x89   : > { %5054 = vst [vmem:[#allocation29_spill] sm:$0xff] %v2998_v51  ;;  %5055 = vst [vmem:[#allocation30_spill] sm:$0xff] %v3010_v57  ;;  %v3013_v58 = vld [vmem:[%s2867_s22 + $0xe8] sm:$0xff]  ;;  %v3022_v63 = vld [vmem:[%s2867_s22 + $0xf0] sm:$0xff]  ;;  %v379_v6 = vadd.f32 %v378_v26, %v377_v52  ;;  %v3026_v7 = vsel %vm368_vm0, %v2998_v51, 0.0  ;;  %v3030_v8 = vsel %vm368_vm0, %v3010_v57, 0.0 }
  0x8a   : > { %v423_v12 = vsel %vm368_vm0, %v2995_v50, 0.0  ;;  %v3036_v13 = vsel %vm368_vm0, %v3022_v63, 0.0  ;;  %v410_v14 = vadd.f32 %v409_v34, %v408_v60  ;;  %v3040_v15 = vsel %vm368_vm0, %v3007_v56, 0.0  ;;  %v3047_v20 = vld [vmem:[%s2867_s22 + $0xf8] sm:$0xff]  ;;  %s2296_s29 = sld [smem:[#allocation7 + $0x1]]  ;;  %s523_s9 = sld [smem:[#allocation7]] }
  0x8b   : > { %v3044_v19 = vsel %vm368_vm0, %v3013_v58, 0.0  ;;  %v381_v24 = vadd.f32 %v380_v31, %v379_v6  ;;  %v444_v25 = vsel %vm368_vm0, %v2882_v0, -inf  ;;  %v445_v26 = vsel %vm368_vm0, %v2888_v2, -inf  ;;  %s5057_s3 = sld [smem:[#allocation151_spill]]  ;;  %s5058_s2 = sld [smem:[#allocation150_spill]] }
  0x8c   : > { %v446_v27 = vsel %vm368_vm0, %v2894_v4, -inf  ;;  %v412_v32 = vadd.f32 %v411_v41, %v410_v14  ;;  %v448_v34 = vsel %vm368_vm0, %v2906_v9, -inf  ;;  %v450_v38 = vsel %vm368_vm0, %v2912_v11, -inf  ;;  %s3428_s30 = sld [smem:[#allocation8 + $0x1]]  ;;  %s3430_s12 = sld [smem:[#allocation8 + $0x8]] }
  0x8d   : > { %v447_v33 = vmax.f32 %v444_v25, %v446_v27  ;;  %v383_v46 = vadd.f32 %v382_v39, %v381_v24  ;;  %v449_v52 = vmax.f32 %v445_v26, %v448_v34  ;;  %v452_v31 = vsel %vm368_vm0, %v2924_v17, -inf  ;;  %s3432_s21 = sld [smem:[#allocation8 + $0xf]]  ;;  %s3434_s23 = sld [smem:[#allocation8 + $0x16]] }
  0x8e   : > { %v454_v60 = vsel %vm368_vm0, %v2932_v21, -inf  ;;  %v414_v6 = vadd.f32 %v413_v47, %v412_v32  ;;  %v429_v4 = vsel %vm368_vm0, %v3047_v20, 0.0  ;;  %v456_v14 = vsel %vm368_vm0, %v2938_v23, -inf  ;;  %s3440_s13 = sld [smem:[#allocation8 + $0x11]]  ;;  %s3446_s17 = sld [smem:[#allocation8 + $0x1d]] }
  0x8f   : > { %v451_v41 = vmax.f32 %v447_v33, %v450_v38  ;;  %v385_v25 = vadd.f32 %v384_v40, %v383_v46  ;;  %v453_v27 = vmax.f32 %v449_v52, %v452_v31  ;;  %v458_v39 = vsel %vm368_vm0, %v2950_v29, -inf  ;;  %s3448_s11 = sld [smem:[#allocation8 + $0x18]]  ;;  %s3450_s18 = sld [smem:[#allocation8 + $0x24]] }
  0x90   : > { %v460_v24 = vsel %vm368_vm0, %v2962_v35, -inf  ;;  %v416_v26 = vadd.f32 %v415_v48, %v414_v6  ;;  %v462_v47 = vsel %vm368_vm0, %v2968_v37, -inf  ;;  %v464_v32 = vsel %vm368_vm0, %v2980_v43, -inf  ;;  %s3452_s16 = sld [smem:[#allocation8 + $0x2b]]  ;;  %s3454_s22 = sld [smem:[#allocation8 + $0x1f]] }
  0x91   : > { %v455_v34 = vmax.f32 %v451_v41, %v454_v60  ;;  %v387_v33 = vadd.f32 %v386_v45, %v385_v25  ;;  %v457_v38 = vmax.f32 %v453_v27, %v456_v14  ;;  %v466_v40 = vsel %vm368_vm0, %v2992_v49, -inf  ;;  %s3456_s20 = sld [smem:[#allocation8 + $0x26]]  ;;  %s3459_s0 = sld [smem:[#allocation8 + $0x2d]] }
  0x92   : > { %v468_v46 = vsel %vm368_vm0, %v2998_v51, -inf  ;;  %v418_v52 = vadd.f32 %v417_v55, %v416_v26  ;;  %v470_v48 = vsel %vm368_vm0, %v3010_v57, -inf  ;;  %v475_v60 = vsel %vm368_vm0, %v2885_v1, -inf  ;;  %s3471_s4 = sld [smem:[#allocation8 + $0x19]]  ;;  %s3473_s5 = sld [smem:[#allocation8 + $0x20]] }
  0x93   : > { %v459_v31 = vmax.f32 %v455_v34, %v458_v39  ;;  %v389_v6 = vadd.f32 %v388_v53, %v387_v33  ;;  %v461_v41 = vmax.f32 %v457_v38, %v460_v24  ;;  %v476_v45 = vsel %vm368_vm0, %v2891_v3, -inf  ;;  %5097 = sst [smem:[#allocation59_spill]] %s3432_s21  ;;  %s3475_s6 = sld [smem:[#allocation8 + $0x27]] }
  0x94   : > { %v477_v14 = vsel %vm368_vm0, %v2897_v5, -inf  ;;  %v420_v25 = vadd.f32 %v419_v61, %v418_v52  ;;  %v479_v55 = vsel %vm368_vm0, %v2909_v10, -inf  ;;  %v481_v57 = vsel %vm368_vm0, %v2921_v16, -inf  ;;  %5098 = sst [smem:[#allocation60_spill]] %s3434_s23  ;;  %s3477_s14 = sld [smem:[#allocation8 + $0x2e]] }
  0x95   : > { %v463_v27 = vmax.f32 %v459_v31, %v462_v47  ;;  %v478_v23 = vmax.f32 %v475_v60, %v477_v14  ;;  %v391_v39 = vadd.f32 %v390_v54, %v389_v6  ;;  %v465_v26 = vmax.f32 %v461_v41, %v464_v32  ;;  %5099 = sst [smem:[#allocation61_spill]] %s3440_s13  ;;  %s3479_s26 = sld [smem:[#allocation8 + $0x2]] }
  0x96   : > { %v480_v34 = vmax.f32 %v476_v45, %v479_v55  ;;  %v422_v53 = vadd.f32 %v421_v62, %v420_v25  ;;  %v483_v38 = vsel %vm368_vm0, %v2927_v18, -inf  ;;  %v485_v47 = vsel %vm368_vm0, %v2935_v22, -inf  ;;  %5100 = sst [smem:[#allocation62_spill]] %s3446_s17  ;;  %s3481_s25 = sld [smem:[#allocation8 + $0x9]] }
  0x97   : > { %v467_v24 = vmax.f32 %v463_v27, %v466_v40  ;;  %v482_v33 = vmax.f32 %v478_v23, %v481_v57  ;;  %v393_v21 = vadd.f32 %v392_v59, %v391_v39  ;;  %v469_v51 = vmax.f32 %v465_v26, %v468_v46  ;;  %5101 = sst [smem:[#allocation63_spill]] %s3448_s11  ;;  %s3487_s10 = sld [smem:[#allocation8 + $0x10]] }
  0x98   : > { %v484_v61 = vmax.f32 %v480_v34, %v483_v38  ;;  %v424_v52 = vadd.f32 %v423_v12, %v422_v53  ;;  %v472_v54 = vsel %vm368_vm0, %v3022_v63, -inf  ;;  %v487_v31 = vsel %vm368_vm0, %v2947_v28, -inf  ;;  %5102 = sst [smem:[#allocation64_spill]] %s3450_s18  ;;  %s3491_s8 = sld [smem:[#allocation8 + $0x1e]] }
  0x99   : > { %v486_v32 = vmax.f32 %v482_v33, %v485_v47  ;;  %v395_v62 = vadd.f32 %v3026_v7, %v393_v21  ;;  %v471_v23 = vmax.f32 %v467_v24, %v470_v48  ;;  %v489_v59 = vsel %vm368_vm0, %v2953_v30, -inf  ;;  %5103 = sst [smem:[#allocation65_spill]] %s3452_s16  ;;  %s3489_s27 = sld [smem:[#allocation8 + $0x17]] }
  0x9a   : > { %v488_v57 = vmax.f32 %v484_v61, %v487_v31  ;;  %v426_v40 = vadd.f32 %v3040_v15, %v424_v52  ;;  %v491_v12 = vsel %vm368_vm0, %v2965_v36, -inf  ;;  %v493_v60 = vsel %vm368_vm0, %v2977_v42, -inf  ;;  %5104 = sst [smem:[#allocation66_spill]] %s3454_s22  ;;  %s3493_s24 = sld [smem:[#allocation8 + $0x25]] }
  0x9b   : > { %v490_v46 = vmax.f32 %v486_v32, %v489_v59  ;;  %v397_v6 = vadd.f32 %v3030_v8, %v395_v62  ;;  %v473_v41 = vmax.f32 %v469_v51, %v472_v54  ;;  %v495_v21 = vsel %vm368_vm0, %v2983_v44, -inf  ;;  %5105 = sst [smem:[#allocation67_spill]] %s3456_s20  ;;  %s3495_s7 = sld [smem:[#allocation8 + $0x2c]] }
  0x9c   : > { %v492_v45 = vmax.f32 %v488_v57, %v491_v12  ;;  %v428_v7 = vadd.f32 %v3044_v19, %v426_v40  ;;  %v497_v15 = vsel %vm368_vm0, %v2995_v50, -inf  ;;  %v499_v14 = vsel %vm368_vm0, %v3007_v56, -inf  ;;  %5106 = sst [smem:[#allocation68_spill]] %s3459_s0  ;;  %s3497_s15 = sld [smem:[#allocation8 + $0x5]] }
  0x9d   : > { %v494_v48 = vmax.f32 %v490_v46, %v493_v60  ;;  %v399_v25 = vadd.f32 %v3036_v13, %v397_v6  ;;  %v501_v8 = vsel %vm368_vm0, %v3013_v58, -inf  ;;  %v503_v39 = vsel %vm368_vm0, %v3047_v20, -inf  ;;  %v537_v6 = vld [vmem:[%s5056_s1 + $0x1] sm:$0x1]  ;;  %5110 = sst [smem:[#allocation72_spill]] %s3471_s4  ;;  %s3502_s28 = sld [smem:[#allocation8 + $0xc]] }
  0x9e   : > { %v496_v27 = vmax.f32 %v492_v45, %v495_v21  ;;  %v430_v51 = vadd.f32 %v429_v4, %v428_v7  ;;  %v474_v19 = vmax.f32 %v471_v23, %v473_v41  ;;  %v517_v41 = vld [vmem:[%s5056_s1] sm:$0x1]  ;;  %vm827_vm2 = vcmask 23552   ;;  %s3461_s1 = sld [smem:[#allocation8 + $0x4]]  ;;  %5111 = sst [smem:[#allocation73_spill]] %s3473_s5 }
  0x9f   : > { %v498_v55 = vmax.f32 %v494_v48, %v497_v15  ;;  %v432_v26 = vmul.f32 0.0625, %v399_v25  ;;  %vm830_vm3 = vcmask 179352   ;;  %5112 = sst [smem:[#allocation74_spill]] %s3475_s6  ;;  %s3504_s19 = sld [smem:[#allocation8 + $0x13]]  ;;  %vm884_vm4 = vcmask 154712  }
  0xa0   : > { %v500_v34 = vmax.f32 %v496_v27, %v499_v14  ;;  %v433_v53 = vmul.f32 0.0625, %v430_v51  ;;  %v506_v52 = vsel %vm368_vm0, %v474_v19, -inf  ;;  %v524_v19 = vstv %s523_s9  ;;  %s3438_s9 = sld [smem:[#allocation8 + $0xa]]  ;;  %5114 = sst [smem:[#allocation76_spill]] %s3479_s26 }
  0xa1   : > { %v502_v24 = vmax.f32 %v498_v55, %v501_v8  ;;  %v434_v33 = vsel %vm368_vm0, %v432_v26, 0.0  ;;  %5113 = sst [smem:[#allocation75_spill]] %s3477_s14  ;;  %s3536_s13 = sld [smem:[#allocation8 + $0x6]]  ;;  %vm1021_vm5 = vcmask 1041409   ;;  %vm1023_vm6 = vcmask 1042434  }
  0xa2   : > { %v504_v38 = vmax.f32 %v500_v34, %v503_v39  ;;  %v435_v61 = vsel %vm368_vm0, %v433_v53, 0.0  ;;  %v543_v39 = vstv %s2296_s29  ;;  %s3436_s29 = sld [smem:[#allocation8 + $0x3]]  ;;  %5115 = sst [smem:[#allocation77_spill]] %s3481_s25  ;;  %vm1025_vm7 = vcmask 1043459  }
  0xa3   : > { %v436_v13 = vadd.f32 %v435_v61, %v434_v33  ;;  %5116 = sst [smem:[#allocation78_spill]] %s3487_s10  ;;  %s3548_s0 = sld [smem:[#allocation8 + $0x14]]  ;;  %vm1027_vm8 = vcmask 1044484   ;;  %vm1029_vm9 = vcmask 1045509   ;;  %vm1031_vm10 = vcmask 1046534  }
  0xa4   : > { %v505_v47 = vmax.f32 %v502_v24, %v504_v38  ;;  %5107 = sst [smem:[#allocation69_spill]] %s3461_s1  ;;  %s3538_s23 = sld [smem:[#allocation8 + $0xd]]  ;;  %vm1033_vm11 = vcmask 1047559   ;;  %vm1044_vm12 = vcmask 154648  }
  0xa5   : > { %v437_v54 = vrot.slane %v436_v13, 4  ;;  %5117 = sst [smem:[#allocation79_spill]] %s3489_s27  ;;  %s3550_s22 = sld [smem:[#allocation8 + $0x1b]] }
  0xa6   : > { %v507_v4 = vsel %vm368_vm0, %v505_v47, -inf  ;;  %v515_v47 = vld [vmem:[%s5057_s3] sm:$0x1]  ;;  %s3469_s3 = sld [smem:[#allocation8 + $0x12]]  ;;  %5118 = sst [smem:[#allocation80_spill]] %s3491_s8 }
  0xa7   : > { %v508_v32 = vmax.f32 %v506_v52, %v507_v4  ;;  %v438_v31 = vadd.f32 %v437_v54, %v436_v13  ;;  %5119 = sst [smem:[#allocation81_spill]] %s3493_s24  ;;  %s3556_s1 = sld [smem:[#allocation8 + $0x22]] }
  0xa8   : > { %5120 = sst [smem:[#allocation82_spill]] %s3495_s7  ;;  %s3526_s7 = sld [smem:[#allocation8 + $0x2f]] }
  0xa9   : > { %v509_v62 = vrot.slane %v508_v32, 4  ;;  %v439_v57 = vrot.slane %v438_v31, 2  ;;  %5121 = sst [smem:[#allocation83_spill]] %s3497_s15  ;;  %s3524_s15 = sld [smem:[#allocation8 + $0x28]] }
  0xaa   : > { %5122 = sst [smem:[#allocation84_spill]] %s3502_s28  ;;  %s3516_s28 = sld [smem:[#allocation8 + $0x1a]] }
  0xab   : > { %v510_v23 = vmax.f32 %v508_v32, %v509_v62  ;;  %v440_v59 = vadd.f32 %v439_v57, %v438_v31  ;;  %v534_v31 = vld [vmem:[%s5058_s2] sm:$0x1]  ;;  %v516_v57 = vmul.f32 2.0, %v515_v47  ;;  %5123 = sst [smem:[#allocation85_spill]] %s3504_s19  ;;  %s3518_s19 = sld [smem:[#allocation8 + $0x21]] }
  0xac   : > { %5109 = sst [smem:[#allocation71_spill]] %s3469_s3  ;;  %s3558_s11 = sld [smem:[#allocation8 + $0x29]] }
  0xad   : > { %v511_v40 = vrot.slane %v510_v23, 2  ;;  %v441_v46 = vrot.slane %v440_v59, 1  ;;  %5128 = sst [smem:[#allocation90_spill]] %s3536_s13  ;;  %s3564_s5 = sld [smem:[#allocation8 + $0x30]] }
  0xae   : > { %5127 = sst [smem:[#allocation89_spill]] %s3526_s7  ;;  %s3566_s4 = sld [smem:[#allocation8 + $0x32]] }
  0xaf   : > { %v512_v12 = vmax.f32 %v510_v23, %v511_v40  ;;  %v442_v60 = vadd.f32 %v441_v46, %v440_v59  ;;  %v553_v59 = vld [vmem:[%s5058_s2 + $0x1] sm:$0x1]  ;;  %s3467_s2 = sld [smem:[#allocation8 + $0xb]]  ;;  %5126 = sst [smem:[#allocation88_spill]] %s3524_s15 }
  0xb0   : > { %5124 = sst [smem:[#allocation86_spill]] %s3516_s28  ;;  %s3568_s6 = sld [smem:[#allocation8 + $0x39]] }
  0xb1   : > { %v513_v45 = vrot.slane %v512_v12, 1  ;;  %v443_v21 = vmul.f32 0.0625, %v442_v60  ;;  %5125 = sst [smem:[#allocation87_spill]] %s3518_s19  ;;  %s3582_s24 = sld [smem:[#allocation8 + $0x40]] }
  0xb2   : > { %5129 = sst [smem:[#allocation91_spill]] %s3538_s23  ;;  %s3584_s8 = sld [smem:[#allocation8 + $0x47]] }
  0xb3   : > { %v514_v7 = vmax.f32 %v512_v12, %v513_v45  ;;  %v538_v48 = vmul.f32 %v537_v6, %v443_v21  ;;  %v518_v15 = vmul.f32 %v517_v41, %v443_v21  ;;  %v563_v21 = vlaneseq  ;;  %5130 = sst [smem:[#allocation92_spill]] %s3548_s0  ;;  %s3592_s20 = sld [smem:[#allocation8 + $0x4e]] }
  0xb4   : > { %5132 = sst [smem:[#allocation93_spill]] %s3550_s22  ;;  %s3594_s17 = sld [smem:[#allocation8 + $0x55]] }
  0xb5   : > { %v545_v14 = vmul.f32 %v537_v6, %v514_v7  ;;  %v526_v25 = vmul.f32 %v517_v41, %v514_v7  ;;  %v539_v27 = vsel %vm519_vm1, %v538_v48, 0.0  ;;  %v520_v8 = vsel %vm519_vm1, %v518_v15, 0.0  ;;  %5108 = sst [smem:[#allocation70_spill]] %s3467_s2  ;;  %s3614_s7 = sld [smem:[#allocation8 + $0x5c]] }
  0xb6   : > { %540 = vadd.xlane.f32.xlu1 %v539_v27  ;;  %521 = vadd.xlane.f32.xlu0 %v520_v8  ;;  %v3140_v7 = vshrl.u32 %v563_v21, 7  ;;  %5136 = sst [smem:[#allocation94_spill]] %s3556_s1  ;;  %s3616_s15 = sld [smem:[#allocation8]] }
  0xb7   : > { %v546_v51 = vsel %vm519_vm1, %v545_v14, 0.0  ;;  %v527_v55 = vsel %vm519_vm1, %v526_v25, 0.0  ;;  %5137 = sst [smem:[#allocation95_spill]] %s3558_s11  ;;  %s3626_s19 = sld [smem:[#allocation8 + $0x7]] }
  0xb8   : > { %5059 = vst [vmem:[#allocation31_spill] sm:$0xff] %v3140_v7  ;;  %v3143_v48 = vsub.s32 0, %v3140_v7  ;;  %5138 = sst [smem:[#allocation96_spill]] %s3564_s5  ;;  %s3628_s28 = sld [smem:[#allocation8 + $0xe]] }
  0xb9   : > { %5139 = sst [smem:[#allocation97_spill]] %s3566_s4  ;;  %s3631_s14 = sld [smem:[#allocation8 + $0x34]] }
  0xba   : > { %547 = vadd.xlane.f32.xlu1 %v546_v51  ;;  %528 = vadd.xlane.f32.xlu0 %v527_v55  ;;  %5140 = sst [smem:[#allocation98_spill]] %s3568_s6  ;;  %s3642_s0 = sld [smem:[#allocation8 + $0x3b]] }
  0xbb   : > { %5141 = sst [smem:[#allocation99_spill]] %s3582_s24  ;;  %s3649_s11 = sld [smem:[#allocation8 + $0x49]] }
  0xbc   : > { %5142 = sst [smem:[#allocation100_spill]] %s3584_s8  ;;  %s3644_s22 = sld [smem:[#allocation8 + $0x42]] }
  0xbd   : > { %5143 = sst [smem:[#allocation101_spill]] %s3592_s20  ;;  %s3651_s1 = sld [smem:[#allocation8 + $0x50]] }
  0xbe   : > { %5144 = sst [smem:[#allocation102_spill]] %s3594_s17  ;;  %s3658_s23 = sld [smem:[#allocation8 + $0x57]] }
  0xbf   : > { %5145 = sst [smem:[#allocation103_spill]] %s3614_s7  ;;  %s3666_s5 = sld [smem:[#allocation8 + $0x35]] }
  0xc0   : > { %5146 = sst [smem:[#allocation104_spill]] %s3616_s15  ;;  %s3660_s13 = sld [smem:[#allocation8 + $0x5e]] }
  0xc1   : > { %5147 = sst [smem:[#allocation105_spill]] %s3626_s19  ;;  %s3668_s18 = sld [smem:[#allocation8 + $0x3c]] }
  0xc2   : > { %5148 = sst [smem:[#allocation106_spill]] %s3628_s28  ;;  %s3678_s20 = sld [smem:[#allocation8 + $0x43]] }
  0xc3   : > { %5149 = sst [smem:[#allocation107_spill]] %s3631_s14  ;;  %s3687_s8 = sld [smem:[#allocation8 + $0x51]] }
  0xc4   : > { %5150 = sst [smem:[#allocation108_spill]] %s3642_s0  ;;  %s3680_s17 = sld [smem:[#allocation8 + $0x4a]] }
  0xc5   : > { %5151 = sst [smem:[#allocation109_spill]] %s3644_s22  ;;  %s3689_s24 = sld [smem:[#allocation8 + $0x58]] }
  0xc6   : > { %5152 = sst [smem:[#allocation110_spill]] %s3649_s11  ;;  %s3694_s6 = sld [smem:[#allocation8 + $0x5f]] }
  0xc7   : > { %5153 = sst [smem:[#allocation111_spill]] %s3651_s1  ;;  %s3696_s4 = sld [smem:[#allocation8 + $0x33]] }
  0xc8   : > { %5154 = sst [smem:[#allocation112_spill]] %s3658_s23  ;;  %s3706_s7 = sld [smem:[#allocation8 + $0x3a]] }
  0xc9   : > { %5155 = sst [smem:[#allocation113_spill]] %s3660_s13  ;;  %s3708_s15 = sld [smem:[#allocation8 + $0x41]] }
  0xca   : > { %5156 = sst [smem:[#allocation114_spill]] %s3666_s5  ;;  %s3716_s28 = sld [smem:[#allocation8 + $0x48]] }
  0xcb   : > { %5157 = sst [smem:[#allocation115_spill]] %s3668_s18  ;;  %s3718_s19 = sld [smem:[#allocation8 + $0x4f]] }
  0xcc   : > { %5158 = sst [smem:[#allocation116_spill]] %s3678_s20  ;;  %s3726_s14 = sld [smem:[#allocation8 + $0x56]] }
  0xcd   : > { %5159 = sst [smem:[#allocation117_spill]] %s3680_s17  ;;  %s3728_s16 = sld [smem:[#allocation8 + $0x5d]] }
  0xce   : > { %5160 = sst [smem:[#allocation118_spill]] %s3687_s8  ;;  %s3734_s0 = sld [smem:[#allocation8 + $0x36]] }
  0xcf   : > { %5161 = sst [smem:[#allocation119_spill]] %s3689_s24  ;;  %s3736_s27 = sld [smem:[#allocation8 + $0x3d]] }
  0xd0   : > { %5162 = sst [smem:[#allocation120_spill]] %s3694_s6  ;;  %s3742_s22 = sld [smem:[#allocation8 + $0x44]] }
  0xd1   : > { %5163 = sst [smem:[#allocation121_spill]] %s3696_s4  ;;  %s3744_s10 = sld [smem:[#allocation8 + $0x4b]] }
  0xd2   : > { %5164 = sst [smem:[#allocation122_spill]] %s3706_s7  ;;  %s3750_s11 = sld [smem:[#allocation8 + $0x52]] }
  0xd3   : > { %5165 = sst [smem:[#allocation123_spill]] %s3708_s15  ;;  %s3752_s25 = sld [smem:[#allocation8 + $0x59]] }
  0xd4   : > { %5166 = sst [smem:[#allocation124_spill]] %s3716_s28  ;;  %s3758_s26 = sld [smem:[#allocation8 + $0x60]] }
  0xd5   : > { %5167 = sst [smem:[#allocation125_spill]] %s3718_s19  ;;  %s3760_s3 = sld [smem:[#allocation8 + $0x37]] }
  0xd6   : > { %5168 = sst [smem:[#allocation126_spill]] %s3726_s14  ;;  %s3767_s23 = sld [smem:[#allocation8 + $0x3e]] }
  0xd7   : > { %5169 = sst [smem:[#allocation127_spill]] %s3728_s16  ;;  %s3769_s13 = sld [smem:[#allocation8 + $0x45]] }
  0xd8   : > { %5170 = sst [smem:[#allocation128_spill]] %s3734_s0  ;;  %s3776_s1 = sld [smem:[#allocation8 + $0x4c]] }
  0xd9   : > { %5171 = sst [smem:[#allocation129_spill]] %s3736_s27  ;;  %s3778_s5 = sld [smem:[#allocation8 + $0x53]] }
  0xda   : > { %5172 = sst [smem:[#allocation130_spill]] %s3742_s22  ;;  %s3784_s2 = sld [smem:[#allocation8 + $0x5a]] }
  0xdb   : > { %5173 = sst [smem:[#allocation131_spill]] %s3744_s10  ;;  %s3786_s21 = sld [smem:[#allocation8 + $0x61]] }
  0xdc   : > { %5174 = sst [smem:[#allocation132_spill]] %s3750_s11  ;;  %s3796_s8 = sld [smem:[#allocation8 + $0x15]] }
  0xdd   : > { %5175 = sst [smem:[#allocation133_spill]] %s3752_s25  ;;  %s3805_s6 = sld [smem:[#allocation8 + $0x23]] }
  0xde   : > { %5176 = sst [smem:[#allocation134_spill]] %s3758_s26  ;;  %s3798_s17 = sld [smem:[#allocation8 + $0x1c]] }
  0xdf   : > { %5177 = sst [smem:[#allocation135_spill]] %s3760_s3  ;;  %s3807_s24 = sld [smem:[#allocation8 + $0x2a]] }
  0xe0   : > { %5178 = sst [smem:[#allocation136_spill]] %s3767_s23  ;;  %s3813_s15 = sld [smem:[#allocation8 + $0x31]] }
  0xe1   : > { %5179 = sst [smem:[#allocation137_spill]] %s3769_s13  ;;  %s5191_s26 = sld [smem:[#allocation59_spill]] }
  0xe2   : > { %5180 = sst [smem:[#allocation138_spill]] %s3776_s1  ;;  %s3825_s25 = sld [smem:[#allocation8 + $0x38]] }
  0xe3   : > { %5181 = sst [smem:[#allocation139_spill]] %s3778_s5  ;;  %s5193_s13 = sld [smem:[#allocation60_spill]] }
  0xe4   : > { %5182 = sst [smem:[#allocation140_spill]] %s3784_s2  ;;  %s5195_s1 = sld [smem:[#allocation61_spill]] }
  0xe5   : > { %5183 = sst [smem:[#allocation141_spill]] %s3786_s21  ;;  %s5200_s21 = sld [smem:[#allocation63_spill]] }
  0xe6   : > { %5184 = sst [smem:[#allocation142_spill]] %s3796_s8  ;;  %s5201_s2 = sld [smem:[#allocation69_spill]] }
  0xe7   : > { %5185 = sst [smem:[#allocation143_spill]] %s3798_s17  ;;  %s5202_s5 = sld [smem:[#allocation70_spill]] }
  0xe8   : > { %5186 = sst [smem:[#allocation144_spill]] %s3805_s6  ;;  %s5203_s23 = sld [smem:[#allocation62_spill]] }
  0xe9   : > { %5187 = sst [smem:[#allocation145_spill]] %s3807_s24  ;;  %s5204_s3 = sld [smem:[#allocation64_spill]] }
  0xea   : > { %5188 = sst [smem:[#allocation146_spill]] %s3813_s15  ;;  %s5207_s15 = sld [smem:[#allocation65_spill]] }
  0xeb   : > { %5189 = sst [smem:[#allocation147_spill]] %s3825_s25  ;;  %s5216_s11 = sld [smem:[#allocation68_spill]] }
  0xec   : > { %s5213_s25 = sld [smem:[#allocation67_spill]]  ;;  %s5225_s16 = sld [smem:[#allocation77_spill]] }
  0xed   : > { %s5229_s10 = sld [smem:[#allocation73_spill]]  ;;  %s5231_s22 = sld [smem:[#allocation78_spill]] }
  0xee   : > { %s5237_s14 = sld [smem:[#allocation84_spill]]  ;;  %s5240_s19 = sld [smem:[#allocation74_spill]] }
  0xef   : > { %s5242_s27 = sld [smem:[#allocation75_spill]]  ;;  %s5243_s0 = sld [smem:[#allocation80_spill]] }
  0xf0   : > { %s5244_s28 = sld [smem:[#allocation85_spill]]  ;;  %s5252_s7 = sld [smem:[#allocation82_spill]] }
  0xf1   : > { %s5253_s4 = sld [smem:[#allocation86_spill]]  ;;  %s5254_s20 = sld [smem:[#allocation87_spill]] }
  0xf2   : > { %s5256_s18 = sld [smem:[#allocation88_spill]]  ;;  %s5261_s24 = sld [smem:[#allocation90_spill]] }
  0xf3   : > { %s5267_s6 = sld [smem:[#allocation92_spill]] }
 0x143   : > { %v541_v26 = vpop.xlane.xlu1 %540  ;;  %v522_v34 = vpop.xlane.xlu0 %521 }
 0x144   : > { %v544_v53 = vadd.f32 %v543_v39, %v541_v26  ;;  %v525_v24 = vadd.f32 %v524_v19, %v522_v34 }
 0x146   : > { %v550_v52 = vmax.f32 %v544_v53, 0.0  ;;  %v531_v54 = vmax.f32 %v525_v24, 0.0 }
 0x147   : > { %v548_v33 = vpop.xlane.xlu1 %547  ;;  %v529_v38 = vpop.xlane.xlu0 %528 }
 0x148   : > { %v549_v61 = vadd.f32 %v548_v33, %v543_v39  ;;  %v530_v13 = vadd.f32 %v529_v38, %v524_v19  ;;  %v5069_v33 = vld [vmem:[#allocation26_spill] sm:$0xff] }
 0x14a   : > { %v551_v4 = vmax.f32 %v549_v61, 0.0  ;;  %v532_v32 = vmax.f32 %v530_v13, 0.0 }
 0x14c   : > { %v552_v62 = vadd.f32 %v551_v4, %v550_v52  ;;  %v533_v23 = vadd.f32 %v532_v32, %v531_v54 }
 0x14e   : > { %v535_v40 = vmul.f32 %v534_v31, %v533_v23  ;;  %v554_v46 = vmul.f32 %v553_v59, %v552_v62 }
 0x150   : > { %v536_v12 = vadd.f32 %v535_v40, %v516_v57 }
 0x152   : > { %v555_v60 = vadd.f32 %v554_v46, %v536_v12  ;;  %v5084_v12 = vld [vmem:[#allocation29_spill] sm:$0xff] }
 0x154   : > { %v2297_v6 = vmul.f32 -1.442695, %v555_v60 }
 0x156   : > { %2493 = vpow2.f32 %v2297_v6 }
 0x160   : > { %v2494_v41 = vpop.eup %2493 }
 0x161   : > { %v559_v45 = vadd.f32 1.0, %v2494_v41  ;;  %v5087_v41 = vld [vmem:[#allocation27_spill] sm:$0xff] }
 0x163   : > { %2495 = vrcp.f32 %v559_v45 }
 0x16d   : > { %v2496_v15 = vpop.eup %2495 }
 0x16e   : > { %v3146_v14 = vrot.slane %v2496_v15, %v3143_v48 }
 0x170   : > { %v3150_v25 = vmul.f32 %v3146_v14, %v2885_v1  ;;  %v3154_v27 = vmul.f32 %v3146_v14, %v2882_v0  ;;  %v3162_v55 = vmul.f32 %v3146_v14, %v2891_v3  ;;  %v3166_v39 = vmul.f32 %v3146_v14, %v2888_v2 }
 0x171   : > { %v3174_v26 = vmul.f32 %v3146_v14, %v2953_v30  ;;  %v3178_v3 = vmul.f32 %v3146_v14, %v2950_v29  ;;  %v3186_v34 = vmul.f32 %v3146_v14, %v2965_v36  ;;  %v3190_v30 = vmul.f32 %v3146_v14, %v2962_v35 }
 0x172   : > { %5060 = vst [vmem:[#allocation32_spill] sm:$0xff] %v3150_v25  ;;  %5061 = vst [vmem:[#allocation33_spill] sm:$0xff] %v3154_v27  ;;  %v603_v8 = vsel %vm368_vm0, %v3150_v25, -inf  ;;  %v600_v51 = vsel %vm368_vm0, %v3154_v27, -inf  ;;  %v609_v0 = vsel %vm368_vm0, %v3162_v55, -inf  ;;  %v606_v1 = vsel %vm368_vm0, %v3166_v39, -inf }
 0x173   : > { %5062 = vst [vmem:[#allocation34_spill] sm:$0xff] %v3162_v55  ;;  %5063 = vst [vmem:[#allocation35_spill] sm:$0xff] %v3166_v39  ;;  %604 = vmax.xlane.f32.xlu1 %v603_v8  ;;  %601 = vmax.xlane.f32.xlu0 %v600_v51  ;;  %v651_v2 = vsel %vm368_vm0, %v3174_v26, -inf  ;;  %v648_v19 = vsel %vm368_vm0, %v3178_v3, -inf  ;;  %v657_v29 = vsel %vm368_vm0, %v3186_v34, -inf  ;;  %v654_v53 = vsel %vm368_vm0, %v3190_v30, -inf }
 0x174   : > { %5064 = vst [vmem:[#allocation36_spill] sm:$0xff] %v3174_v26  ;;  %5065 = vst [vmem:[#allocation37_spill] sm:$0xff] %v3178_v3  ;;  %v3198_v24 = vmul.f32 %v3146_v14, %v2897_v5  ;;  %v3202_v36 = vmul.f32 %v3146_v14, %v5069_v33  ;;  %v3210_v61 = vmul.f32 %v3146_v14, %v2977_v42  ;;  %v5090_v51 = vld [vmem:[#allocation30_spill] sm:$0xff] }
 0x175   : > { %5066 = vst [vmem:[#allocation38_spill] sm:$0xff] %v3186_v34  ;;  %5067 = vst [vmem:[#allocation39_spill] sm:$0xff] %v3190_v30  ;;  %v3214_v5 = vmul.f32 %v3146_v14, %v2968_v37  ;;  %v3222_v52 = vmul.f32 %v3146_v14, %v2909_v10  ;;  %v3226_v42 = vmul.f32 %v3146_v14, %v2906_v9 }
 0x176   : > { %5068 = vst [vmem:[#allocation40_spill] sm:$0xff] %v3198_v24  ;;  %5070 = vst [vmem:[#allocation26_spill] sm:$0xff] %v3202_v36  ;;  %v615_v35 = vsel %vm368_vm0, %v3198_v24, -inf  ;;  %v612_v38 = vsel %vm368_vm0, %v3202_v36, -inf  ;;  %v663_v13 = vsel %vm368_vm0, %v3210_v61, -inf  ;;  %v3234_v4 = vmul.f32 %v3146_v14, %v2983_v44 }
 0x177   : > { %610 = vmax.xlane.f32.xlu1 %v609_v0  ;;  %607 = vmax.xlane.f32.xlu0 %v606_v1  ;;  %5071 = vst [vmem:[#allocation41_spill] sm:$0xff] %v3210_v61  ;;  %5072 = vst [vmem:[#allocation42_spill] sm:$0xff] %v3214_v5  ;;  %v660_v47 = vsel %vm368_vm0, %v3214_v5, -inf  ;;  %v621_v37 = vsel %vm368_vm0, %v3222_v52, -inf  ;;  %v618_v54 = vsel %vm368_vm0, %v3226_v42, -inf  ;;  %v3238_v10 = vmul.f32 %v3146_v14, %v2980_v43 }
 0x178   : > { %5073 = vst [vmem:[#allocation43_spill] sm:$0xff] %v3222_v52  ;;  %5074 = vst [vmem:[#allocation44_spill] sm:$0xff] %v3226_v42  ;;  %v669_v9 = vsel %vm368_vm0, %v3234_v4, -inf  ;;  %v3246_v31 = vmul.f32 %v3146_v14, %v2921_v16  ;;  %v3250_v44 = vmul.f32 %v3146_v14, %v2912_v11  ;;  %v3258_v57 = vmul.f32 %v3146_v14, %v2995_v50 }
 0x179   : > { %5075 = vst [vmem:[#allocation45_spill] sm:$0xff] %v3234_v4  ;;  %5076 = vst [vmem:[#allocation46_spill] sm:$0xff] %v3238_v10  ;;  %v666_v32 = vsel %vm368_vm0, %v3238_v10, -inf  ;;  %v3262_v16 = vmul.f32 %v3146_v14, %v2992_v49  ;;  %v3270_v59 = vmul.f32 %v3146_v14, %v2927_v18  ;;  %v3274_v50 = vmul.f32 %v3146_v14, %v2924_v17 }
 0x17a   : > { %5077 = vst [vmem:[#allocation47_spill] sm:$0xff] %v3246_v31  ;;  %5078 = vst [vmem:[#allocation48_spill] sm:$0xff] %v3250_v44  ;;  %v627_v43 = vsel %vm368_vm0, %v3246_v31, -inf  ;;  %v624_v62 = vsel %vm368_vm0, %v3250_v44, -inf  ;;  %v675_v11 = vsel %vm368_vm0, %v3258_v57, -inf  ;;  %v3282_v46 = vmul.f32 %v3146_v14, %v3007_v56 }
 0x17b   : > { %652 = vmax.xlane.f32.xlu1 %v651_v2  ;;  %649 = vmax.xlane.f32.xlu0 %v648_v19  ;;  %5079 = vst [vmem:[#allocation49_spill] sm:$0xff] %v3258_v57  ;;  %5080 = vst [vmem:[#allocation50_spill] sm:$0xff] %v3262_v16  ;;  %v672_v23 = vsel %vm368_vm0, %v3262_v16, -inf  ;;  %v633_v49 = vsel %vm368_vm0, %v3270_v59, -inf  ;;  %v630_v40 = vsel %vm368_vm0, %v3274_v50, -inf  ;;  %v3286_v18 = vmul.f32 %v3146_v14, %v5084_v12  ;;  %v5093_v19 = vld [vmem:[#allocation28_spill] sm:$0xff] }
 0x17c   : > { %5081 = vst [vmem:[#allocation51_spill] sm:$0xff] %v3270_v59  ;;  %5082 = vst [vmem:[#allocation52_spill] sm:$0xff] %v3274_v50  ;;  %v681_v17 = vsel %vm368_vm0, %v3282_v46, -inf  ;;  %v3294_v6 = vmul.f32 %v3146_v14, %v2935_v22  ;;  %v3298_v56 = vmul.f32 %v3146_v14, %v5087_v41  ;;  %v3306_v8 = vmul.f32 %v3146_v14, %v3013_v58 }
 0x17d   : > { %5083 = vst [vmem:[#allocation53_spill] sm:$0xff] %v3282_v46  ;;  %5085 = vst [vmem:[#allocation29_spill] sm:$0xff] %v3286_v18  ;;  %v678_v60 = vsel %vm368_vm0, %v3286_v18, -inf  ;;  %v3310_v22 = vmul.f32 %v3146_v14, %v5090_v51  ;;  %v3318_v2 = vmul.f32 %v3146_v14, %v2947_v28  ;;  %v3322_v58 = vmul.f32 %v3146_v14, %v5093_v19 }
 0x17e   : > { %5086 = vst [vmem:[#allocation54_spill] sm:$0xff] %v3294_v6  ;;  %5088 = vst [vmem:[#allocation27_spill] sm:$0xff] %v3298_v56  ;;  %v639_v45 = vsel %vm368_vm0, %v3294_v6, -inf  ;;  %v636_v15 = vsel %vm368_vm0, %v3298_v56, -inf  ;;  %v687_v0 = vsel %vm368_vm0, %v3306_v8, -inf  ;;  %v3330_v33 = vmul.f32 %v3146_v14, %v3047_v20 }
 0x17f   : > { %658 = vmax.xlane.f32.xlu1 %v657_v29  ;;  %655 = vmax.xlane.f32.xlu0 %v654_v53  ;;  %5089 = vst [vmem:[#allocation55_spill] sm:$0xff] %v3306_v8  ;;  %5091 = vst [vmem:[#allocation30_spill] sm:$0xff] %v3310_v22  ;;  %v684_v1 = vsel %vm368_vm0, %v3310_v22, -inf  ;;  %v645_v29 = vsel %vm368_vm0, %v3318_v2, -inf  ;;  %v642_v53 = vsel %vm368_vm0, %v3322_v58, -inf  ;;  %v3334_v28 = vmul.f32 %v3146_v14, %v3022_v63 }
 0x180   : > { %5092 = vst [vmem:[#allocation56_spill] sm:$0xff] %v3318_v2  ;;  %5094 = vst [vmem:[#allocation28_spill] sm:$0xff] %v3322_v58  ;;  %v696_v20 = vsel %vm368_vm0, %v3154_v27, 0.0  ;;  %v705_v63 = vsel %vm368_vm0, %v3162_v55, 0.0  ;;  %v702_v14 = vsel %vm368_vm0, %v3166_v39, 0.0  ;;  %v765_v12 = vsel %vm368_vm0, %v3234_v4, 0.0 }
 0x181   : > { %5095 = vst [vmem:[#allocation57_spill] sm:$0xff] %v3330_v33  ;;  %5096 = vst [vmem:[#allocation58_spill] sm:$0xff] %v3334_v28  ;;  %v720_v41 = vsel %vm368_vm0, %v3250_v44, 0.0  ;;  %v729_v51 = vsel %vm368_vm0, %v3270_v59, 0.0  ;;  %v774_v19 = vsel %vm368_vm0, %v3286_v18, 0.0 }
 0x183   : > { %616 = vmax.xlane.f32.xlu1 %v615_v35  ;;  %613 = vmax.xlane.f32.xlu0 %v612_v38  ;;  %v693_v35 = vsel %vm368_vm0, %v3330_v33, -inf  ;;  %v690_v38 = vsel %vm368_vm0, %v3334_v28, -inf }
 0x187   : > { %664 = vmax.xlane.f32.xlu1 %v663_v13  ;;  %661 = vmax.xlane.f32.xlu0 %v660_v47  ;;  %v699_v13 = vsel %vm368_vm0, %v3150_v25, 0.0  ;;  %v747_v47 = vsel %vm368_vm0, %v3174_v26, 0.0 }
 0x18b   : > { %622 = vmax.xlane.f32.xlu1 %v621_v37  ;;  %619 = vmax.xlane.f32.xlu0 %v618_v54  ;;  %v744_v37 = vsel %vm368_vm0, %v3178_v3, 0.0  ;;  %v2662_v54 = vmov 0.0  }
 0x18c   : > { %825 = vst [vmem:[#allocation2] sm:$0x7] %v2662_v54  ;;  %828 = vst.msk [vmem:[#allocation2 + $0x3] sm:$0xff] %vm827_vm2, %v2662_v54 }
 0x18d   : > { %826 = vst [vmem:[#allocation2 + $0x13] sm:$0x7] %v2662_v54  ;;  %829 = vst.msk [vmem:[#allocation2 + $0xb] sm:$0xff] %vm827_vm2, %v2662_v54 }
 0x18e   : > { %834 = vst [vmem:[#allocation2 + $0x18] sm:$0x7] %v2662_v54  ;;  %835 = vst [vmem:[#allocation2 + $0x2b] sm:$0x7] %v2662_v54 }
 0x18f   : > { %670 = vmax.xlane.f32.xlu1 %v669_v9  ;;  %667 = vmax.xlane.f32.xlu0 %v666_v32  ;;  %836 = vst.msk [vmem:[#allocation2 + $0x1b] sm:$0xff] %vm827_vm2, %v2662_v54  ;;  %837 = vst.msk [vmem:[#allocation2 + $0x23] sm:$0xff] %vm827_vm2, %v2662_v54  ;;  %v753_v9 = vsel %vm368_vm0, %v3186_v34, 0.0  ;;  %v750_v32 = vsel %vm368_vm0, %v3190_v30, 0.0 }
 0x190   : > { %831 = vst.msk [vmem:[#allocation2 + $0x3] sm:$0xff] %vm830_vm3, %v2662_v54  ;;  %832 = vst.msk [vmem:[#allocation2 + $0xb] sm:$0xff] %vm830_vm3, %v2662_v54 }
 0x191   : > { %838 = vst.msk [vmem:[#allocation2 + $0x1b] sm:$0xff] %vm830_vm3, %v2662_v54  ;;  %839 = vst.msk [vmem:[#allocation2 + $0x23] sm:$0xff] %vm830_vm3, %v2662_v54 }
 0x193   : > { %628 = vmax.xlane.f32.xlu1 %v627_v43  ;;  %625 = vmax.xlane.f32.xlu0 %v624_v62  ;;  %v711_v43 = vsel %vm368_vm0, %v3198_v24, 0.0  ;;  %v708_v62 = vsel %vm368_vm0, %v3202_v36, 0.0 }
 0x197   : > { %676 = vmax.xlane.f32.xlu1 %v675_v11  ;;  %673 = vmax.xlane.f32.xlu0 %v672_v23  ;;  %v759_v11 = vsel %vm368_vm0, %v3210_v61, 0.0  ;;  %v756_v23 = vsel %vm368_vm0, %v3214_v5, 0.0 }
 0x19b   : > { %634 = vmax.xlane.f32.xlu1 %v633_v49  ;;  %631 = vmax.xlane.f32.xlu0 %v630_v40  ;;  %v717_v49 = vsel %vm368_vm0, %v3222_v52, 0.0  ;;  %v714_v40 = vsel %vm368_vm0, %v3226_v42, 0.0 }
 0x19f   : > { %682 = vmax.xlane.f32.xlu1 %v681_v17  ;;  %679 = vmax.xlane.f32.xlu0 %v678_v60  ;;  %v762_v17 = vsel %vm368_vm0, %v3238_v10, 0.0  ;;  %v723_v60 = vsel %vm368_vm0, %v3246_v31, 0.0  ;;  %v5217_v10 = vstv %s5191_s26 }
 0x1a3   : > { %640 = vmax.xlane.f32.xlu1 %v639_v45  ;;  %637 = vmax.xlane.f32.xlu0 %v636_v15  ;;  %v771_v45 = vsel %vm368_vm0, %v3258_v57, 0.0  ;;  %v768_v15 = vsel %vm368_vm0, %v3262_v16, 0.0 }
 0x1a7   : > { %688 = vmax.xlane.f32.xlu1 %v687_v0  ;;  %685 = vmax.xlane.f32.xlu0 %v684_v1  ;;  %v726_v0 = vsel %vm368_vm0, %v3274_v50, 0.0  ;;  %v777_v1 = vsel %vm368_vm0, %v3282_v46, 0.0  ;;  %v5297_v50 = vstv %s5244_s28 }
 0x1ab   : > { %646 = vmax.xlane.f32.xlu1 %v645_v29  ;;  %643 = vmax.xlane.f32.xlu0 %v642_v53  ;;  %v735_v29 = vsel %vm368_vm0, %v3294_v6, 0.0  ;;  %v732_v53 = vsel %vm368_vm0, %v3298_v56, 0.0 }
 0x1af   : > { %694 = vmax.xlane.f32.xlu1 %v693_v35  ;;  %691 = vmax.xlane.f32.xlu0 %v690_v38  ;;  %v783_v35 = vsel %vm368_vm0, %v3306_v8, 0.0  ;;  %v780_v38 = vsel %vm368_vm0, %v3310_v22, 0.0  ;;  %v5206_v8 = vstv %s5200_s21 }
 0x1b3   : > { %700 = vadd.xlane.f32.xlu1 %v699_v13  ;;  %697 = vadd.xlane.f32.xlu0 %v696_v20  ;;  %v741_v13 = vsel %vm368_vm0, %v3318_v2, 0.0  ;;  %v738_v20 = vsel %vm368_vm0, %v3322_v58, 0.0  ;;  %v5239_v58 = vstv %s5207_s15 }
 0x1b7   : > { %706 = vadd.xlane.f32.xlu1 %v705_v63  ;;  %703 = vadd.xlane.f32.xlu0 %v702_v14  ;;  %v789_v63 = vsel %vm368_vm0, %v3330_v33, 0.0  ;;  %v786_v14 = vsel %vm368_vm0, %v3334_v28, 0.0 }
 0x1bb   : > { %748 = vadd.xlane.f32.xlu1 %v747_v47  ;;  %745 = vadd.xlane.f32.xlu0 %v744_v37 }
 0x1bf   : > { %754 = vadd.xlane.f32.xlu1 %v753_v9  ;;  %751 = vadd.xlane.f32.xlu0 %v750_v32 }
 0x1c3   : > { %712 = vadd.xlane.f32.xlu1 %v711_v43  ;;  %709 = vadd.xlane.f32.xlu0 %v708_v62 }
 0x1c7   : > { %760 = vadd.xlane.f32.xlu1 %v759_v11  ;;  %757 = vadd.xlane.f32.xlu0 %v756_v23 }
 0x1cb   : > { %718 = vadd.xlane.f32.xlu1 %v717_v49  ;;  %715 = vadd.xlane.f32.xlu0 %v714_v40 }
 0x1cf   : > { %766 = vadd.xlane.f32.xlu1 %v765_v12  ;;  %763 = vadd.xlane.f32.xlu0 %v762_v17  ;;  %v873_v17 = vand.u32 127, %v563_v21 }
 0x1d1   : > { %v879_v21 = vadd.s32 4294967285, %v873_v17 }
 0x1d3   : > { %724 = vadd.xlane.f32.xlu1 %v723_v60  ;;  %721 = vadd.xlane.f32.xlu0 %v720_v41 }
 0x1d7   : > { %772 = vadd.xlane.f32.xlu1 %v771_v45  ;;  %769 = vadd.xlane.f32.xlu0 %v768_v15  ;;  %v874_v45 = vadd.s32 4294967293, %v873_v17 }
 0x1db   : > { %730 = vadd.xlane.f32.xlu1 %v729_v51  ;;  %727 = vadd.xlane.f32.xlu0 %v726_v0  ;;  %v3500_v0 = vsub.s32 %v879_v21, %v3140_v7 }
 0x1df   : > { %778 = vadd.xlane.f32.xlu1 %v777_v1  ;;  %775 = vadd.xlane.f32.xlu0 %v774_v19  ;;  %v3507_v1 = vsub.s32 %v874_v45, %v3140_v7 }
 0x1e3   : > { %736 = vadd.xlane.f32.xlu1 %v735_v29  ;;  %733 = vadd.xlane.f32.xlu0 %v732_v53 }
 0x1e7   : > { %784 = vadd.xlane.f32.xlu1 %v783_v35  ;;  %781 = vadd.xlane.f32.xlu0 %v780_v38 }
 0x1eb   : > { %742 = vadd.xlane.f32.xlu1 %v741_v13  ;;  %739 = vadd.xlane.f32.xlu0 %v738_v20 }
 0x1ef   : > { %790 = vadd.xlane.f32.xlu1 %v789_v63  ;;  %787 = vadd.xlane.f32.xlu0 %v786_v14 }
 0x200   : > { %v3408_v47 = vpop.xlane.xlu1 %604  ;;  %v3410_v37 = vpop.xlane.xlu0 %601 }
 0x201   : > { %v883_v63 = vrot.slane %v3408_v47, %v3500_v0  ;;  %v878_v28 = vrot.slane %v3410_v37, %v3507_v1 }
 0x204   : > { %v3412_v54 = vpop.xlane.xlu1 %610  ;;  %v3414_v9 = vpop.xlane.xlu0 %607 }
 0x205   : > { %v893_v35 = vrot.slane %v3412_v54, %v3500_v0  ;;  %v889_v38 = vrot.slane %v3414_v9, %v3507_v1 }
 0x208   : > { %v3416_v32 = vpop.xlane.xlu1 %652  ;;  %v3418_v43 = vpop.xlane.xlu0 %649 }
 0x209   : > { %v956_v54 = vrot.slane %v3416_v32, %v3500_v0  ;;  %v952_v9 = vrot.slane %v3418_v43, %v3507_v1 }
 0x20c   : > { %v3420_v62 = vpop.xlane.xlu1 %658  ;;  %v3422_v11 = vpop.xlane.xlu0 %655 }
 0x20d   : > { %v965_v53 = vrot.slane %v3420_v62, %v3500_v0  ;;  %v961_v20 = vrot.slane %v3422_v11, %v3507_v1 }
 0x210   : > { %v3424_v23 = vpop.xlane.xlu1 %616  ;;  %v3426_v49 = vpop.xlane.xlu0 %613 }
 0x211   : > { %v902_v62 = vrot.slane %v3424_v23, %v3500_v0  ;;  %v898_v11 = vrot.slane %v3426_v49, %v3507_v1  ;;  %v894_v23 = vsel %vm884_vm4, %v893_v35, %v889_v38  ;;  %v885_v35 = vsel %vm884_vm4, %v883_v63, %v878_v28 }
 0x212   : > { %v957_v28 = vsel %vm884_vm4, %v956_v54, %v952_v9 }
 0x213   : > { %v903_v38 = vsel %vm884_vm4, %v902_v62, %v898_v11 }
 0x214   : > { %v3442_v40 = vpop.xlane.xlu1 %664  ;;  %v3444_v12 = vpop.xlane.xlu0 %661 }
 0x215   : > { %v974_v47 = vrot.slane %v3442_v40, %v3500_v0  ;;  %v970_v37 = vrot.slane %v3444_v12, %v3507_v1  ;;  %v966_v40 = vsel %vm884_vm4, %v965_v53, %v961_v20  ;;  %v1022_v53 = vsel %vm1021_vm5, %v894_v23, %v885_v35 }
 0x216   : > { %v1024_v54 = vsel %vm1023_vm6, %v903_v38, %v1022_v53 }
 0x217   : > { %v975_v20 = vsel %vm884_vm4, %v974_v47, %v970_v37 }
 0x218   : > { %v3463_v60 = vpop.xlane.xlu1 %622  ;;  %v3465_v41 = vpop.xlane.xlu0 %619 }
 0x219   : > { %v911_v43 = vrot.slane %v3463_v60, %v3500_v0  ;;  %v907_v33 = vrot.slane %v3465_v41, %v3507_v1  ;;  %v1035_v41 = vsel %vm1021_vm5, %v966_v40, %v957_v28 }
 0x21a   : > { %v3671_v40 = vsel %vm1023_vm6, %v975_v20, %v1035_v41 }
 0x21b   : > { %v912_v28 = vsel %vm884_vm4, %v911_v43, %v907_v33 }
 0x21c   : > { %v3483_v15 = vpop.xlane.xlu1 %670  ;;  %v3485_v51 = vpop.xlane.xlu0 %667  ;;  %v1026_v33 = vsel %vm1025_vm7, %v912_v28, %v1024_v54 }
 0x21d   : > { %v983_v47 = vrot.slane %v3483_v15, %v3500_v0 }
 0x220   : > { %v3509_v19 = vpop.xlane.xlu1 %628  ;;  %v3511_v29 = vpop.xlane.xlu0 %625 }
 0x221   : > { %v920_v35 = vrot.slane %v3509_v19, %v3500_v0  ;;  %v916_v38 = vrot.slane %v3511_v29, %v3507_v1 }
 0x224   : > { %v3540_v17 = vpop.xlane.xlu1 %676  ;;  %v3542_v45 = vpop.xlane.xlu0 %673 }
 0x225   : > { %v992_v23 = vrot.slane %v3540_v17, %v3500_v0  ;;  %v988_v54 = vrot.slane %v3542_v45, %v3507_v1 }
 0x228   : > { %v3578_v13 = vpop.xlane.xlu1 %634  ;;  %v3580_v21 = vpop.xlane.xlu0 %631 }
 0x229   : > { %v929_v53 = vrot.slane %v3578_v13, %v3500_v0  ;;  %v925_v20 = vrot.slane %v3580_v21, %v3507_v1 }
 0x22b   : > { %v930_v15 = vsel %vm884_vm4, %v929_v53, %v925_v20 }
 0x22c   : > { %v3619_v49 = vpop.xlane.xlu1 %682  ;;  %v3621_v32 = vpop.xlane.xlu0 %679 }
 0x230   : > { %v641_v63 = vpop.xlane.xlu1 %640  ;;  %v638_v62 = vpop.xlane.xlu0 %637 }
 0x231   : > { %v938_v29 = vrot.slane %v641_v63, %v3500_v0  ;;  %v934_v43 = vrot.slane %v638_v62, %v3507_v1  ;;  %v979_v63 = vrot.slane %v3485_v51, %v3507_v1  ;;  %v921_v62 = vsel %vm884_vm4, %v920_v35, %v916_v38 }
 0x232   : > { %v1001_v51 = vrot.slane %v3619_v49, %v3500_v0  ;;  %v997_v35 = vrot.slane %v3621_v32, %v3507_v1  ;;  %v1028_v32 = vsel %vm1027_vm8, %v921_v62, %v1026_v33 }
 0x233   : > { %v939_v17 = vsel %vm884_vm4, %v938_v29, %v934_v43  ;;  %v984_v49 = vsel %vm884_vm4, %v983_v47, %v979_v63 }
 0x234   : > { %v689_v41 = vpop.xlane.xlu1 %688  ;;  %v686_v37 = vpop.xlane.xlu0 %685  ;;  %v1002_v47 = vsel %vm884_vm4, %v1001_v51, %v997_v35 }
 0x235   : > { %v1010_v45 = vrot.slane %v689_v41, %v3500_v0  ;;  %v1006_v28 = vrot.slane %v686_v37, %v3507_v1  ;;  %v993_v37 = vsel %vm884_vm4, %v992_v23, %v988_v54  ;;  %v1030_v41 = vsel %vm1029_vm9, %v930_v15, %v1028_v32 }
 0x236   : > { %v1032_v33 = vsel %vm1031_vm10, %v939_v17, %v1030_v41  ;;  %v1037_v23 = vsel %vm1025_vm7, %v984_v49, %v3671_v40  ;;  %v5205_v17 = vstv %s3428_s30 }
 0x237   : > { %v1011_v54 = vsel %vm884_vm4, %v1010_v45, %v1006_v28 }
 0x238   : > { %v647_v53 = vpop.xlane.xlu1 %646  ;;  %v644_v20 = vpop.xlane.xlu0 %643 }
 0x239   : > { %v947_v29 = vrot.slane %v647_v53, %v3500_v0  ;;  %v943_v43 = vrot.slane %v644_v20, %v3507_v1  ;;  %v1038_v53 = vsel %vm1027_vm8, %v993_v37, %v1037_v23 }
 0x23a   : > { %v1039_v20 = vsel %vm1029_vm9, %v1002_v47, %v1038_v53 }
 0x23b   : > { %v948_v63 = vsel %vm884_vm4, %v947_v29, %v943_v43  ;;  %v1040_v43 = vsel %vm1031_vm10, %v1011_v54, %v1039_v20 }
 0x23c   : > { %v1034_v15 = vsel %vm1033_vm11, %v948_v63, %v1032_v33  ;;  %v695_v51 = vpop.xlane.xlu1 %694  ;;  %v692_v35 = vpop.xlane.xlu0 %691 }
 0x23d   : > { %1045 = vst.msk [vmem:[#allocation2 + $0x3] sm:$0xff] %vm1044_vm12, %v1034_v15  ;;  %v1019_v40 = vrot.slane %v695_v51, %v3500_v0  ;;  %v1015_v28 = vrot.slane %v692_v35, %v3507_v1  ;;  %v5194_v51 = vstv %s3436_s29 }
 0x23f   : > { %v1020_v37 = vsel %vm884_vm4, %v1019_v40, %v1015_v28  ;;  %v5190_v40 = vstv %s3428_s30  ;;  %s5211_s30 = sld [smem:[#allocation66_spill]] }
 0x240   : > { %v1041_v47 = vsel %vm1033_vm11, %v1020_v37, %v1040_v43  ;;  %v701_v63 = vpop.xlane.xlu1 %700  ;;  %v698_v23 = vpop.xlane.xlu0 %697 }
 0x241   : > { %1046 = vst.msk [vmem:[#allocation2 + $0xb] sm:$0xff] %vm1044_vm12, %v1041_v47  ;;  %v794_v20 = vmul.f32 0.03125, %v701_v63  ;;  %v793_v43 = vmul.f32 0.03125, %v698_v23  ;;  %v5192_v63 = vstv %s3430_s12 }
 0x243   : > { %v1086_v54 = vrot.slane %v794_v20, %v3500_v0  ;;  %v1082_v41 = vrot.slane %v793_v43, %v3507_v1  ;;  %v5199_v43 = vstv %s5195_s1 }
 0x244   : > { %v3819_v28 = vld [vmem:[#allocation2] sm:$0xff]  ;;  %v707_v37 = vpop.xlane.xlu1 %706  ;;  %v704_v33 = vpop.xlane.xlu0 %703 }
 0x245   : > { %v3821_v53 = vld [vmem:[#allocation2 + $0x1] sm:$0xff]  ;;  %v796_v47 = vmul.f32 0.03125, %v707_v37  ;;  %v795_v29 = vmul.f32 0.03125, %v704_v33  ;;  %v1249_v35 = vmul.f32 %v5190_v40, %v3819_v28  ;;  %v1257_v38 = vmul.f32 %v5194_v51, %v3819_v28 }
 0x246   : > { %v3830_v62 = vld [vmem:[#allocation2 + $0x2] sm:$0xff]  ;;  %v1281_v23 = vmul.f32 %v5192_v63, %v3821_v53  ;;  %v5196_v63 = vstv %s3438_s9  ;;  %v5218_v5 = vstv %s5211_s30 }
 0x247   : > { %v1095_v37 = vrot.slane %v796_v47, %v3500_v0  ;;  %v1091_v33 = vrot.slane %v795_v29, %v3507_v1  ;;  %v3841_v40 = vld [vmem:[#allocation2 + $0x3] sm:$0xff]  ;;  %v1293_v9 = vmul.f32 %v5196_v63, %v3821_v53  ;;  %v5197_v29 = vstv %s5191_s26  ;;  %s5222_s26 = sld [smem:[#allocation72_spill]] }
 0x248   : > { %v749_v15 = vpop.xlane.xlu1 %748  ;;  %v746_v32 = vpop.xlane.xlu0 %745  ;;  %v1283_v47 = vadd.f32 %v1281_v23, %v1249_v35  ;;  %v1325_v49 = vmul.f32 %v5197_v29, %v3830_v62  ;;  %v3854_v45 = vld [vmem:[#allocation2 + $0x8] sm:$0xff]  ;;  %v5198_v63 = vstv %s5193_s13  ;;  %v1337_v19 = vmul.f32 %v5199_v43, %v3830_v62 }
 0x249   : > { %v1369_v20 = vmul.f32 %v5198_v63, %v3841_v40  ;;  %v3867_v35 = vld [vmem:[#allocation2 + $0x9] sm:$0xff]  ;;  %v1096_v23 = vsel %vm884_vm4, %v1095_v37, %v1091_v33  ;;  %v810_v29 = vmul.f32 0.03125, %v749_v15  ;;  %v809_v21 = vmul.f32 0.03125, %v746_v32 }
 0x24a   : > { %v1327_v13 = vadd.f32 %v1325_v49, %v1283_v47  ;;  %v3870_v51 = vld [vmem:[#allocation2 + $0x4] sm:$0xff]  ;;  %v1295_v47 = vadd.f32 %v1293_v9, %v1257_v38  ;;  %v1087_v63 = vsel %vm884_vm4, %v1086_v54, %v1082_v41  ;;  %v1250_v37 = vmul.f32 %v5205_v17, %v3854_v45 }
 0x24b   : > { %v3872_v49 = vld [vmem:[#allocation2 + $0x5] sm:$0xff]  ;;  %v1381_v22 = vmul.f32 %v5206_v8, %v3841_v40  ;;  %v5208_v9 = vstv %s5201_s2  ;;  %v5209_v41 = vstv %s5202_s5  ;;  %v3893_v54 = vsel %vm1021_vm5, %v1096_v23, %v1087_v63 }
 0x24c   : > { %v755_v43 = vpop.xlane.xlu1 %754  ;;  %v752_v60 = vpop.xlane.xlu0 %751  ;;  %v1371_v11 = vadd.f32 %v1369_v20, %v1327_v13  ;;  %v3879_v15 = vld [vmem:[#allocation2 + $0x6] sm:$0xff]  ;;  %v1339_v32 = vadd.f32 %v1337_v19, %v1295_v47  ;;  %v1261_v38 = vmul.f32 %v5208_v9, %v3819_v28  ;;  %v1299_v13 = vmul.f32 %v5209_v41, %v3821_v53 }
 0x24d   : > { %v3884_v12 = vld [vmem:[#allocation2 + $0xa] sm:$0xff]  ;;  %v5210_v17 = vstv %s5203_s23  ;;  %v5212_v20 = vstv %s5204_s3  ;;  %v5214_v47 = vstv %s3430_s12  ;;  %v1158_v14 = vrot.slane %v810_v29, %v3500_v0  ;;  %s5221_s12 = sld [smem:[#allocation71_spill]] }
 0x24e   : > { %v1413_v19 = vmul.f32 %v5210_v17, %v3870_v51  ;;  %v1457_v8 = vmul.f32 %v5212_v20, %v3872_v49  ;;  %v1282_v33 = vmul.f32 %v5214_v47, %v3867_v35  ;;  %v3904_v9 = vld [vmem:[#allocation2 + $0xb] sm:$0xff]  ;;  %v1154_v41 = vrot.slane %v809_v21, %v3507_v1 }
 0x24f   : > { %v812_v23 = vmul.f32 0.03125, %v755_v43  ;;  %v811_v63 = vmul.f32 0.03125, %v752_v60  ;;  %v5215_v17 = vstv %s5207_s15  ;;  %v1326_v47 = vmul.f32 %v5217_v10, %v3884_v12  ;;  %s5251_s15 = sld [smem:[#allocation81_spill]] }
 0x250   : > { %v713_v18 = vpop.xlane.xlu1 %712  ;;  %v710_v46 = vpop.xlane.xlu0 %709  ;;  %v1415_v16 = vadd.f32 %v1413_v19, %v1371_v11  ;;  %v3911_v57 = vmul.f32 %v5215_v17, %v3879_v15  ;;  %v1284_v20 = vadd.f32 %v1282_v33, %v1250_v37  ;;  %v1383_v4 = vadd.f32 %v1381_v22, %v1339_v32  ;;  %v3925_v19 = vld [vmem:[#allocation2 + $0xc] sm:$0xff] }
 0x251   : > { %v1425_v29 = vmul.f32 %v5218_v5, %v3870_v51  ;;  %v5219_v21 = vstv %s5213_s25  ;;  %v5220_v60 = vstv %s5193_s13  ;;  %v798_v17 = vmul.f32 0.03125, %v713_v18  ;;  %v3927_v33 = vld [vmem:[#allocation2 + $0xd] sm:$0xff]  ;;  %s5224_s13 = sld [smem:[#allocation76_spill]] }
 0x252   : > { %v1469_v43 = vmul.f32 %v5219_v21, %v3872_v49  ;;  %v1370_v11 = vmul.f32 %v5220_v60, %v3904_v9  ;;  %v797_v61 = vmul.f32 0.03125, %v710_v46  ;;  %v1328_v37 = vadd.f32 %v1326_v47, %v1284_v20 }
 0x253   : > { %v1301_v10 = vadd.f32 %v1299_v13, %v1261_v38  ;;  %v1159_v22 = vsel %vm884_vm4, %v1158_v14, %v1154_v41  ;;  %v1167_v5 = vrot.slane %v812_v23, %v3500_v0  ;;  %v1163_v32 = vrot.slane %v811_v63, %v3507_v1 }
 0x254   : > { %v5223_v21 = vstv %s5216_s11  ;;  %v761_v30 = vpop.xlane.xlu1 %760  ;;  %v758_v34 = vpop.xlane.xlu0 %757  ;;  %v1459_v18 = vadd.f32 %v1457_v8, %v1415_v16  ;;  %v1372_v46 = vadd.f32 %v1370_v11, %v1328_v37  ;;  %v5226_v20 = vstv %s5203_s23  ;;  %s5236_s23 = sld [smem:[#allocation83_spill]] }
 0x255   : > { %v1513_v60 = vmul.f32 %v5223_v21, %v3879_v15  ;;  %v1414_v47 = vmul.f32 %v5226_v20, %v3925_v19  ;;  %v5227_v38 = vstv %s5221_s12  ;;  %v814_v13 = vmul.f32 0.03125, %v761_v30 }
 0x256   : > { %v1343_v14 = vmul.f32 %v5227_v38, %v3830_v62  ;;  %v813_v41 = vmul.f32 0.03125, %v758_v34  ;;  %v1427_v23 = vadd.f32 %v1425_v29, %v1383_v4  ;;  %v5228_v63 = vstv %s5204_s3  ;;  %v3950_v38 = vld [vmem:[#allocation2 + $0xe] sm:$0xff]  ;;  %s5234_s3 = sld [smem:[#allocation79_spill]] }
 0x257   : > { %v1458_v3 = vmul.f32 %v5228_v63, %v3927_v33  ;;  %v1104_v21 = vrot.slane %v798_v17, %v3500_v0  ;;  %v1100_v26 = vrot.slane %v797_v61, %v3507_v1  ;;  %v5230_v8 = vstv %s5222_s26 }
 0x258   : > { %v1345_v16 = vadd.f32 %v1343_v14, %v1301_v10  ;;  %v1387_v11 = vmul.f32 %v5230_v8, %v3841_v40  ;;  %v1168_v37 = vsel %vm884_vm4, %v1167_v5, %v1163_v32  ;;  %v1416_v20 = vadd.f32 %v1414_v47, %v1372_v46  ;;  %v719_v10 = vpop.xlane.xlu1 %718  ;;  %v716_v14 = vpop.xlane.xlu0 %715 }
 0x259   : > { %v5232_v34 = vstv %s5224_s13  ;;  %v5233_v4 = vstv %s5225_s16  ;;  %v1176_v17 = vrot.slane %v814_v13, %v3500_v0  ;;  %v1172_v61 = vrot.slane %v813_v41, %v3507_v1 }
 0x25a   : > { %v1253_v30 = vmul.f32 %v5232_v34, %v3819_v28  ;;  %v1287_v29 = vmul.f32 %v5233_v4, %v3821_v53  ;;  %v1389_v63 = vadd.f32 %v1387_v11, %v1345_v16  ;;  %v5235_v5 = vstv %s5229_s10 }
 0x25b   : > { %v1431_v32 = vmul.f32 %v5235_v5, %v3870_v51  ;;  %v800_v46 = vmul.f32 0.03125, %v719_v10  ;;  %v799_v47 = vmul.f32 0.03125, %v716_v14  ;;  %v5238_v34 = vstv %s5231_s22 }
 0x25c   : > { %v1289_v8 = vadd.f32 %v1287_v29, %v1253_v30  ;;  %v1331_v2 = vmul.f32 %v5238_v34, %v3830_v62  ;;  %v1230_v4 = vsel %vm1021_vm5, %v1168_v37, %v1159_v22  ;;  %v1105_v13 = vsel %vm884_vm4, %v1104_v21, %v1100_v26  ;;  %v767_v22 = vpop.xlane.xlu1 %766  ;;  %v764_v26 = vpop.xlane.xlu0 %763 }
 0x25d   : > { %v1471_v41 = vadd.f32 %v1469_v43, %v1427_v23  ;;  %v1502_v6 = vmul.f32 %v5239_v58, %v3950_v38  ;;  %v1460_v16 = vadd.f32 %v1458_v3, %v1416_v20  ;;  %v1433_v11 = vadd.f32 %v1431_v32, %v1389_v63 }
 0x25e   : > { %v1333_v5 = vadd.f32 %v1331_v2, %v1289_v8  ;;  %v5241_v10 = vstv %s5234_s3  ;;  %v1113_v30 = vrot.slane %v800_v46, %v3500_v0  ;;  %v1109_v29 = vrot.slane %v799_v47, %v3507_v1 }
 0x25f   : > { %v1375_v14 = vmul.f32 %v5241_v10, %v3841_v40  ;;  %v5245_v43 = vstv %s5236_s23  ;;  %v5246_v3 = vstv %s5237_s14  ;;  %v1177_v2 = vsel %vm884_vm4, %v1176_v17, %v1172_v61 }
 0x260   : > { %v1265_v23 = vmul.f32 %v5245_v43, %v3819_v28  ;;  %v1305_v58 = vmul.f32 %v5246_v3, %v3821_v53  ;;  %v816_v21 = vmul.f32 0.03125, %v767_v22  ;;  %v815_v37 = vmul.f32 0.03125, %v764_v26 }
 0x261   : > { %v1377_v20 = vadd.f32 %v1375_v14, %v1333_v5  ;;  %v3984_v63 = vadd.f32 %v3911_v57, %v1459_v18  ;;  %v3986_v32 = vadd.f32 %v1513_v60, %v1471_v41  ;;  %v5247_v46 = vstv %s5240_s19  ;;  %v725_v5 = vpop.xlane.xlu1 %724 }
 0x262   : > { %v1475_v47 = vmul.f32 %v5247_v46, %v3872_v49  ;;  %v1307_v8 = vadd.f32 %v1305_v58, %v1265_v23  ;;  %v1224_v34 = vsel %vm1023_vm6, %v1105_v13, %v3893_v54  ;;  %v5248_v10 = vstv %s5242_s27  ;;  %v722_v54 = vpop.xlane.xlu0 %721 }
 0x263   : > { %v1519_v43 = vmul.f32 %v5248_v10, %v3879_v15  ;;  %v5249_v17 = vstv %s5243_s0  ;;  %v5250_v57 = vstv %s5244_s28  ;;  %v1231_v60 = vsel %vm1023_vm6, %v1177_v2, %v1230_v4  ;;  %s5327_s28 = sld [smem:[#allocation100_spill]] }
 0x264   : > { %v1419_v61 = vmul.f32 %v5249_v17, %v3870_v51  ;;  %v1349_v18 = vmul.f32 %v5250_v57, %v3830_v62  ;;  %v1114_v41 = vsel %vm884_vm4, %v1113_v30, %v1109_v29  ;;  %v4004_v13 = vadd.f32 %v1502_v6, %v1460_v16 }
 0x265   : > { %v1477_v14 = vadd.f32 %v1475_v47, %v1433_v11  ;;  %v1185_v22 = vrot.slane %v816_v21, %v3500_v0  ;;  %v1181_v26 = vrot.slane %v815_v37, %v3507_v1  ;;  %v802_v58 = vmul.f32 0.03125, %v725_v5 }
 0x266   : > { %v1421_v23 = vadd.f32 %v1419_v61, %v1377_v20  ;;  %v1351_v3 = vadd.f32 %v1349_v18, %v1307_v8  ;;  %v801_v46 = vmul.f32 0.03125, %v722_v54  ;;  %v5255_v4 = vstv %s5224_s13  ;;  %v773_v8 = vpop.xlane.xlu1 %772  ;;  %v770_v10 = vpop.xlane.xlu0 %769  ;;  %s5262_s13 = sld [smem:[#allocation91_spill]] }
 0x267   : > { %v1254_v30 = vmul.f32 %v5255_v4, %v3854_v45  ;;  %v5257_v29 = vstv %s5225_s16  ;;  %v1225_v6 = vsel %vm1025_vm7, %v1114_v41, %v1224_v34  ;;  %v5258_v16 = vstv %s5251_s15  ;;  %s5265_s16 = sld [smem:[#allocation89_spill]] }
 0x268   : > { %v1288_v2 = vmul.f32 %v5257_v29, %v3867_v35  ;;  %v1463_v11 = vmul.f32 %v5258_v16, %v3872_v49  ;;  %v5259_v21 = vstv %s5252_s7  ;;  %v5260_v20 = vstv %s5253_s4 }
 0x269   : > { %v1507_v37 = vmul.f32 %v5259_v21, %v3879_v15  ;;  %v1393_v47 = vmul.f32 %v5260_v20, %v3841_v40  ;;  %v4024_v17 = vadd.f32 %v1519_v43, %v1477_v14  ;;  %v5263_v61 = vstv %s5254_s20 }
 0x26a   : > { %v1437_v57 = vmul.f32 %v5263_v61, %v3870_v51  ;;  %v1290_v34 = vadd.f32 %v1288_v2, %v1254_v30  ;;  %v5264_v18 = vstv %s5231_s22  ;;  %v1186_v5 = vsel %vm884_vm4, %v1185_v22, %v1181_v26  ;;  %s5274_s22 = sld [smem:[#allocation93_spill]] }
 0x26b   : > { %v1332_v41 = vmul.f32 %v5264_v18, %v3884_v12  ;;  %v1465_v54 = vadd.f32 %v1463_v11, %v1421_v23  ;;  %v1395_v4 = vadd.f32 %v1393_v47, %v1351_v3  ;;  %v5266_v29 = vstv %s5256_s18  ;;  %v731_v11 = vpop.xlane.xlu1 %730 }
 0x26c   : > { %v1481_v16 = vmul.f32 %v5266_v29, %v3872_v49  ;;  %v1122_v21 = vrot.slane %v802_v58, %v3500_v0  ;;  %v1118_v43 = vrot.slane %v801_v46, %v3507_v1  ;;  %v5268_v30 = vstv %s5234_s3  ;;  %v728_v58 = vpop.xlane.xlu0 %727  ;;  %s5349_s3 = sld [smem:[#allocation102_spill]] }
 0x26d   : > { %v1334_v14 = vadd.f32 %v1332_v41, %v1290_v34  ;;  %v1376_v2 = vmul.f32 %v5268_v30, %v3904_v9  ;;  %v818_v20 = vmul.f32 0.03125, %v773_v8  ;;  %v817_v61 = vmul.f32 0.03125, %v770_v10 }
 0x26e   : > { %v5269_v18 = vstv %s5261_s24  ;;  %v5270_v26 = vstv %s5262_s13  ;;  %v1232_v3 = vsel %vm1025_vm7, %v1186_v5, %v1231_v60  ;;  %v5271_v46 = vstv %s5265_s16 }
 0x26f   : > { %v1269_v22 = vmul.f32 %v5269_v18, %v3819_v28  ;;  %v1311_v23 = vmul.f32 %v5270_v26, %v3821_v53  ;;  %v1525_v47 = vmul.f32 %v5271_v46, %v3879_v15  ;;  %v1378_v34 = vadd.f32 %v1376_v2, %v1334_v14 }
 0x270   : > { %v5272_v41 = vstv %s5243_s0  ;;  %v804_v8 = vmul.f32 0.03125, %v731_v11  ;;  %v803_v10 = vmul.f32 0.03125, %v728_v58  ;;  %v5273_v18 = vstv %s5267_s6  ;;  %s5276_s0 = sld [smem:[#allocation94_spill]] }
 0x271   : > { %v1420_v29 = vmul.f32 %v5272_v41, %v3925_v19  ;;  %v1313_v30 = vadd.f32 %v1311_v23, %v1269_v22  ;;  %v1355_v56 = vmul.f32 %v5273_v18, %v3830_v62  ;;  %v1123_v26 = vsel %vm884_vm4, %v1122_v21, %v1118_v43 }
 0x272   : > { %v4058_v60 = vadd.f32 %v1507_v37, %v1465_v54  ;;  %v1439_v5 = vadd.f32 %v1437_v57, %v1395_v4  ;;  %v5275_v46 = vstv %s5251_s15  ;;  %v1194_v2 = vrot.slane %v818_v20, %v3500_v0  ;;  %v779_v37 = vpop.xlane.xlu1 %778  ;;  %v776_v54 = vpop.xlane.xlu0 %775  ;;  %s5354_s15 = sld [smem:[#allocation111_spill]] }
 0x273   : > { %v1464_v14 = vmul.f32 %v5275_v46, %v3927_v33  ;;  %v1190_v11 = vrot.slane %v817_v61, %v3507_v1  ;;  %v1422_v58 = vadd.f32 %v1420_v29, %v1378_v34  ;;  %v1357_v22 = vadd.f32 %v1355_v56, %v1313_v30 }
 0x274   : > { %v1131_v23 = vrot.slane %v804_v8, %v3500_v0  ;;  %v1127_v41 = vrot.slane %v803_v10, %v3507_v1  ;;  %v5277_v57 = vstv %s3436_s29  ;;  %v5278_v21 = vstv %s3438_s9  ;;  %s5282_s29 = sld [smem:[#allocation95_spill]]  ;;  %s5284_s9 = sld [smem:[#allocation96_spill]] }
 0x275   : > { %v1258_v4 = vmul.f32 %v5277_v57, %v3854_v45  ;;  %v1294_v43 = vmul.f32 %v5278_v21, %v3867_v35  ;;  %v1226_v20 = vsel %vm1027_vm8, %v1123_v26, %v1225_v6  ;;  %v820_v61 = vmul.f32 0.03125, %v779_v37 }
 0x276   : > { %v819_v34 = vmul.f32 0.03125, %v776_v54  ;;  %v5279_v56 = vstv %s5274_s22  ;;  %v1483_v8 = vadd.f32 %v1481_v16, %v1439_v5  ;;  %v5280_v10 = vstv %s5252_s7  ;;  %v737_v16 = vpop.xlane.xlu1 %736  ;;  %v734_v5 = vpop.xlane.xlu0 %733  ;;  %s5320_s7 = sld [smem:[#allocation144_spill]] }
 0x277   : > { %v1399_v29 = vmul.f32 %v5279_v56, %v3841_v40  ;;  %v1508_v30 = vmul.f32 %v5280_v10, %v3950_v38  ;;  %v1296_v18 = vadd.f32 %v1294_v43, %v1258_v4  ;;  %v5281_v46 = vstv %s5195_s1  ;;  %s5303_s1 = sld [smem:[#allocation104_spill]] }
 0x278   : > { %v1338_v57 = vmul.f32 %v5281_v46, %v3884_v12  ;;  %v1195_v59 = vsel %vm884_vm4, %v1194_v2, %v1190_v11  ;;  %v1466_v21 = vadd.f32 %v1464_v14, %v1422_v58  ;;  %v5283_v26 = vstv %s5276_s0 }
 0x279   : > { %v1401_v6 = vadd.f32 %v1399_v29, %v1357_v22  ;;  %v1443_v37 = vmul.f32 %v5283_v26, %v3870_v51  ;;  %v1132_v54 = vsel %vm884_vm4, %v1131_v23, %v1127_v41  ;;  %v5285_v4 = vstv %s5200_s21  ;;  %s5338_s21 = sld [smem:[#allocation115_spill]] }
 0x27a   : > { %v1340_v56 = vadd.f32 %v1338_v57, %v1296_v18  ;;  %v1382_v43 = vmul.f32 %v5285_v4, %v3904_v9  ;;  %v5286_v10 = vstv %s5201_s2  ;;  %v1203_v2 = vrot.slane %v820_v61, %v3500_v0  ;;  %s5304_s2 = sld [smem:[#allocation105_spill]] }
 0x27b   : > { %v1262_v46 = vmul.f32 %v5286_v10, %v3854_v45  ;;  %v1199_v14 = vrot.slane %v819_v34, %v3507_v1  ;;  %v806_v11 = vmul.f32 0.03125, %v737_v16  ;;  %v805_v58 = vmul.f32 0.03125, %v734_v5 }
 0x27c   : > { %v1233_v22 = vsel %vm1027_vm8, %v1195_v59, %v1232_v3  ;;  %v4097_v23 = vadd.f32 %v1525_v47, %v1483_v8  ;;  %v5287_v41 = vstv %s5282_s29  ;;  %v5288_v18 = vstv %s5202_s5  ;;  %v785_v47 = vpop.xlane.xlu1 %784  ;;  %v782_v8 = vpop.xlane.xlu0 %781  ;;  %s5315_s5 = sld [smem:[#allocation97_spill]] }
 0x27d   : > { %v1487_v29 = vmul.f32 %v5287_v41, %v3872_v49  ;;  %v1300_v57 = vmul.f32 %v5288_v18, %v3867_v35  ;;  %v1227_v26 = vsel %vm1029_vm9, %v1132_v54, %v1226_v20  ;;  %v1445_v61 = vadd.f32 %v1443_v37, %v1401_v6 }
 0x27e   : > { %v5289_v34 = vstv %s5284_s9  ;;  %v1384_v5 = vadd.f32 %v1382_v43, %v1340_v56  ;;  %v1140_v59 = vrot.slane %v806_v11, %v3500_v0  ;;  %v1136_v3 = vrot.slane %v805_v58, %v3507_v1 }
 0x27f   : > { %v4109_v16 = vmul.f32 %v5289_v34, %v3879_v15  ;;  %v1302_v4 = vadd.f32 %v1300_v57, %v1262_v46  ;;  %v5290_v10 = vstv %s5221_s12  ;;  %v1204_v6 = vsel %vm884_vm4, %v1203_v2, %v1199_v14  ;;  %s5345_s12 = sld [smem:[#allocation122_spill]] }
 0x280   : > { %v1344_v20 = vmul.f32 %v5290_v10, %v3884_v12  ;;  %v4117_v37 = vadd.f32 %v1508_v30, %v1466_v21  ;;  %v5291_v54 = vstv %s5211_s30  ;;  %v5292_v43 = vstv %s5222_s26  ;;  %s5344_s30 = sld [smem:[#allocation121_spill]]  ;;  %s5347_s26 = sld [smem:[#allocation101_spill]] }
 0x281   : > { %v1426_v56 = vmul.f32 %v5291_v54, %v3925_v19  ;;  %v1388_v11 = vmul.f32 %v5292_v43, %v3904_v9  ;;  %v822_v41 = vmul.f32 0.03125, %v785_v47  ;;  %v821_v18 = vmul.f32 0.03125, %v782_v8 }
 0x282   : > { %v1346_v58 = vadd.f32 %v1344_v20, %v1302_v4  ;;  %v5293_v34 = vstv %s5236_s23  ;;  %v1489_v57 = vadd.f32 %v1487_v29, %v1445_v61  ;;  %v5294_v10 = vstv %s5213_s25  ;;  %v743_v4 = vpop.xlane.xlu1 %742  ;;  %v740_v20 = vpop.xlane.xlu0 %739  ;;  %s5323_s25 = sld [smem:[#allocation98_spill]]  ;;  %s5351_s23 = sld [smem:[#allocation103_spill]] }
 0x283   : > { %v1266_v46 = vmul.f32 %v5293_v34, %v3854_v45  ;;  %v1470_v2 = vmul.f32 %v5294_v10, %v3927_v33  ;;  %v5295_v30 = vstv %s5216_s11  ;;  %v5296_v14 = vstv %s5237_s14  ;;  %s5331_s14 = sld [smem:[#allocation109_spill]]  ;;  %s5339_s11 = sld [smem:[#allocation116_spill]] }
 0x284   : > { %v1514_v21 = vmul.f32 %v5295_v30, %v3950_v38  ;;  %v1306_v54 = vmul.f32 %v5296_v14, %v3867_v35  ;;  %v1234_v47 = vsel %vm1029_vm9, %v1204_v6, %v1233_v22  ;;  %v1141_v8 = vsel %vm884_vm4, %v1140_v59, %v1136_v3 }
 0x285   : > { %v1428_v43 = vadd.f32 %v1426_v56, %v1384_v5  ;;  %v1390_v29 = vadd.f32 %v1388_v11, %v1346_v58  ;;  %v808_v61 = vmul.f32 0.03125, %v743_v4  ;;  %v807_v34 = vmul.f32 0.03125, %v740_v20 }
 0x286   : > { %v1308_v10 = vadd.f32 %v1306_v54, %v1266_v46  ;;  %v1350_v30 = vmul.f32 %v5297_v50, %v3884_v12  ;;  %v1212_v31 = vrot.slane %v822_v41, %v3500_v0  ;;  %v1208_v14 = vrot.slane %v821_v18, %v3507_v1  ;;  %v791_v41 = vpop.xlane.xlu1 %790  ;;  %v788_v18 = vpop.xlane.xlu0 %787 }
 0x287   : > { %v5298_v22 = vstv %s5229_s10  ;;  %v5299_v3 = vstv %s5253_s4  ;;  %v1149_v5 = vrot.slane %v808_v61, %v3500_v0  ;;  %v1145_v56 = vrot.slane %v807_v34, %v3507_v1  ;;  %s5306_s4 = sld [smem:[#allocation106_spill]]  ;;  %s5329_s10 = sld [smem:[#allocation108_spill]] }
 0x288   : > { %v1432_v59 = vmul.f32 %v5298_v22, %v3925_v19  ;;  %v1394_v6 = vmul.f32 %v5299_v3, %v3904_v9  ;;  %v1352_v11 = vadd.f32 %v1350_v30, %v1308_v10  ;;  %v5300_v58 = vstv %s5261_s24  ;;  %s5322_s24 = sld [smem:[#allocation145_spill]] }
 0x289   : > { %v1270_v46 = vmul.f32 %v5300_v58, %v3854_v45  ;;  %v1228_v50 = vsel %vm1031_vm10, %v1141_v8, %v1227_v26  ;;  %v5301_v4 = vstv %s5254_s20  ;;  %v5302_v22 = vstv %s5262_s13  ;;  %s5336_s20 = sld [smem:[#allocation114_spill]]  ;;  %s5356_s13 = sld [smem:[#allocation112_spill]] }
 0x28a   : > { %v1434_v54 = vadd.f32 %v1432_v59, %v1390_v29  ;;  %v1438_v20 = vmul.f32 %v5301_v4, %v3925_v19  ;;  %v1312_v3 = vmul.f32 %v5302_v22, %v3867_v35  ;;  %v1150_v61 = vsel %vm884_vm4, %v1149_v5, %v1145_v56 }
 0x28b   : > { %v824_v34 = vmul.f32 0.03125, %v791_v41  ;;  %v823_v10 = vmul.f32 0.03125, %v788_v18  ;;  %v1396_v30 = vadd.f32 %v1394_v6, %v1352_v11  ;;  %v1213_v58 = vsel %vm884_vm4, %v1212_v31, %v1208_v14 }
 0x28c   : > { %v1229_v26 = vsel %vm1033_vm11, %v1150_v61, %v1228_v50  ;;  %v1314_v8 = vadd.f32 %v1312_v3, %v1270_v46  ;;  %v5305_v29 = vstv %s5267_s6  ;;  %v5307_v56 = vstv %s5240_s19  ;;  %s5317_s6 = sld [smem:[#allocation107_spill]]  ;;  %s5332_s19 = sld [smem:[#allocation110_spill]] }
 0x28d   : > { %v1356_v59 = vmul.f32 %v5305_v29, %v3884_v12  ;;  %1239 = vst.msk [vmem:[#allocation2 + $0x1b] sm:$0xff] %vm1044_vm12, %v1229_v26  ;;  %v1221_v4 = vrot.slane %v824_v34, %v3500_v0  ;;  %v1217_v5 = vrot.slane %v823_v10, %v3507_v1  ;;  %v1476_v6 = vmul.f32 %v5307_v56, %v3927_v33 }
 0x28e   : > { %v1440_v31 = vadd.f32 %v1438_v20, %v1396_v30  ;;  %v1472_v14 = vadd.f32 %v1470_v2, %v1428_v43  ;;  %v5308_v46 = vstv %s5303_s1  ;;  %v5309_v41 = vstv %s5304_s2  ;;  %s5378_s1 = sld [smem:[#allocation119_spill]]  ;;  %s5379_s2 = sld [smem:[#allocation129_spill]] }
 0x28f   : > { %v1358_v11 = vadd.f32 %v1356_v59, %v1314_v8  ;;  %v1245_v50 = vmul.f32 %v5308_v46, %v3819_v28  ;;  %v1275_v18 = vmul.f32 %v5309_v41, %v3821_v53  ;;  %v1235_v22 = vsel %vm1031_vm10, %v1213_v58, %v1234_v47 }
 0x290   : > { %v1222_v0 = vsel %vm884_vm4, %v1221_v4, %v1217_v5  ;;  %v1478_v1 = vadd.f32 %v1476_v6, %v1434_v54  ;;  %v5310_v3 = vstv %s5256_s18  ;;  %v5311_v43 = vstv %s5274_s22  ;;  %s5342_s18 = sld [smem:[#allocation117_spill]]  ;;  %s5368_s22 = sld [smem:[#allocation123_spill]] }
 0x291   : > { %v1482_v61 = vmul.f32 %v5310_v3, %v3927_v33  ;;  %v1236_v2 = vsel %vm1033_vm11, %v1222_v0, %v1235_v22  ;;  %v1400_v28 = vmul.f32 %v5311_v43, %v3904_v9  ;;  %v1277_v20 = vadd.f32 %v1275_v18, %v1245_v50 }
 0x292   : > { %v5312_v53 = vstv %s5306_s4  ;;  %1240 = vst.msk [vmem:[#allocation2 + $0x23] sm:$0xff] %vm1044_vm12, %v1236_v2  ;;  %v4194_v47 = vadd.f32 %v4109_v16, %v1489_v57  ;;  %v5313_v54 = vstv %s5242_s27  ;;  %v5314_v58 = vstv %s3796_s8  ;;  %s5325_s27 = sld [smem:[#allocation99_spill]]  ;;  %s5401_s8 = sld [smem:[#allocation134_spill]] }
 0x293   : > { %v1319_v34 = vmul.f32 %v5312_v53, %v3830_v62  ;;  %v1520_v10 = vmul.f32 %v5313_v54, %v3950_v38  ;;  %v1484_v30 = vadd.f32 %v1482_v61, %v1440_v31  ;;  %v1363_v26 = vmul.f32 %v5314_v58, %v3841_v40 }
 0x294   : > { %v1402_v8 = vadd.f32 %v1400_v28, %v1358_v11  ;;  %v5316_v59 = vmov %v5308_v46  ;;  %v5318_v4 = vmov %v5309_v41  ;;  %v4208_v16 = vadd.f32 %v1514_v21, %v1472_v14  ;;  %v4218_v11 = vld [vmem:[#allocation2 + $0x18] sm:$0xff] }
 0x295   : > { %v1321_v29 = vadd.f32 %v1319_v34, %v1277_v20  ;;  %v1246_v62 = vmul.f32 %v5316_v59, %v3854_v45  ;;  %v1276_v5 = vmul.f32 %v5318_v4, %v3867_v35  ;;  %v4210_v57 = vadd.f32 %v1520_v10, %v1478_v1  ;;  %v4220_v45 = vld [vmem:[#allocation2 + $0x19] sm:$0xff] }
 0x296   : > { %v5319_v56 = vstv %s5265_s16  ;;  %v5321_v40 = vstv %s5276_s0  ;;  %v4222_v35 = vld [vmem:[#allocation2 + $0x1a] sm:$0xff]  ;;  %v5324_v21 = vstv %s5282_s29  ;;  %v5326_v46 = vstv %s5284_s9  ;;  %s5362_s16 = sld [smem:[#allocation113_spill]]  ;;  %s5372_s0 = sld [smem:[#allocation118_spill]] }
 0x297   : > { %v1526_v6 = vmul.f32 %v5319_v56, %v3950_v38  ;;  %v1444_v31 = vmul.f32 %v5321_v40, %v3925_v19  ;;  %v4227_v14 = vmul.f32 %v5324_v21, %v3927_v33  ;;  %v4232_v50 = vmul.f32 %v5326_v46, %v3950_v38  ;;  %v4241_v1 = vld [vmem:[#allocation2 + $0x1b] sm:$0xff]  ;;  %s5373_s29 = sld [smem:[#allocation124_spill]]  ;;  %s5374_s9 = sld [smem:[#allocation128_spill]] }
 0x298   : > { %v4234_v41 = vadd.f32 %v1363_v26, %v1321_v29  ;;  %v4236_v18 = vadd.f32 %v1276_v5, %v1246_v62  ;;  %v5328_v22 = vstv %s5315_s5  ;;  %v5330_v3 = vstv %s5317_s6 }
 0x299   : > { %v1545_v0 = vmul.f32 %v5328_v22, %v4218_v11  ;;  %v1557_v61 = vmul.f32 %v5330_v3, %v4218_v11  ;;  %v4246_v2 = vadd.f32 %v1526_v6, %v1484_v30  ;;  %v5333_v43 = vstv %s3798_s17  ;;  %v4281_v4 = vld [vmem:[#allocation2 + $0x1c] sm:$0xff]  ;;  %v4344_v55 = vld [vmem:[#allocation2 + $0x24] sm:$0xff]  ;;  %s5014_s17 = smov 125  }
 0x29a   : > { %v4251_v28 = vmul.f32 %v5333_v43, %v3870_v51  ;;  %v4253_v20 = vadd.f32 %v1444_v31, %v1402_v8  ;;  %v5334_v53 = vstv %s5320_s7  ;;  %v5335_v54 = vstv %s5322_s24  ;;  %v4294_v21 = vld [vmem:[#allocation2 + $0x1e] sm:$0xff]  ;;  %s5396_s24 = sld [smem:[#allocation133_spill]]  ;;  %s5400_s7 = sld [smem:[#allocation135_spill]] }
 0x29b   : > { %v4258_v34 = vmul.f32 %v5334_v53, %v3872_v49  ;;  %v4263_v10 = vmul.f32 %v5335_v54, %v3879_v15  ;;  %v5337_v58 = vstv %s5306_s4  ;;  %v1547_v51 = vadd.f32 %v1545_v0, %v3984_v63  ;;  %v4296_v46 = vld [vmem:[#allocation2 + $0x20] sm:$0xff]  ;;  %s5382_s4 = sld [smem:[#allocation125_spill]] }
 0x29c   : > { %v4268_v30 = vmul.f32 %v5337_v58, %v3884_v12  ;;  %v5340_v26 = vstv %s5323_s25  ;;  %v5341_v29 = vstv %s5325_s27  ;;  %v1559_v59 = vadd.f32 %v1557_v61, %v3986_v32  ;;  %v4283_v12 = vld [vmem:[#allocation2 + $0x1d] sm:$0xff]  ;;  %v4346_v39 = vld [vmem:[#allocation2 + $0x25] sm:$0xff] }
 0x29d   : > { %v1589_v8 = vmul.f32 %v5340_v26, %v4220_v45  ;;  %v1633_v49 = vmul.f32 %v5341_v29, %v4222_v35  ;;  %v5343_v15 = vstv %s5327_s28  ;;  %v5346_v63 = vstv %s5329_s10  ;;  %v4307_v58 = vld [vmem:[#allocation2 + $0x21] sm:$0xff] }
 0x29e   : > { %v1677_v62 = vmul.f32 %v5343_v15, %v4241_v1  ;;  %v1601_v5 = vmul.f32 %v5346_v63, %v4220_v45  ;;  %v5348_v56 = vstv %s5331_s14  ;;  %v5350_v40 = vstv %s5332_s19  ;;  %v4329_v44 = vld [vmem:[#allocation2 + $0x23] sm:$0xff] }
 0x29f   : > { %v1645_v6 = vmul.f32 %v5348_v56, %v4222_v35  ;;  %v1689_v32 = vmul.f32 %v5350_v40, %v4241_v1  ;;  %v1591_v31 = vadd.f32 %v1589_v8, %v1547_v51  ;;  %v5352_v22 = vstv %s5336_s20 }
 0x2a0   : > { %v1563_v0 = vmul.f32 %v5352_v22, %v4218_v11  ;;  %v5353_v3 = vstv %s5338_s21  ;;  %v5355_v43 = vstv %s5339_s11  ;;  %v1603_v54 = vadd.f32 %v1601_v5, %v1559_v59 }
 0x2a1   : > { %v1607_v61 = vmul.f32 %v5353_v3, %v4220_v45  ;;  %v1651_v53 = vmul.f32 %v5355_v43, %v4222_v35  ;;  %v5357_v51 = vstv %s5342_s18  ;;  %v5358_v8 = vstv %s5344_s30 }
 0x2a2   : > { %v1695_v26 = vmul.f32 %v5357_v51, %v4241_v1  ;;  %v1551_v29 = vmul.f32 %v5358_v8, %v4218_v11  ;;  %v5359_v15 = vstv %s5345_s12  ;;  %v1635_v56 = vadd.f32 %v1633_v49, %v1591_v31  ;;  %v4327_v51 = vld [vmem:[#allocation2 + $0x22] sm:$0xff] }
 0x2a3   : > { %v1595_v63 = vmul.f32 %v5359_v15, %v4220_v45  ;;  %v5360_v40 = vstv %s5347_s26  ;;  %v5361_v3 = vstv %s5349_s3  ;;  %v5363_v5 = vstv %s5315_s5  ;;  %s5384_s5 = sld [smem:[#allocation126_spill]] }
 0x2a4   : > { %v1721_v22 = vmul.f32 %v5360_v40, %v4281_v4  ;;  %v1765_v59 = vmul.f32 %v5361_v3, %v4283_v12  ;;  %v1546_v43 = vmul.f32 %v5363_v5, %v4296_v46  ;;  %v5364_v8 = vstv %s5351_s23 }
 0x2a5   : > { %v1809_v15 = vmul.f32 %v5364_v8, %v4294_v21  ;;  %v1647_v49 = vadd.f32 %v1645_v6, %v1603_v54  ;;  %v5365_v31 = vstv %s5354_s15  ;;  %v5366_v52 = vstv %s5356_s13 }
 0x2a6   : > { %v1733_v40 = vmul.f32 %v5365_v31, %v4281_v4  ;;  %v1777_v42 = vmul.f32 %v5366_v52, %v4283_v12  ;;  %v1679_v3 = vadd.f32 %v1677_v62, %v1635_v56  ;;  %v1548_v5 = vadd.f32 %v1546_v43, %v4004_v13 }
 0x2a7   : > { %v5367_v24 = vstv %s5323_s25  ;;  %v1565_v6 = vadd.f32 %v1563_v0, %v4024_v17  ;;  %v1691_v54 = vadd.f32 %v1689_v32, %v1647_v49  ;;  %v5369_v8 = vstv %s5362_s16  ;;  %s5385_s25 = sld [smem:[#allocation130_spill]] }
 0x2a8   : > { %v1590_v36 = vmul.f32 %v5367_v24, %v4307_v58  ;;  %v1821_v31 = vmul.f32 %v5369_v8, %v4294_v21  ;;  %v5370_v52 = vstv %s5325_s27  ;;  %v5371_v56 = vstv %s5327_s28  ;;  %s5389_s27 = sld [smem:[#allocation120_spill]]  ;;  %s2663_s28 = smov 127  }
 0x2a9   : > { %v1634_v62 = vmul.f32 %v5370_v52, %v4327_v51  ;;  %v1678_v13 = vmul.f32 %v5371_v56, %v4329_v44  ;;  %v1723_v43 = vadd.f32 %v1721_v22, %v1679_v3  ;;  %v1609_v25 = vadd.f32 %v1607_v61, %v1565_v6  ;;  %v4368_v3 = vld [vmem:[#allocation2 + $0x26] sm:$0xff] }
 0x2aa   : > { %v1592_v24 = vadd.f32 %v1590_v36, %v1548_v5  ;;  %v1553_v27 = vadd.f32 %v1551_v29, %v4058_v60  ;;  %v1735_v7 = vadd.f32 %v1733_v40, %v1691_v54  ;;  %v5375_v17 = vstv %s5347_s26  ;;  %s5390_s26 = sld [smem:[#allocation131_spill]] }
 0x2ab   : > { %v1722_v32 = vmul.f32 %v5375_v17, %v4344_v55  ;;  %v5376_v0 = vstv %s5349_s3  ;;  %v5377_v8 = vstv %s5368_s22  ;;  %v1767_v56 = vadd.f32 %v1765_v59, %v1723_v43  ;;  %s5394_s3 = sld [smem:[#allocation127_spill]] }
 0x2ac   : > { %v1766_v49 = vmul.f32 %v5376_v0, %v4346_v39  ;;  %v1639_v52 = vmul.f32 %v5377_v8, %v4222_v35  ;;  %v1636_v22 = vadd.f32 %v1634_v62, %v1592_v24  ;;  %v1653_v36 = vadd.f32 %v1651_v53, %v1609_v25 }
 0x2ad   : > { %v1597_v61 = vadd.f32 %v1595_v63, %v1553_v27  ;;  %v1779_v60 = vadd.f32 %v1777_v42, %v1735_v7  ;;  %v5380_v29 = vstv %s5372_s0  ;;  %v5381_v5 = vstv %s5373_s29 }
 0x2ae   : > { %v1739_v40 = vmul.f32 %v5380_v29, %v4281_v4  ;;  %v1683_v6 = vmul.f32 %v5381_v5, %v4241_v1  ;;  %v5383_v54 = vstv %s5374_s9  ;;  %v1811_v0 = vadd.f32 %v1809_v15, %v1767_v56 }
 0x2af   : > { %v1569_v17 = vmul.f32 %v5383_v54, %v4218_v11  ;;  %v1680_v59 = vadd.f32 %v1678_v13, %v1636_v22  ;;  %v1697_v62 = vadd.f32 %v1695_v26, %v1653_v36  ;;  %v1641_v43 = vadd.f32 %v1639_v52, %v1597_v61 }
 0x2b0   : > { %v5386_v25 = vstv %s5351_s23  ;;  %v5387_v7 = vstv %s5378_s1  ;;  %v5388_v63 = vstv %s5379_s2  ;;  %1845 = vrot.lane.b32.xlu0 %v1811_v0, %s2663_s28  ;;  %v1823_v56 = vadd.f32 %v1821_v31, %v1779_v60  ;;  %s5395_s23 = sld [smem:[#allocation132_spill]] }
 0x2b1   : > { %v1810_v27 = vmul.f32 %v5386_v25, %v4368_v3  ;;  %v1783_v42 = vmul.f32 %v5387_v7, %v4283_v12  ;;  %v1571_v53 = vadd.f32 %v1569_v17, %v4097_v23  ;;  %v1613_v24 = vmul.f32 %v5388_v63, %v4220_v45 }
 0x2b2   : > { %v1724_v15 = vadd.f32 %v1722_v32, %v1680_v59  ;;  %v1741_v13 = vadd.f32 %v1739_v40, %v1697_v62  ;;  %v1685_v26 = vadd.f32 %v1683_v6, %v1641_v43  ;;  %v5391_v8 = vstv %s5382_s4 }
 0x2b3   : > { %v1727_v52 = vmul.f32 %v5391_v8, %v4281_v4  ;;  %v5392_v22 = vstv %s5384_s5  ;;  %v1615_v61 = vadd.f32 %v1613_v24, %v1571_v53  ;;  %v5393_v23 = vstv %s5385_s25 }
 0x2b4   : > { %v1771_v36 = vmul.f32 %v5392_v22, %v4283_v12  ;;  %v1657_v29 = vmul.f32 %v5393_v23, %v4222_v35  ;;  %v1768_v5 = vadd.f32 %v1766_v49, %v1724_v15  ;;  %v1785_v54 = vadd.f32 %v1783_v42, %v1741_v13  ;;  %1865 = vrot.lane.b32.xlu0 %v1823_v56, %s5014_s17  ;;  %s5015_s17 = smov 124  }
 0x2b5   : > { %v1729_v32 = vadd.f32 %v1727_v52, %v1685_v26  ;;  %v5397_v40 = vstv %s5344_s30  ;;  %v5398_v17 = vstv %s5389_s27  ;;  %v5399_v0 = vstv %s5390_s26  ;;  %s5406_s30 = sld [smem:[#allocation136_spill]] }
 0x2b6   : > { %v1552_v6 = vmul.f32 %v5397_v40, %v4296_v46  ;;  %v1827_v31 = vmul.f32 %v5398_v17, %v4294_v21  ;;  %v1659_v60 = vadd.f32 %v1657_v29, %v1615_v61  ;;  %v1701_v59 = vmul.f32 %v5399_v0, %v4241_v1 }
 0x2b7   : > { %v4409_v62 = vadd.f32 %v4227_v14, %v4253_v20  ;;  %v1812_v49 = vadd.f32 %v1810_v27, %v1768_v5  ;;  %v1773_v43 = vadd.f32 %v1771_v36, %v1729_v32  ;;  %v5402_v7 = vstv %s5345_s12  ;;  %s5412_s12 = sld [smem:[#allocation137_spill]] }
 0x2b8   : > { %v1554_v25 = vadd.f32 %v1552_v6, %v4117_v37  ;;  %v1596_v42 = vmul.f32 %v5402_v7, %v4307_v58  ;;  %v5403_v53 = vstv %s5394_s3  ;;  %v1703_v24 = vadd.f32 %v1701_v59, %v1659_v60 }
 0x2b9   : > { %v1815_v63 = vmul.f32 %v5403_v53, %v4294_v21  ;;  %v5404_v14 = vstv %s5395_s23  ;;  %v5405_v15 = vstv %s5396_s24  ;;  %1847 = vrot.lane.b32.xlu1 %v1812_v49, %s2663_s28  ;;  %v1829_v27 = vadd.f32 %v1827_v31, %v1785_v54  ;;  %s5413_s28 = sld [smem:[#allocation138_spill]] }
 0x2ba   : > { %v1745_v20 = vmul.f32 %v5404_v14, %v4281_v4  ;;  %v1789_v13 = vmul.f32 %v5405_v15, %v4283_v12  ;;  %v1598_v26 = vadd.f32 %v1596_v42, %v1554_v25  ;;  %v5407_v37 = vstv %s5368_s22  ;;  %s5414_s22 = sld [smem:[#allocation139_spill]] }
 0x2bb   : > { %v1640_v8 = vmul.f32 %v5407_v37, %v4327_v51  ;;  %v5408_v52 = vstv %s5400_s7  ;;  %v5409_v36 = vstv %s5401_s8  ;;  %v5410_v23 = vstv %s5373_s29  ;;  %1875 = vrot.lane.b32.xlu0 %v1829_v27, %s5015_s17  ;;  %s5417_s29 = sld [smem:[#allocation140_spill]]  ;;  %s5420_s17 = sld [smem:[#allocation141_spill]] }
 0x2bc   : > { %v1575_v56 = vmul.f32 %v5408_v52, %v4218_v11  ;;  %v1747_v22 = vadd.f32 %v1745_v20, %v1703_v24  ;;  %v1833_v61 = vmul.f32 %v5409_v36, %v4294_v21  ;;  %v1684_v29 = vmul.f32 %v5410_v23, %v4329_v44 }
 0x2bd   : > { %v5411_v5 = vstv %s5382_s4  ;;  %v1817_v32 = vadd.f32 %v1815_v63, %v1773_v43  ;;  %v1642_v40 = vadd.f32 %v1640_v8, %v1598_v26  ;;  %v5415_v17 = vstv %s5406_s30  ;;  %s2666_s4 = smov 126  }
 0x2be   : > { %v1728_v54 = vmul.f32 %v5411_v5, %v4344_v55  ;;  %v1577_v6 = vadd.f32 %v1575_v56, %v4194_v47  ;;  %v1619_v31 = vmul.f32 %v5415_v17, %v4220_v45  ;;  %v1791_v60 = vadd.f32 %v1789_v13, %v1747_v22 }
 0x2bf   : > { %v5416_v0 = vstv %s5384_s5  ;;  %v5418_v49 = vmov %v5403_v53  ;;  %v5419_v7 = vstv %s5317_s6  ;;  %1855 = vrot.lane.b32.xlu1 %v1817_v32, %s2666_s4  ;;  %v1686_v47 = vadd.f32 %v1684_v29, %v1642_v40  ;;  %s2667_s6 = smov 123  }
 0x2c0   : > { %v1772_v59 = vmul.f32 %v5416_v0, %v4346_v39  ;;  %v1816_v25 = vmul.f32 %v5418_v49, %v4368_v3  ;;  %v1558_v42 = vmul.f32 %v5419_v7, %v4296_v46  ;;  %v1621_v43 = vadd.f32 %v1619_v31, %v1577_v6 }
 0x2c1   : > { %v5421_v53 = vstv %s5412_s12  ;;  %v5422_v24 = vstv %s5413_s28  ;;  %v1835_v20 = vadd.f32 %v1833_v61, %v1791_v60  ;;  %v5423_v15 = vstv %s5414_s22 }
 0x2c2   : > { %v1663_v63 = vmul.f32 %v5421_v53, %v4222_v35  ;;  %v1707_v14 = vmul.f32 %v5422_v24, %v4241_v1  ;;  %v1751_v13 = vmul.f32 %v5423_v15, %v4281_v4  ;;  %v1560_v27 = vadd.f32 %v1558_v42, %v4208_v16 }
 0x2c3   : > { %v5424_v26 = vstv %s5329_s10  ;;  %v1730_v8 = vadd.f32 %v1728_v54, %v1686_v47  ;;  %v5425_v56 = vstv %s5417_s29  ;;  %v5426_v36 = vstv %s5336_s20  ;;  %1885 = vrot.lane.b32.xlu0 %v1835_v20, %s2667_s6  ;;  %s4514_s10 = sld [smem:[#allocation8 + $0x3f]]  ;;  %s5447_s20 = sld [smem:[#allocation142_spill]] }
 0x2c4   : > { %v1602_v37 = vmul.f32 %v5424_v26, %v4307_v58  ;;  %v1665_v52 = vadd.f32 %v1663_v63, %v1621_v43  ;;  %v1795_v22 = vmul.f32 %v5425_v56, %v4283_v12  ;;  %v1564_v61 = vmul.f32 %v5426_v36, %v4296_v46 }
 0x2c5   : > { %v5427_v23 = vstv %s5420_s17  ;;  %v5428_v5 = vstv %s5331_s14  ;;  %v5429_v32 = vstv %s5332_s19  ;;  %v1774_v6 = vadd.f32 %v1772_v59, %v1730_v8  ;;  %s2668_s14 = smov 122   ;;  %s4540_s19 = sld [smem:[#allocation8 + $0x46]] }
 0x2c6   : > { %v1839_v16 = vmul.f32 %v5427_v23, %v4294_v21  ;;  %v1604_v29 = vadd.f32 %v1602_v37, %v1560_v27  ;;  %v1646_v54 = vmul.f32 %v5428_v5, %v4327_v51  ;;  %v1690_v40 = vmul.f32 %v5429_v32, %v4329_v44 }
 0x2c7   : > { %v1709_v17 = vadd.f32 %v1707_v14, %v1665_v52  ;;  %v1566_v31 = vadd.f32 %v1564_v61, %v4210_v57  ;;  %v5430_v60 = vstv %s5338_s21  ;;  %v5431_v7 = vstv %s5354_s15  ;;  %s4553_s21 = sld [smem:[#allocation8 + $0x4d]]  ;;  %s4564_s15 = sld [smem:[#allocation8 + $0x54]] }
 0x2c8   : > { %v1608_v0 = vmul.f32 %v5430_v60, %v4307_v58  ;;  %v1648_v49 = vadd.f32 %v1646_v54, %v1604_v29  ;;  %v1734_v42 = vmul.f32 %v5431_v7, %v4344_v55  ;;  %v5432_v47 = vstv %s5356_s13  ;;  %s5457_s13 = sld [smem:[#allocation144_spill]] }
 0x2c9   : > { %v1778_v43 = vmul.f32 %v5432_v47, %v4346_v39  ;;  %v5433_v53 = vstv %s5374_s9  ;;  %v1818_v24 = vadd.f32 %v1816_v25, %v1774_v6  ;;  %v1753_v59 = vadd.f32 %v1751_v13, %v1709_v17  ;;  %s5462_s9 = smov 124  }
 0x2ca   : > { %v1570_v63 = vmul.f32 %v5433_v53, %v4296_v46  ;;  %v1610_v14 = vadd.f32 %v1608_v0, %v1566_v31  ;;  %v5434_v57 = vstv %s5339_s11  ;;  %v1692_v15 = vadd.f32 %v1690_v40, %v1648_v49  ;;  %s5451_s11 = smov 125  }
 0x2cb   : > { %v1652_v20 = vmul.f32 %v5434_v57, %v4327_v51  ;;  %v5435_v27 = vstv %s5362_s16  ;;  %v5436_v8 = vstv %s5379_s2  ;;  %1857 = vrot.lane.b32.xlu1 %v1818_v24, %s2666_s4  ;;  %v1797_v25 = vadd.f32 %v1795_v22, %v1753_v59  ;;  %s4578_s16 = sld [smem:[#allocation8 + $0x5b]]  ;;  %s2669_s4 = smov [#allocation11]  }
 0x2cc   : > { %v1822_v26 = vmul.f32 %v5435_v27, %v4368_v3  ;;  %v1572_v37 = vadd.f32 %v1570_v63, %v4246_v2  ;;  %v1614_v52 = vmul.f32 %v5436_v8, %v4307_v58  ;;  %v5437_v56 = vstv %s5342_s18  ;;  %s5452_s18 = sld [smem:[#allocation143_spill]] }
 0x2cd   : > { %v1654_v13 = vadd.f32 %v1652_v20, %v1610_v14  ;;  %v1696_v36 = vmul.f32 %v5437_v56, %v4329_v44  ;;  %v5438_v61 = vstv %s5385_s25  ;;  %v1736_v29 = vadd.f32 %v1734_v42, %v1692_v15  ;;  %s5496_s25 = sld [smem:[#allocation20_spill]] }
 0x2ce   : > { %v1658_v23 = vmul.f32 %v5438_v61, %v4327_v51  ;;  %v1616_v2 = vadd.f32 %v1614_v52, %v1572_v37  ;;  %v1534_v5 = vadd.f32 %v4232_v50, %v4409_v62  ;;  %v5439_v22 = vstv %s5400_s7  ;;  %s5446_s7 = sld [smem:[#allocation146_spill]] }
 0x2cf   : > { %v1576_v54 = vmul.f32 %v5439_v22, %v4296_v46  ;;  %v1841_v32 = vadd.f32 %v1839_v16, %v1797_v25  ;;  %v1698_v40 = vadd.f32 %v1696_v36, %v1654_v13  ;;  %v5440_v6 = vstv %s5372_s0  ;;  %s5461_s0 = sld [smem:[#allocation145_spill]] }
 0x2d0   : > { %v1740_v17 = vmul.f32 %v5440_v6, %v4344_v55  ;;  %v5441_v31 = vstv %s5390_s26  ;;  %v1780_v0 = vadd.f32 %v1778_v43, %v1736_v29  ;;  %v1660_v49 = vadd.f32 %v1658_v23, %v1616_v2 }
 0x2d1   : > { %v1702_v60 = vmul.f32 %v5441_v31, %v4329_v44  ;;  %v1578_v7 = vadd.f32 %v1576_v54, %v1534_v5  ;;  %v5442_v42 = vstv %s5406_s30  ;;  %1895 = vrot.lane.b32.xlu0 %v1841_v32, %s2668_s14  ;;  %v5443_v16 = vstv %s5378_s1  ;;  %s5470_s1 = sld [smem:[#allocation25_spill]] }
 0x2d2   : > { %v1620_v50 = vmul.f32 %v5442_v42, %v4307_v58  ;;  %v1742_v62 = vadd.f32 %v1740_v17, %v1698_v40  ;;  %v1784_v47 = vmul.f32 %v5443_v16, %v4346_v39  ;;  %v5444_v53 = vstv %s5395_s23 }
 0x2d3   : > { %v1746_v63 = vmul.f32 %v5444_v53, %v4344_v55  ;;  %v5445_v43 = vstv %s5412_s12  ;;  %v1824_v59 = vadd.f32 %v1822_v26, %v1780_v0  ;;  %v1704_v14 = vadd.f32 %v1702_v60, %v1660_v49  ;;  %s2404_s26 = sshll.u32 %s5496_s25, 12  ;;  %s5504_s12 = sld [smem:[#allocation155_spill]] }
 0x2d4   : > { %v1664_v24 = vmul.f32 %v5445_v43, %v4327_v51  ;;  %v1622_v57 = vadd.f32 %v1620_v50, %v1578_v7  ;;  %v1409_v20 = vadd.f32 %v4251_v28, %v4234_v41  ;;  %v1786_v15 = vadd.f32 %v1784_v47, %v1742_v62 }
 0x2d5   : > { %v5448_v27 = vstv %s5389_s27  ;;  %v5449_v8 = vstv %s5396_s24  ;;  %v5450_v25 = vstv %s5413_s28  ;;  %1867 = vrot.lane.b32.xlu1 %v1824_v59, %s5451_s11  ;;  %v1748_v26 = vadd.f32 %v1746_v63, %v1704_v14  ;;  %s5455_s24 = sld [smem:[#allocation147_spill]] }
 0x2d6   : > { %v1828_v37 = vmul.f32 %v5448_v27, %v4368_v3  ;;  %v1790_v52 = vmul.f32 %v5449_v8, %v4346_v39  ;;  %v1708_v13 = vmul.f32 %v5450_v25, %v4329_v44  ;;  %v1666_v56 = vadd.f32 %v1664_v24, %v1622_v57 }
 0x2d7   : > { %v1453_v41 = vadd.f32 %v4258_v34, %v1409_v20  ;;  %v5453_v28 = vstv %s5446_s7  ;;  %v5454_v23 = vstv %s5414_s22  ;;  %v1626_v2 = vstv %s4514_s10  ;;  %s5473_s2 = sshll.u32 %s5470_s1, 8  ;;  %s2164_s22 = scalar_lea.sflag [#allocation5], %s5470_s1 }
 0x2d8   : > { %v1539_v36 = vmul.f32 %v5453_v28, %v4218_v11  ;;  %v1830_v61 = vadd.f32 %v1828_v37, %v1786_v15  ;;  %v1752_v29 = vmul.f32 %v5454_v23, %v4344_v55  ;;  %v5456_v5 = vstv %s5447_s20  ;;  %s4631_s5 = scalar_lea.vmem [#allocation11], %s5473_s2 }
 0x2d9   : > { %v1364_v22 = vmul.f32 %v5456_v5, %v3904_v9  ;;  %v1792_v54 = vadd.f32 %v1790_v52, %v1748_v26  ;;  %v1710_v32 = vadd.f32 %v1708_v13, %v1666_v56  ;;  %v1497_v34 = vadd.f32 %v4263_v10, %v1453_v41  ;;  %s2177_s3 = sshll.u32 %s4631_s5, 4  ;;  %s4726_s28 = scalar_lea.hbm %s5504_s12, %s2404_s26  ;;  %s4728_s3 = int_to_ptr.vmem [resolvable:$true] %s2177_s3 }
 0x2da   : > { %v1322_v11 = vadd.f32 %v4268_v30, %v4236_v18  ;;  %v5458_v40 = vstv %s5401_s8  ;;  %v5459_v17 = vstv %s5417_s29  ;;  %v5460_v9 = vstv %s5452_s18  ;;  %1877 = vrot.lane.b32.xlu1 %v1830_v61, %s5462_s9  ;;  %s1903_s8 = sld [smem:[#allocation10]]  ;;  %s2580_s29 = scalar_lea.vmem %s4728_s3, 4096 }
 0x2db   : > { %v1834_v6 = vmul.f32 %v5458_v40, %v4368_v3  ;;  %v1796_v31 = vmul.f32 %v5459_v17, %v4346_v39  ;;  %v1408_v60 = vmul.f32 %v5460_v9, %v3925_v19  ;;  %v1754_v10 = vadd.f32 %v1752_v29, %v1710_v32  ;;  %p2581_p12 = scmp.ne.s32.totalorder %s4728_s3, %s2580_s29 }
 0x2dc   : > { %v1541_v0 = vadd.f32 %v1539_v36, %v1497_v34  ;;  %v5463_v18 = vstv %s5455_s24  ;;  %v1366_v49 = vadd.f32 %v1364_v22, %v1322_v11  ;;  %v1627_v7 = vmul.f32 %v1626_v2, %v4222_v35 }
 0x2dd   : > { %v1583_v30 = vmul.f32 %v5463_v18, %v4220_v45  ;;  %v1670_v42 = vstv %s4540_s19  ;;  %v5464_v50 = vstv %s5457_s13  ;;  %v1836_v16 = vadd.f32 %v1834_v6, %v1792_v54  ;;  %p2582_p0 = pnand %p2581_p12, %p2813_p9 }
 0x2de   : > { %v1452_v62 = vmul.f32 %v5464_v50, %v3927_v33  ;;  %v1798_v47 = vadd.f32 %v1796_v31, %v1754_v10  ;;  %v1410_v53 = vadd.f32 %v1408_v60, %v1366_v49  ;;  %v5465_v63 = vstv %s5420_s17  ;;  %s2395_s17 = sld [smem:[#allocation10 + $0x1]] }
 0x2df   : > { %v1585_v19 = vadd.f32 %v1583_v30, %v1541_v0  ;;  %v1840_v43 = vmul.f32 %v5465_v63, %v4368_v3  ;;  %v1714_v24 = vstv %s4553_s21  ;;  %v5466_v45 = vstv %s5461_s0  ;;  %1887 = vrot.lane.b32.xlu1 %v1836_v16, %s2667_s6  ;;  %p2583_p3 = pneg %p2582_p0  ;;  %s2584_s6 = sshll.u32 %s2669_s4, 4  ;;  %s2585_s6 = int_to_ptr.vmem [resolvable:$false] %s2584_s6 }
 0x2e0   : > { %v1496_v59 = vmul.f32 %v5466_v45, %v3950_v38  ;;  %v1671_v14 = vmul.f32 %v1670_v42, %v4241_v1  ;;  %v1454_v57 = vadd.f32 %v1452_v62, %v1410_v53  ;;  %v5467_v33 = vmov %v5453_v28  ;;  %s2586_s10 = scalar_lea.vmem %s2585_s6, 8192  ;;  %p2587_p2 = scmp.lt.s32.totalorder %s4728_s3, %s2585_s6 }
 0x2e1   : > { %v1629_v35 = vadd.f32 %v1627_v7, %v1585_v19  ;;  %v1540_v20 = vmul.f32 %v5467_v33, %v4296_v46  ;;  %v1758_v15 = vstv %s4564_s15  ;;  %v1842_v27 = vadd.f32 %v1840_v43, %v1798_v47  ;;  %v5469_v33 = vld [vmem:[#allocation31_spill] sm:$0xff]  ;;  %p2588_p4 = scmp.lt.s32.totalorder %s2586_s10, %s2580_s29 }
 0x2e2   : > { %v1715_v8 = vmul.f32 %v1714_v24, %v4281_v4  ;;  %v1498_v52 = vadd.f32 %v1496_v59, %v1454_v57  ;;  %v1802_v25 = vstv %s4578_s16  ;;  %v1759_v38 = vmul.f32 %v1758_v15, %v4283_v12 }
 0x2e3   : > { %v1673_v37 = vadd.f32 %v1671_v14, %v1629_v35  ;;  %1897 = vrot.lane.b32.xlu1 %v1842_v27, %s2668_s14  ;;  %v5468_v26 = vmov %v5463_v18  ;;  %v1803_v41 = vmul.f32 %v1802_v25, %v4294_v21  ;;  %v1628_v46 = vmul.f32 %v1626_v2, %v4327_v51  ;;  %p2589_p6 = por %p2588_p4, %p2587_p2 }
 0x2e4   : > { %v1584_v56 = vmul.f32 %v5468_v26, %v4307_v58  ;;  %v1542_v1 = vadd.f32 %v1540_v20, %v1498_v52  ;;  %v1672_v4 = vmul.f32 %v1670_v42, %v4329_v44  ;;  %v1716_v29 = vmul.f32 %v1714_v24, %v4344_v55 }
 0x2e5   : > { %v1717_v13 = vadd.f32 %v1715_v8, %v1673_v37  ;;  %v1760_v12 = vmul.f32 %v1758_v15, %v4346_v39  ;;  %v1804_v54 = vmul.f32 %v1802_v25, %v4368_v3  ;;  %v1904_v39 = vstv %s1903_s8  ;;  %p2590_p8 = pnand %p2589_p6, %p2583_p3 }
 0x2e6   : > { %v1586_v36 = vadd.f32 %v1584_v56, %v1542_v1  ;;  %v1908_v3 = vstv %s2395_s17  ;;  %v1936_v20 = vsub.s32 1, %v5469_v33  ;;  %v1947_v27 = vsub.s32 2, %v5469_v33 }
 0x2e7   : > { %v1761_v28 = vadd.f32 %v1759_v38, %v1717_v13  ;;  %v1958_v8 = vsub.s32 3, %v5469_v33  ;;  %v1969_v38 = vsub.s32 4, %v5469_v33  ;;  %v1980_v56 = vsub.s32 5, %v5469_v33 }
 0x2e8   : > { %v1630_v23 = vadd.f32 %v1628_v46, %v1586_v36  ;;  %v2002_v46 = vsub.s32 7, %v5469_v33 }
 0x2e9   : > { %v1805_v61 = vadd.f32 %v1803_v41, %v1761_v28  ;;  %v1991_v41 = vsub.s32 6, %v5469_v33  ;;  %v5484_v33 = vld [vmem:[#allocation27_spill] sm:$0xff] }
 0x2ea   : > { %v1674_v5 = vadd.f32 %v1672_v4, %v1630_v23 }
 0x2ec   : > { %v1718_v22 = vadd.f32 %v1716_v29, %v1674_v5 }
 0x2ee   : > { %v1762_v58 = vadd.f32 %v1760_v12, %v1718_v22 }
 0x2f0   : > { %v1806_v32 = vadd.f32 %v1804_v54, %v1762_v58 }
 0x322   : > { %v1846_v34 = vpop.permute.xlu0 %1845 }
 0x323   : > { %v1851_v40 = vadd.f32 %v1846_v34, %v1805_v61  ;;  %v5471_v34 = vld [vmem:[#allocation33_spill] sm:$0xff] }
 0x326   : > { %v1866_v21 = vpop.permute.xlu0 %1865 }
 0x32b   : > { %v1848_v11 = vpop.permute.xlu1 %1847 }
 0x32c   : > { %v1852_v42 = vadd.f32 %v1848_v11, %v1806_v32  ;;  %v5472_v11 = vld [vmem:[#allocation32_spill] sm:$0xff] }
 0x32d   : > { %v1876_v51 = vpop.permute.xlu0 %1875 }
 0x331   : > { %v1856_v2 = vpop.permute.xlu1 %1855 }
 0x332   : > { %v1861_v6 = vadd.f32 %v1856_v2, %v1851_v40 }
 0x334   : > { %v1871_v17 = vadd.f32 %v1866_v21, %v1861_v6  ;;  %v5474_v6 = vld [vmem:[#allocation35_spill] sm:$0xff] }
 0x335   : > { %v1886_v31 = vpop.permute.xlu0 %1885 }
 0x336   : > { %v1881_v44 = vadd.f32 %v1876_v51, %v1871_v17 }
 0x338   : > { %v1891_v55 = vadd.f32 %v1886_v31, %v1881_v44  ;;  %v5475_v44 = vld [vmem:[#allocation34_spill] sm:$0xff] }
 0x33d   : > { %v1858_v9 = vpop.permute.xlu1 %1857 }
 0x33e   : > { %v1862_v50 = vadd.f32 %v1858_v9, %v1852_v42 }
 0x343   : > { %v1896_v60 = vpop.permute.xlu0 %1895 }
 0x344   : > { %v1901_v10 = vadd.f32 %v1896_v60, %v1891_v55 }
 0x346   : > { %v1905_v0 = vmul.f32 %v1904_v39, %v1901_v10  ;;  %v5477_v10 = vld [vmem:[#allocation40_spill] sm:$0xff] }
 0x347   : > { %v1868_v18 = vpop.permute.xlu1 %1867 }
 0x348   : > { %v1909_v30 = vadd.f32 %v1908_v3, %v1905_v0  ;;  %v1872_v16 = vadd.f32 %v1868_v18, %v1862_v50 }
 0x34a   : > { %v2396_v49 = vmul.f32 -1.442695, %v1909_v30  ;;  %v5478_v30 = vld [vmem:[#allocation44_spill] sm:$0xff] }
 0x34c   : > { %v1878_v7 = vpop.permute.xlu1 %1877  ;;  %2497 = vpow2.f32 %v2396_v49 }
 0x34d   : > { %v1882_v47 = vadd.f32 %v1878_v7, %v1872_v16  ;;  %v5479_v7 = vld [vmem:[#allocation43_spill] sm:$0xff]  ;;  %v5480_v16 = vld [vmem:[#allocation48_spill] sm:$0xff] }
 0x351   : > { %v1888_v62 = vpop.permute.xlu1 %1887 }
 0x352   : > { %v1892_v53 = vadd.f32 %v1888_v62, %v1882_v47 }
 0x355   : > { %v1898_v19 = vpop.permute.xlu1 %1897 }
 0x356   : > { %v2498_v63 = vpop.eup %2497  ;;  %v1902_v43 = vadd.f32 %v1898_v19, %v1892_v53  ;;  %v5481_v19 = vld [vmem:[#allocation47_spill] sm:$0xff] }
 0x357   : > { %v1917_v24 = vadd.f32 1.0, %v2498_v63 }
 0x358   : > { %v1906_v45 = vmul.f32 %v1904_v39, %v1902_v43  ;;  %v5476_v39 = vld [vmem:[#allocation26_spill] sm:$0xff] }
 0x359   : > { %2499 = vrcp.f32 %v1917_v24  ;;  %v5482_v24 = vld [vmem:[#allocation52_spill] sm:$0xff] }
 0x35a   : > { %v1910_v59 = vadd.f32 %v1908_v3, %v1906_v45 }
 0x35c   : > { %v2397_v35 = vmul.f32 -1.442695, %v1910_v59  ;;  %v5483_v59 = vld [vmem:[#allocation51_spill] sm:$0xff] }
 0x35e   : > { %2501 = vpow2.f32 %v2397_v35 }
 0x363   : > { %v2500_v14 = vpop.eup %2499 }
 0x364   : > { %v1926_v57 = vrot.slane %v2500_v14, %v3143_v48  ;;  %v1937_v15 = vrot.slane %v2500_v14, %v1936_v20  ;;  %v1948_v37 = vrot.slane %v2500_v14, %v1947_v27  ;;  %v1959_v25 = vrot.slane %v2500_v14, %v1958_v8 }
 0x365   : > { %v1970_v26 = vrot.slane %v2500_v14, %v1969_v38  ;;  %v1981_v1 = vrot.slane %v2500_v14, %v1980_v56  ;;  %v1992_v28 = vrot.slane %v2500_v14, %v1991_v41  ;;  %v2003_v36 = vrot.slane %v2500_v14, %v2002_v46 }
 0x366   : > { %1932 = vbcast.lane.b32.xlu1 %v1926_v57, 264  ;;  %1928 = vbcast.lane.b32.xlu0 %v1926_v57, 256 }
 0x368   : > { %v2502_v52 = vpop.eup %2501 }
 0x369   : > { %v1918_v13 = vadd.f32 1.0, %v2502_v52  ;;  %v5486_v52 = vld [vmem:[#allocation28_spill] sm:$0xff] }
 0x36a   : > { %1943 = vbcast.lane.b32.xlu1 %v1937_v15, 264  ;;  %1939 = vbcast.lane.b32.xlu0 %v1937_v15, 256  ;;  %v5485_v15 = vld [vmem:[#allocation54_spill] sm:$0xff] }
 0x36b   : > { %2503 = vrcp.f32 %v1918_v13 }
 0x36e   : > { %1954 = vbcast.lane.b32.xlu1 %v1948_v37, 264  ;;  %1950 = vbcast.lane.b32.xlu0 %v1948_v37, 256 }
 0x372   : > { %1965 = vbcast.lane.b32.xlu1 %v1959_v25, 264  ;;  %1961 = vbcast.lane.b32.xlu0 %v1959_v25, 256 }
 0x375   : > { %v2504_v61 = vpop.eup %2503 }
 0x376   : > { %1976 = vbcast.lane.b32.xlu1 %v1970_v26, 264  ;;  %1972 = vbcast.lane.b32.xlu0 %v1970_v26, 256  ;;  %v2014_v4 = vrot.slane %v2504_v61, %v3143_v48  ;;  %v2025_v23 = vrot.slane %v2504_v61, %v1936_v20  ;;  %v2036_v29 = vrot.slane %v2504_v61, %v1947_v27 }
 0x377   : > { %v2047_v5 = vrot.slane %v2504_v61, %v1958_v8  ;;  %v2058_v12 = vrot.slane %v2504_v61, %v1969_v38  ;;  %v2069_v22 = vrot.slane %v2504_v61, %v1980_v56  ;;  %v2080_v54 = vrot.slane %v2504_v61, %v1991_v41  ;;  %v5487_v38 = vld [vmem:[#allocation56_spill] sm:$0xff] }
 0x378   : > { %v2091_v48 = vrot.slane %v2504_v61, %v2002_v46 }
 0x37a   : > { %1987 = vbcast.lane.b32.xlu1 %v1981_v1, 264  ;;  %1983 = vbcast.lane.b32.xlu0 %v1981_v1, 256  ;;  %v5488_v1 = vld [vmem:[#allocation36_spill] sm:$0xff] }
 0x37e   : > { %1998 = vbcast.lane.b32.xlu1 %v1992_v28, 264  ;;  %1994 = vbcast.lane.b32.xlu0 %v1992_v28, 256  ;;  %v5489_v28 = vld [vmem:[#allocation37_spill] sm:$0xff] }
 0x382   : > { %2009 = vbcast.lane.b32.xlu1 %v2003_v36, 264  ;;  %2005 = vbcast.lane.b32.xlu0 %v2003_v36, 256 }
 0x386   : > { %2020 = vbcast.lane.b32.xlu1 %v2014_v4, 264  ;;  %2016 = vbcast.lane.b32.xlu0 %v2014_v4, 256  ;;  %v5490_v4 = vld [vmem:[#allocation38_spill] sm:$0xff] }
 0x38a   : > { %2031 = vbcast.lane.b32.xlu1 %v2025_v23, 264  ;;  %2027 = vbcast.lane.b32.xlu0 %v2025_v23, 256 }
 0x38e   : > { %2042 = vbcast.lane.b32.xlu1 %v2036_v29, 264  ;;  %2038 = vbcast.lane.b32.xlu0 %v2036_v29, 256  ;;  %v5491_v29 = vld [vmem:[#allocation39_spill] sm:$0xff] }
 0x392   : > { %2053 = vbcast.lane.b32.xlu1 %v2047_v5, 264  ;;  %2049 = vbcast.lane.b32.xlu0 %v2047_v5, 256 }
 0x396   : > { %2064 = vbcast.lane.b32.xlu1 %v2058_v12, 264  ;;  %2060 = vbcast.lane.b32.xlu0 %v2058_v12, 256 }
 0x39a   : > { %2075 = vbcast.lane.b32.xlu1 %v2069_v22, 264  ;;  %2071 = vbcast.lane.b32.xlu0 %v2069_v22, 256 }
 0x39e   : > { %2086 = vbcast.lane.b32.xlu1 %v2080_v54, 264  ;;  %2082 = vbcast.lane.b32.xlu0 %v2080_v54, 256  ;;  %v5492_v54 = vld [vmem:[#allocation41_spill] sm:$0xff] }
 0x3a2   : > { %2097 = vbcast.lane.b32.xlu1 %v2091_v48, 264  ;;  %2093 = vbcast.lane.b32.xlu0 %v2091_v48, 256 }
 0x3d8   : > { %v1929_v58 = vpop.permute.xlu0 %1928  ;;  %v1933_v32 = vpop.permute.xlu1 %1932 }
 0x3d9   : > { %v2099_v21 = vmul.f32 %v1929_v58, %v5471_v34  ;;  %v2100_v40 = vmul.f32 %v1933_v32, %v5472_v11  ;;  %v5493_v58 = vld [vmem:[#allocation42_spill] sm:$0xff]  ;;  %v5494_v11 = vld [vmem:[#allocation45_spill] sm:$0xff] }
 0x3db   : > { %2131 = vst.msk [vmem:[%s4631_s5] sm:$0xff] %vm368_vm0, %v2099_v21  ;;  %2132 = vst.msk [vmem:[%s4631_s5 + $0x8] sm:$0xff] %vm368_vm0, %v2100_v40 }
 0x3dc   : > { %v1940_v51 = vpop.permute.xlu0 %1939  ;;  %v1944_v2 = vpop.permute.xlu1 %1943 }
 0x3dd   : > { %v2101_v17 = vmul.f32 %v1940_v51, %v5474_v6  ;;  %v2102_v31 = vmul.f32 %v1944_v2, %v5475_v44  ;;  %v5495_v51 = vld [vmem:[#allocation46_spill] sm:$0xff]  ;;  %v5497_v44 = vld [vmem:[#allocation49_spill] sm:$0xff] }
 0x3df   : > { %2133 = vst.msk [vmem:[%s4631_s5 + $0x10] sm:$0xff] %vm368_vm0, %v2101_v17  ;;  %2134 = vst.msk [vmem:[%s4631_s5 + $0x18] sm:$0xff] %vm368_vm0, %v2102_v31 }
 0x3e0   : > { %v1951_v55 = vpop.permute.xlu0 %1950  ;;  %v1955_v9 = vpop.permute.xlu1 %1954 }
 0x3e1   : > { %v2103_v60 = vmul.f32 %v1951_v55, %v5476_v39  ;;  %v2104_v3 = vmul.f32 %v1955_v9, %v5477_v10  ;;  %v5498_v55 = vld [vmem:[#allocation50_spill] sm:$0xff]  ;;  %v5499_v10 = vld [vmem:[#allocation53_spill] sm:$0xff] }
 0x3e3   : > { %2135 = vst.msk [vmem:[%s4631_s5 + $0x20] sm:$0xff] %vm368_vm0, %v2103_v60  ;;  %2136 = vst.msk [vmem:[%s4631_s5 + $0x28] sm:$0xff] %vm368_vm0, %v2104_v3 }
 0x3e4   : > { %v1962_v0 = vpop.permute.xlu0 %1961  ;;  %v1966_v18 = vpop.permute.xlu1 %1965 }
 0x3e5   : > { %v2105_v49 = vmul.f32 %v1962_v0, %v5478_v30  ;;  %v2106_v42 = vmul.f32 %v1966_v18, %v5479_v7  ;;  %v5500_v0 = vld [vmem:[#allocation29_spill] sm:$0xff]  ;;  %v5501_v7 = vld [vmem:[#allocation55_spill] sm:$0xff] }
 0x3e7   : > { %2137 = vst.msk [vmem:[%s4631_s5 + $0x30] sm:$0xff] %vm368_vm0, %v2105_v49  ;;  %2138 = vst.msk [vmem:[%s4631_s5 + $0x38] sm:$0xff] %vm368_vm0, %v2106_v42 }
 0x3e8   : > { %v1973_v50 = vpop.permute.xlu0 %1972  ;;  %v1977_v62 = vpop.permute.xlu1 %1976 }
 0x3e9   : > { %v2107_v47 = vmul.f32 %v1973_v50, %v5480_v16  ;;  %v2108_v53 = vmul.f32 %v1977_v62, %v5481_v19  ;;  %v5502_v50 = vld [vmem:[#allocation30_spill] sm:$0xff]  ;;  %v5505_v19 = vld [vmem:[#allocation57_spill] sm:$0xff] }
 0x3eb   : > { %2139 = vst.msk [vmem:[%s4631_s5 + $0x40] sm:$0xff] %vm368_vm0, %v2107_v47  ;;  %2140 = vst.msk [vmem:[%s4631_s5 + $0x48] sm:$0xff] %vm368_vm0, %v2108_v53 }
 0x3ec   : > { %v1984_v63 = vpop.permute.xlu0 %1983  ;;  %v1988_v43 = vpop.permute.xlu1 %1987 }
 0x3ed   : > { %v2109_v45 = vmul.f32 %v1984_v63, %v5482_v24  ;;  %v2110_v35 = vmul.f32 %v1988_v43, %v5483_v59  ;;  %v5506_v63 = vld [vmem:[#allocation58_spill] sm:$0xff] }
 0x3ef   : > { %2141 = vst.msk [vmem:[%s4631_s5 + $0x50] sm:$0xff] %vm368_vm0, %v2109_v45  ;;  %2142 = vst.msk [vmem:[%s4631_s5 + $0x58] sm:$0xff] %vm368_vm0, %v2110_v35 }
 0x3f0   : > { %v1995_v14 = vpop.permute.xlu0 %1994  ;;  %v1999_v57 = vpop.permute.xlu1 %1998 }
 0x3f1   : > { %v2111_v20 = vmul.f32 %v1995_v14, %v5484_v33  ;;  %v2112_v27 = vmul.f32 %v1999_v57, %v5485_v15 }
 0x3f3   : > { %2143 = vst.msk [vmem:[%s4631_s5 + $0x60] sm:$0xff] %vm368_vm0, %v2111_v20  ;;  %2144 = vst.msk [vmem:[%s4631_s5 + $0x68] sm:$0xff] %vm368_vm0, %v2112_v27 }
 0x3f4   : > { %v2006_v37 = vpop.permute.xlu0 %2005  ;;  %v2010_v8 = vpop.permute.xlu1 %2009 }
 0x3f5   : > { %v2113_v25 = vmul.f32 %v2006_v37, %v5486_v52  ;;  %v2114_v13 = vmul.f32 %v2010_v8, %v5487_v38 }
 0x3f7   : > { %2145 = vst.msk [vmem:[%s4631_s5 + $0x70] sm:$0xff] %vm368_vm0, %v2113_v25  ;;  %2146 = vst.msk [vmem:[%s4631_s5 + $0x78] sm:$0xff] %vm368_vm0, %v2114_v13 }
 0x3f8   : > { %v2021_v26 = vpop.permute.xlu1 %2020  ;;  %v2017_v56 = vpop.permute.xlu0 %2016 }
 0x3f9   : > { %v2116_v41 = vmul.f32 %v2021_v26, %v5488_v1  ;;  %v2115_v46 = vmul.f32 %v2017_v56, %v5489_v28 }
 0x3fb   : > { %2148 = vst.msk [vmem:[%s4631_s5 + $0x88] sm:$0xff] %vm368_vm0, %v2116_v41  ;;  %2147 = vst.msk [vmem:[%s4631_s5 + $0x80] sm:$0xff] %vm368_vm0, %v2115_v46 }
 0x3fc   : > { %v2032_v36 = vpop.permute.xlu1 %2031  ;;  %v2028_v61 = vpop.permute.xlu0 %2027 }
 0x3fd   : > { %v2118_v23 = vmul.f32 %v2032_v36, %v5490_v4  ;;  %v2117_v5 = vmul.f32 %v2028_v61, %v5491_v29 }
 0x3ff   : > { %2150 = vst.msk [vmem:[%s4631_s5 + $0x98] sm:$0xff] %vm368_vm0, %v2118_v23  ;;  %2149 = vst.msk [vmem:[%s4631_s5 + $0x90] sm:$0xff] %vm368_vm0, %v2117_v5 }
 0x400   : > { %v2043_v12 = vpop.permute.xlu1 %2042  ;;  %v2039_v22 = vpop.permute.xlu0 %2038 }
 0x401   : > { %v2120_v48 = vmul.f32 %v2043_v12, %v5492_v54  ;;  %v2119_v32 = vmul.f32 %v2039_v22, %v5493_v58 }
 0x403   : > { %2152 = vst.msk [vmem:[%s4631_s5 + $0xa8] sm:$0xff] %vm368_vm0, %v2120_v48  ;;  %2151 = vst.msk [vmem:[%s4631_s5 + $0xa0] sm:$0xff] %vm368_vm0, %v2119_v32 }
 0x404   : > { %v2054_v34 = vpop.permute.xlu1 %2053  ;;  %v2050_v21 = vpop.permute.xlu0 %2049 }
 0x405   : > { %v2122_v40 = vmul.f32 %v2054_v34, %v5494_v11  ;;  %v2121_v2 = vmul.f32 %v2050_v21, %v5495_v51 }
 0x407   : > { %2154 = vst.msk [vmem:[%s4631_s5 + $0xb8] sm:$0xff] %vm368_vm0, %v2122_v40  ;;  %2153 = vst.msk [vmem:[%s4631_s5 + $0xb0] sm:$0xff] %vm368_vm0, %v2121_v2 }
 0x408   : > { %v2065_v6 = vpop.permute.xlu1 %2064  ;;  %v2061_v17 = vpop.permute.xlu0 %2060 }
 0x409   : > { %v2124_v31 = vmul.f32 %v2065_v6, %v5497_v44  ;;  %v2123_v9 = vmul.f32 %v2061_v17, %v5498_v55 }
 0x40b   : > { %2156 = vst.msk [vmem:[%s4631_s5 + $0xc8] sm:$0xff] %vm368_vm0, %v2124_v31  ;;  %2155 = vst.msk [vmem:[%s4631_s5 + $0xc0] sm:$0xff] %vm368_vm0, %v2123_v9 }
 0x40c   : > { %v2076_v39 = vpop.permute.xlu1 %2075  ;;  %v2072_v60 = vpop.permute.xlu0 %2071 }
 0x40d   : > { %v2126_v3 = vmul.f32 %v2076_v39, %v5499_v10  ;;  %v2125_v18 = vmul.f32 %v2072_v60, %v5500_v0 }
 0x40f   : > { %2158 = vst.msk [vmem:[%s4631_s5 + $0xd8] sm:$0xff] %vm368_vm0, %v2126_v3  ;;  %2157 = vst.msk [vmem:[%s4631_s5 + $0xd0] sm:$0xff] %vm368_vm0, %v2125_v18 }
 0x410   : > { %v2087_v30 = vpop.permute.xlu1 %2086  ;;  %v2083_v49 = vpop.permute.xlu0 %2082 }
 0x411   : > { %v2128_v42 = vmul.f32 %v2087_v30, %v5501_v7  ;;  %v2127_v62 = vmul.f32 %v2083_v49, %v5502_v50 }
 0x413   : > { %2160 = vst.msk [vmem:[%s4631_s5 + $0xe8] sm:$0xff] %vm368_vm0, %v2128_v42  ;;  %2159 = vst.msk [vmem:[%s4631_s5 + $0xe0] sm:$0xff] %vm368_vm0, %v2127_v62 }
 0x414   : > { %v2098_v16 = vpop.permute.xlu1 %2097  ;;  %v2094_v47 = vpop.permute.xlu0 %2093 }
 0x415   : > { %v2130_v53 = vmul.f32 %v2098_v16, %v5505_v19  ;;  %v2129_v43 = vmul.f32 %v2094_v47, %v5506_v63 }
 0x417   : > { %2162 = vst.msk [vmem:[%s4631_s5 + $0xf8] sm:$0xff] %vm368_vm0, %v2130_v53  ;;  %2161 = vst.msk [vmem:[%s4631_s5 + $0xf0] sm:$0xff] %vm368_vm0, %v2129_v43 }
 0x418   : > { %2593 = shalt.err (!%p2590_p8)
}
 0x419   : > { %s2594_s14 = scalar_lea.hbm %s4726_s28, 4096  ;;  %s2598_s20 = scalar_lea.hbm %s5504_s12, 8192 }
 0x41a   : > { %p2595_p1 = scmp.ne.s32.totalorder %s4726_s28, %s2594_s14  ;;  %p2599_p13 = scmp.lt.u32.totalorder %s4726_s28, %s5504_s12 }
 0x41b   : > { %p2600_p7 = scmp.lt.u32.totalorder %s2598_s20, %s2594_s14  ;;  %p2602_p12 = scmp.lt.u32.totalorder %s2594_s14, %s4726_s28 }
 0x41c   : > { %p2596_p5 = pnand %p2595_p1, %p2813_p9 }
 0x41d   : > { %p2601_p10 = por %p2600_p7, %p2599_p13 }
 0x41e   : > { %p2597_p11 = pneg %p2596_p5 }
 0x41f   : > { %p2603_p0 = por %p2602_p12, %p2601_p10 }
 0x421   : > { %p2604_p3 = pnand %p2603_p0, %p2597_p11 }
 0x423   : > { %2607 = shalt.err (!%p2604_p3)
}
 0x424   : > { %s2670_s18 = smov 128   ;;  %s2671_s24 = smov 8  }
 0x425   : > { %2419 = dma.vmem_to_hbm [thread:$0]  (%p2813_p9), %s4728_s3, 4096, %s4726_s28, %s2164_s22, %s2670_s18, %s2670_s18, %s2671_s24  }
 0x426 PF: > { %s5507_s15 = sld [smem:[#allocation16_spill]]  ;;  %s5508_s13 = sld [smem:[#allocation21_spill]] }
 0x427   : > { %s5509_s16 = sld [smem:[#allocation19_spill]] }
 0x42c   : > { %s2192_s0 = sand.u32 1, %s5507_s15   ;;  %p5510_p2 = scmp.ne.s32.totalorder %s5508_s13, 0 }
 0x42d   : > { %p5511_p4 = scmp.ge.s32.totalorder %s5509_s16, 2  ;;  %s2193_s9 = scalar_lea.sflag [#allocation5], %s2192_s0 }
 0x42f   : > { %p2436_p6 = pnand %p5511_p4, %p5510_p2 }
 0x431   : > { %2637 = dma.done.wait (!%p2436_p6), %s2193_s9, 4096  }
 0x432   : > { %2639 = vsyncadd (!%p2436_p6), %s2193_s9, 4294963200  ;;  %s5512_s27 = sld [smem:[#allocation22_spill]]  ;;  %s5513_s24 = sld [smem:[#allocation17_spill]] }
 0x433   : > { %s5514_s25 = sld [smem:[#allocation18_spill]]  ;;  %s5515_s26 = sld [smem:[#allocation23_spill]] }
 0x438   : > { %p22_p8 = scmp.ge.s32.totalorder %s5512_s27, 4  }
 0x43a   :  { %24 = sbr.rel (!%p22_p8) target bundleno = 16 (0x10), region = 107 }
 0x441   :  { %2198 = vsyncpa [#allocation4], 1 }
 0x442   :  { %2200 = vsyncpa [#allocation4 + $0x1], 1 }
 0x443   :  { %2201 = vsyncpa [#allocation5], 1 }
 0x444   :  { %2203 = vsyncpa [#allocation5 + $0x1], 1 }
 0x445   :  { %2204 = vsyncpa [#allocation6], 1 }
 0x446   :  { %2206 = vsyncpa [#allocation6 + $0x1], 1 }
 0x447   :  { %2207 = vsyncpa [#allocation9], 1 }

</bundles_post_ra>
